<compile_context>
chip_gen: v7x
topology: tpu7x:2x2x1
jax: 0.10.0
libtpu: 0.0.40
codegen_flags: <defaults>
</compile_context>

<pallas_src>
import functools
import math

import jax
import jax.numpy as jnp
from jax import lax
from jax.experimental import pallas as pl
from jax.experimental.pallas import tpu as pltpu

LN_EPS = 1e-5
LANE = 128


# ------------------------------ in-kernel helpers ------------------------------

def _round_up(n, m):
    return ((n + m - 1) // m) * m


def _fdot(a, b):
    # f32 MXU matmul (recurrent path: keep state/weights in f32)
    return jnp.dot(a, b, preferred_element_type=jnp.float32)


def _bdot(a, b):
    # bf16 MXU operands, f32 accumulate (non-recurrent / batched matmuls)
    return jnp.dot(a.astype(jnp.bfloat16), b.astype(jnp.bfloat16),
                   preferred_element_type=jnp.float32)


def _layernorm(x, gamma, beta):
    mean = jnp.mean(x, axis=-1, keepdims=True)
    var = jnp.mean((x - mean) ** 2, axis=-1, keepdims=True)
    return (x - mean) * lax.rsqrt(var + LN_EPS) * gamma + beta


def _gelu(x):
    # exact (erf) GELU, matching torch.nn.GELU() default
    return 0.5 * x * (1.0 + lax.erf(x * (1.0 / math.sqrt(2.0))))


# ------------------------------ encoder kernel ------------------------------

def encoder_kernel(x_ref, wp_ref, bp_ref, g1_ref, be1_ref,
                   wih0_ref, b0_ref, whh0_ref,
                   w1stk_ref, b1_ref,
                   wa_ref, ba_ref,
                   wm_ref, bm_ref, gm_ref, bem_ref,
                   whead_ref, bhead_ref,
                   head_ref, *, S, B, H):
    # ---- batch-major input projection + LayerNorm (layout-agnostic, bf16 MXU operands) ----
    xp = _layernorm(_bdot(x_ref[...], wp_ref[...]) + bp_ref[...],
                    g1_ref[...], be1_ref[...])                         # (B*S, H) f32

    # ---- LSTM layer 0: input-side gates for ALL timesteps hoisted into ONE wide matmul ----
    # combined bias (b_ih + b_hh) folded; kept as a traced value (no scratch round trip).
    gi = (_bdot(xp, wih0_ref[...]) + b0_ref[...]).reshape(B, S, 4 * H)  # (B, S, 4H) f32

    # loop-invariant weights / broadcasts hoisted out of the recurrence
    whh0 = whh0_ref[...]                                   # (H, 4H)  f32
    w1stk = w1stk_ref[...]                                 # (2H, 4H) f32
    b1 = jnp.broadcast_to(b1_ref[...], (B, 4 * H))
    wa = wa_ref[...]                                       # (1, H)
    ba = ba_ref[...]                                       # (1, 1)

    h0 = jnp.zeros((B, H), jnp.float32)
    c0 = jnp.zeros((B, H), jnp.float32)
    h1 = jnp.zeros((B, H), jnp.float32)
    c1 = jnp.zeros((B, H), jnp.float32)

    h1_steps = []
    score_steps = []
    # fully unrolled time loop (S is small & static here)
    # TODO(synk): at production S use lax.fori_loop(..., unroll=2-4) with an aligned
    # (S, B, 4H)/(S, B, H) VMEM scratch instead of full unroll (vreg pressure / code size).
    for t in range(S):
        # layer 0: ONE fused (B,H)@(H,4H) recurrent matmul; gates = static lane slices
        g = gi[:, t, :] + _fdot(h0, whh0)
        i0 = jax.nn.sigmoid(g[:, 0 * H:1 * H])
        f0 = jax.nn.sigmoid(g[:, 1 * H:2 * H])
        gg = jnp.tanh(g[:, 2 * H:3 * H])
        o0 = jax.nn.sigmoid(g[:, 3 * H:4 * H])
        c0 = f0 * c0 + i0 * gg
        h0 = o0 * jnp.tanh(c0)

        # layer 1: input + hidden side fused into ONE (B,2H)@(2H,4H) matmul
        g = _fdot(jnp.concatenate([h0, h1], axis=-1), w1stk) + b1
        i1 = jax.nn.sigmoid(g[:, 0 * H:1 * H])
        f1 = jax.nn.sigmoid(g[:, 1 * H:2 * H])
        gg = jnp.tanh(g[:, 2 * H:3 * H])
        o1 = jax.nn.sigmoid(g[:, 3 * H:4 * H])
        c1 = f1 * c1 + i1 * gg
        h1 = o1 * jnp.tanh(c1)
        h1_steps.append(h1)

        # attention score: VPU multiply + lane reduce, off the recurrence critical path
        score_steps.append(jnp.sum(h1 * wa, axis=-1, keepdims=True) + ba)

    # ---- temporal attention: (B, S) scores (time on lanes) -> lane-axis softmax ----
    scores = jnp.concatenate(score_steps, axis=-1)          # (B, S)
    attn = jax.nn.softmax(scores, axis=-1)
    context = jnp.zeros((B, H), jnp.float32)
    for t in range(S):
        context = context + attn[:, t:t + 1] * h1_steps[t]

    combined = context + h1                                 # h1 == hidden[-1]
    hid = _gelu(_layernorm(_bdot(combined, wm_ref[...]) + bm_ref[...],
                           gm_ref[...], bem_ref[...]))
    # fused mu|logvar head, zero-padded to a lane-dense 128-wide store (sliced in glue)
    head_ref[...] = _bdot(hid, whead_ref[...]) + bhead_ref[...]


# ------------------------------ decoder kernel ------------------------------

def decoder_kernel(head_ref, eps_ref,
                   wlp_ref, blp_ref, glp_ref, belp_ref,
                   wih0_ref, b0f_ref, bhh0n_ref, whh0_ref,
                   w1all_ref, b1all_ref,
                   wo1_ref, bo1_ref, go2_ref, beo2_ref, wo2_ref, bo2_ref,
                   out_ref, *, S, B, H, L):
    # ---- fused reparameterization: z = mu + eps * exp(0.5*logvar) ----
    head = head_ref[...]
    mu = head[:, 0:L]
    logvar = head[:, L:2 * L]
    z = mu + eps_ref[...] * jnp.exp(0.5 * logvar)

    # latent projection + LayerNorm
    hidden = _layernorm(_fdot(z, wlp_ref[...]) + blp_ref[...],
                        glp_ref[...], belp_ref[...])        # (B, H)

    # ---- GRU layer 0: decoder input is the SAME `hidden` every step -> its input-side
    # gates (with foldable r/z hh-biases) are computed exactly once. ----
    gi0 = _fdot(hidden, wih0_ref[...]) + b0f_ref[...]       # (B, 3H)
    bhh0_n = jnp.broadcast_to(bhh0n_ref[...], (B, H))

    # loop-invariant weights / broadcasts
    whh0 = whh0_ref[...]                                    # (H, 3H padded to 128 lanes) f32
    w1all = w1all_ref[...]                                  # (2H, 4H) f32
    b1all = jnp.broadcast_to(b1all_ref[...], (B, 4 * H))

    # initial GRU state = latent projection repeated across layers (matches init h repeat)
    h0 = hidden
    h1 = hidden

    h1_steps = []
    # TODO(synk): production S -> lax.fori_loop(unroll=2-4) + aligned (S,B,H) VMEM scratch.
    for t in range(S):
        # layer 0: ONE fused (B,H)@(H,3H->128) recurrent matmul
        gh = _fdot(h0, whh0)
        r = jax.nn.sigmoid(gi0[:, 0:H] + gh[:, 0:H])
        zz = jax.nn.sigmoid(gi0[:, H:2 * H] + gh[:, H:2 * H])
        n = jnp.tanh(gi0[:, 2 * H:3 * H] + r * (gh[:, 2 * H:3 * H] + bhh0_n))
        h0 = (1.0 - zz) * n + zz * h0

        # layer 1: ONE fused (B,2H)@(2H,4H) matmul; columns = [r | z | x@W_in | h@W_hn]
        g = _fdot(jnp.concatenate([h0, h1], axis=-1), w1all) + b1all
        r1 = jax.nn.sigmoid(g[:, 0:H])
        z1 = jax.nn.sigmoid(g[:, H:2 * H])
        n1 = jnp.tanh(g[:, 2 * H:3 * H] + r1 * g[:, 3 * H:4 * H])
        h1 = (1.0 - z1) * n1 + z1 * h1
        h1_steps.append(h1)

    # ---- batch-major (B*S, H) GRU output slab (row = b*S + t): no HBM transpose needed ----
    go = jnp.stack(h1_steps, axis=1).reshape(B * S, H)
    y = _gelu(_layernorm(_bdot(go, wo1_ref[...]) + bo1_ref[...],
                         go2_ref[...], beo2_ref[...]))
    out_ref[...] = _bdot(y, wo2_ref[...]) + bo2_ref[...]    # (B*S, 128) lane-dense


# ------------------------------ parameter init (PyTorch-like layout) ------------------------------

def _linear(key, fan_in, fan_out):
    kw, kb = jax.random.split(key)
    bound = 1.0 / math.sqrt(fan_in)
    w = jax.random.uniform(kw, (fan_in, fan_out), jnp.float32, -bound, bound)
    b = jax.random.uniform(kb, (1, fan_out), jnp.float32, -bound, bound)
    return w, b


def _rnn_layer(key, in_dim, hid_dim, n_gates):
    k1, k2, k3, k4 = jax.random.split(key, 4)
    bound = 1.0 / math.sqrt(hid_dim)
    wih = jax.random.uniform(k1, (in_dim, n_gates * hid_dim), jnp.float32, -bound, bound)
    whh = jax.random.uniform(k2, (hid_dim, n_gates * hid_dim), jnp.float32, -bound, bound)
    bih = jax.random.uniform(k3, (1, n_gates * hid_dim), jnp.float32, -bound, bound)
    bhh = jax.random.uniform(k4, (1, n_gates * hid_dim), jnp.float32, -bound, bound)
    return wih, whh, bih, bhh


def init_params(key, n_joints, n_dims, hidden_dim, latent_dim):
    ID = n_joints * n_dims
    H, L = hidden_dim, latent_dim
    ks = jax.random.split(key, 16)
    p = {}
    # encoder
    p["enc_wp"], p["enc_bp"] = _linear(ks[0], ID, H)
    p["enc_g1"], p["enc_be1"] = jnp.ones((1, H), jnp.float32), jnp.zeros((1, H), jnp.float32)
    p["enc_l0"] = _rnn_layer(ks[1], H, H, 4)
    p["enc_l1"] = _rnn_layer(ks[2], H, H, 4)
    p["enc_wa"], p["enc_ba"] = _linear(ks[3], H, 1)
    p["enc_wm"], p["enc_bm"] = _linear(ks[4], H, H)
    p["enc_gm"], p["enc_bem"] = jnp.ones((1, H), jnp.float32), jnp.zeros((1, H), jnp.float32)
    p["enc_wmu"], p["enc_bmu"] = _linear(ks[5], H, L)
    p["enc_wlv"], p["enc_blv"] = _linear(ks[6], H, L)
    # decoder
    p["dec_wlp"], p["dec_blp"] = _linear(ks[7], L, H)
    p["dec_glp"], p["dec_belp"] = jnp.ones((1, H), jnp.float32), jnp.zeros((1, H), jnp.float32)
    p["dec_l0"] = _rnn_layer(ks[8], H, H, 3)
    p["dec_l1"] = _rnn_layer(ks[9], H, H, 3)
    p["dec_w1"], p["dec_b1"] = _linear(ks[10], H, H)
    p["dec_g2"], p["dec_be2"] = jnp.ones((1, H), jnp.float32), jnp.zeros((1, H), jnp.float32)
    p["dec_w2"], p["dec_b2"] = _linear(ks[11], H, n_joints * n_dims)
    return p


# ------------------------------ packing helpers (glue) ------------------------------

def _pad_lanes(w, mult=LANE):
    pad = (-w.shape[-1]) % mult
    if pad:
        w = jnp.pad(w, ((0, 0), (0, pad)))
    return w


# ------------------------------ wrapper (glue) ------------------------------

def dance_vae_forward(params, x, eps_key, hidden_dim, latent_dim):
    B, S, J, D = x.shape
    ID = J * D
    H, L = hidden_dim, latent_dim
    HEADP = _round_up(2 * L, LANE)
    OUTP = _round_up(ID, LANE)
    bf16 = jnp.bfloat16

    # batch-major flat rows (row = b*S + t): a pure reshape, NO HBM transpose.
    x_bm = x.reshape(B * S, ID).astype(bf16)

    # --- encoder weight packing: fused gate stacks, fused/padded heads, bf16 MXU weights ---
    e_wih0, e_whh0, e_bih0, e_bhh0 = params["enc_l0"]        # (H,4H),(H,4H),(1,4H),(1,4H)
    e_wih1, e_whh1, e_bih1, e_bhh1 = params["enc_l1"]
    enc_b0 = e_bih0 + e_bhh0                                 # (1, 4H) combined layer-0 bias
    enc_w1stk = jnp.concatenate([e_wih1, e_whh1], axis=0)    # (2H, 4H) stacked [h0|h1] weight
    enc_b1 = e_bih1 + e_bhh1                                 # (1, 4H)
    wa_row = jnp.transpose(params["enc_wa"])                 # (1, H)
    whead = _pad_lanes(jnp.concatenate([params["enc_wmu"], params["enc_wlv"]], axis=1))
    bhead = _pad_lanes(jnp.concatenate([params["enc_bmu"], params["enc_blv"]], axis=1))

    vmem = pl.BlockSpec(memory_space=pltpu.MemorySpace.VMEM)
    # TODO(synk): at production S*B, grid the feed-forward matmuls over ~128-512-row blocks
    # (pipelined BlockSpecs), grid the recurrence over batch with
    # dimension_semantics=("parallel",) for v7x's 2nd TensorCore, and set a per-generation
    # vmem budget instead of whole-array residency. Tiny test shapes: defaults suffice.

    enc_inputs = (
        x_bm,
        params["enc_wp"].astype(bf16), params["enc_bp"], params["enc_g1"], params["enc_be1"],
        e_wih0.astype(bf16), enc_b0, e_whh0,
        enc_w1stk, enc_b1,
        wa_row, params["enc_ba"],
        params["enc_wm"].astype(bf16), params["enc_bm"], params["enc_gm"], params["enc_bem"],
        whead.astype(bf16), bhead,
    )
    head = pl.pallas_call(
        functools.partial(encoder_kernel, S=S, B=B, H=H),
        out_shape=jax.ShapeDtypeStruct((B, HEADP), jnp.float32),
        in_specs=[vmem] * len(enc_inputs),
        out_specs=vmem,
    )(*enc_inputs)
    mu = head[:, :L]
    logvar = head[:, L:2 * L]

    # standard-normal noise for the (in-kernel) reparameterization trick
    eps = jax.random.normal(eps_key, (B, L), jnp.float32)

    # --- decoder weight packing ---
    d_wih0, d_whh0, d_bih0, d_bhh0 = params["dec_l0"]        # (H,3H),(H,3H),(1,3H),(1,3H)
    d_wih1, d_whh1, d_bih1, d_bhh1 = params["dec_l1"]
    # layer 0: fold r/z hidden-side biases into the hoisted input-side bias; keep b_hn apart
    dec_b0f = d_bih0 + jnp.concatenate(
        [d_bhh0[:, :2 * H], jnp.zeros((1, H), jnp.float32)], axis=1)      # (1, 3H)
    dec_bhh0n = d_bhh0[:, 2 * H:3 * H]                                    # (1, H)
    dec_whh0 = _pad_lanes(d_whh0)                                         # (H, 3H) -> (H, 128)
    # layer 1: stacked [h0|h1] weight with column groups [r | z | x@W_in | h@W_hn]
    zH = jnp.zeros((H, H), jnp.float32)
    dec_w1all = jnp.concatenate([
        jnp.concatenate([d_wih1[:, :H], d_wih1[:, H:2 * H], d_wih1[:, 2 * H:3 * H], zH], axis=1),
        jnp.concatenate([d_whh1[:, :H], d_whh1[:, H:2 * H], zH, d_whh1[:, 2 * H:3 * H]], axis=1),
    ], axis=0)                                                            # (2H, 4H)
    dec_b1all = jnp.concatenate([
        d_bih1[:, :2 * H] + d_bhh1[:, :2 * H],
        d_bih1[:, 2 * H:3 * H], d_bhh1[:, 2 * H:3 * H]], axis=1)          # (1, 4H)
    w2p = _pad_lanes(params["dec_w2"])
    b2p = _pad_lanes(params["dec_b2"])

    dec_inputs = (
        head, eps,
        params["dec_wlp"], params["dec_blp"], params["dec_glp"], params["dec_belp"],
        d_wih0, dec_b0f, dec_bhh0n, dec_whh0,
        dec_w1all, dec_b1all,
        params["dec_w1"].astype(bf16), params["dec_b1"], params["dec_g2"], params["dec_be2"],
        w2p.astype(bf16), b2p,
    )
    out_flat = pl.pallas_call(
        functools.partial(decoder_kernel, S=S, B=B, H=H, L=L),
        out_shape=jax.ShapeDtypeStruct((B * S, OUTP), jnp.float32),
        in_specs=[vmem] * len(dec_inputs),
        out_specs=vmem,
    )(*dec_inputs)

    # batch-major output: drop lane padding, reshape back to (B, S, J, D) — no transpose.
    reconstructed = out_flat.reshape(B, S, OUTP)[:, :, :ID].reshape(B, S, J, D)
    return reconstructed, mu, logvar


# ------------------------------ main ------------------------------

if __name__ == "__main__":
    # small shapes consistent with the module
    B, S, J, D = 2, 8, 4, 3          # batch, seq, n_joints, n_dims
    HIDDEN, LATENT = 32, 16

    key = jax.random.PRNGKey(0)
    k_param, k_x, k_eps = jax.random.split(key, 3)

    params = init_params(k_param, J, D, HIDDEN, LATENT)
    x = jax.random.normal(k_x, (B, S, J, D), jnp.float32)

    recon, mu, logvar = dance_vae_forward(params, x, k_eps, HIDDEN, LATENT)
    jax.block_until_ready((recon, mu, logvar))

    assert recon.shape == (B, S, J, D)
    assert mu.shape == (B, LATENT) and logvar.shape == (B, LATENT)
    print("KERNEL_OK")
</pallas_src>

<mosaic_0001>
module attributes {stable_mosaic.version = 11 : i64} {
  func.func @encoder_kernel(%arg0: memref<16x12xbf16, #tpu.memory_space<vmem>>, %arg1: memref<12x32xbf16, #tpu.memory_space<vmem>>, %arg2: memref<1x32xf32, #tpu.memory_space<vmem>>, %arg3: memref<1x32xf32, #tpu.memory_space<vmem>>, %arg4: memref<1x32xf32, #tpu.memory_space<vmem>>, %arg5: memref<32x128xbf16, #tpu.memory_space<vmem>>, %arg6: memref<1x128xf32, #tpu.memory_space<vmem>>, %arg7: memref<32x128xf32, #tpu.memory_space<vmem>>, %arg8: memref<64x128xf32, #tpu.memory_space<vmem>>, %arg9: memref<1x128xf32, #tpu.memory_space<vmem>>, %arg10: memref<1x32xf32, #tpu.memory_space<vmem>>, %arg11: memref<1x1xf32, #tpu.memory_space<vmem>>, %arg12: memref<32x32xbf16, #tpu.memory_space<vmem>>, %arg13: memref<1x32xf32, #tpu.memory_space<vmem>>, %arg14: memref<1x32xf32, #tpu.memory_space<vmem>>, %arg15: memref<1x32xf32, #tpu.memory_space<vmem>>, %arg16: memref<32x128xbf16, #tpu.memory_space<vmem>>, %arg17: memref<1x128xf32, #tpu.memory_space<vmem>>, %arg18: memref<2x128xf32, #tpu.memory_space<vmem>>) attributes {dimension_semantics = [], scalar_prefetch = 0 : i64, scratch_operands = 0 : i64, tpu.core_type = #tpu.core_type<tc>} {
    %c0 = arith.constant 0 : index
    %c0_0 = arith.constant 0 : index
    %0 = vector.load %arg0[%c0, %c0_0] : memref<16x12xbf16, #tpu.memory_space<vmem>>, vector<16x12xbf16>
    %c0_1 = arith.constant 0 : index
    %c0_2 = arith.constant 0 : index
    %1 = vector.load %arg1[%c0_1, %c0_2] : memref<12x32xbf16, #tpu.memory_space<vmem>>, vector<12x32xbf16>
    %cst = arith.constant dense<0.000000e+00> : vector<16x32xf32>
    %2 = tpu.matmul %0, %1, %cst {dimension_numbers = #tpu.dot_dimension_numbers<[1], [0], [0], [1], [0, 0, 1, 1], [], []>} : vector<16x12xbf16>, vector<12x32xbf16>, vector<16x32xf32> -> vector<16x32xf32>
    %c0_3 = arith.constant 0 : index
    %c0_4 = arith.constant 0 : index
    %3 = vector.load %arg2[%c0_3, %c0_4] : memref<1x32xf32, #tpu.memory_space<vmem>>, vector<1x32xf32>
    %4 = vector.broadcast %3 : vector<1x32xf32> to vector<16x32xf32>
    %5 = arith.addf %2, %4 : vector<16x32xf32>
    %c0_5 = arith.constant 0 : index
    %c0_6 = arith.constant 0 : index
    %6 = vector.load %arg3[%c0_5, %c0_6] : memref<1x32xf32, #tpu.memory_space<vmem>>, vector<1x32xf32>
    %c0_7 = arith.constant 0 : index
    %c0_8 = arith.constant 0 : index
    %7 = vector.load %arg4[%c0_7, %c0_8] : memref<1x32xf32, #tpu.memory_space<vmem>>, vector<1x32xf32>
    %cst_9 = arith.constant dense<0.000000e+00> : vector<16xf32>
    %8 = vector.multi_reduction <add>, %5, %cst_9 [1] : vector<16x32xf32> to vector<16xf32>
    %9 = vector.shape_cast %8 : vector<16xf32> to vector<16x1xf32>
    %cst_10 = arith.constant 3.200000e+01 : f32
    %10 = vector.broadcast %cst_10 : f32 to vector<16x1xf32>
    %11 = arith.divf %9, %10 : vector<16x1xf32>
    %12 = vector.broadcast %11 : vector<16x1xf32> to vector<16x32xf32>
    %13 = arith.subf %5, %12 : vector<16x32xf32>
    %14 = arith.mulf %13, %13 : vector<16x32xf32>
    %cst_11 = arith.constant dense<0.000000e+00> : vector<16xf32>
    %15 = vector.multi_reduction <add>, %14, %cst_11 [1] : vector<16x32xf32> to vector<16xf32>
    %16 = vector.shape_cast %15 : vector<16xf32> to vector<16x1xf32>
    %cst_12 = arith.constant 3.200000e+01 : f32
    %17 = vector.broadcast %cst_12 : f32 to vector<16x1xf32>
    %18 = arith.divf %16, %17 : vector<16x1xf32>
    %19 = vector.broadcast %11 : vector<16x1xf32> to vector<16x32xf32>
    %20 = arith.subf %5, %19 : vector<16x32xf32>
    %cst_13 = arith.constant 9.99999974E-6 : f32
    %21 = vector.broadcast %cst_13 : f32 to vector<16x1xf32>
    %22 = arith.addf %18, %21 : vector<16x1xf32>
    %23 = math.rsqrt %22 : vector<16x1xf32>
    %24 = vector.broadcast %23 : vector<16x1xf32> to vector<16x32xf32>
    %25 = arith.mulf %20, %24 : vector<16x32xf32>
    %26 = vector.broadcast %6 : vector<1x32xf32> to vector<16x32xf32>
    %27 = arith.mulf %25, %26 : vector<16x32xf32>
    %28 = vector.broadcast %7 : vector<1x32xf32> to vector<16x32xf32>
    %29 = arith.addf %27, %28 : vector<16x32xf32>
    %c0_14 = arith.constant 0 : index
    %c0_15 = arith.constant 0 : index
    %30 = vector.load %arg5[%c0_14, %c0_15] : memref<32x128xbf16, #tpu.memory_space<vmem>>, vector<32x128xbf16>
    %31 = arith.truncf %29 : vector<16x32xf32> to vector<16x32xbf16>
    %cst_16 = arith.constant dense<0.000000e+00> : vector<16x128xf32>
    %32 = tpu.matmul %31, %30, %cst_16 {dimension_numbers = #tpu.dot_dimension_numbers<[1], [0], [0], [1], [0, 0, 1, 1], [], []>} : vector<16x32xbf16>, vector<32x128xbf16>, vector<16x128xf32> -> vector<16x128xf32>
    %c0_17 = arith.constant 0 : index
    %c0_18 = arith.constant 0 : index
    %33 = vector.load %arg6[%c0_17, %c0_18] : memref<1x128xf32, #tpu.memory_space<vmem>>, vector<1x128xf32>
    %34 = vector.broadcast %33 : vector<1x128xf32> to vector<16x128xf32>
    %35 = arith.addf %32, %34 : vector<16x128xf32>
    %36 = vector.shape_cast %35 : vector<16x128xf32> to vector<2x8x128xf32>
    %c0_19 = arith.constant 0 : index
    %c0_20 = arith.constant 0 : index
    %37 = vector.load %arg7[%c0_19, %c0_20] : memref<32x128xf32, #tpu.memory_space<vmem>>, vector<32x128xf32>
    %c0_21 = arith.constant 0 : index
    %c0_22 = arith.constant 0 : index
    %38 = vector.load %arg8[%c0_21, %c0_22] : memref<64x128xf32, #tpu.memory_space<vmem>>, vector<64x128xf32>
    %c0_23 = arith.constant 0 : index
    %c0_24 = arith.constant 0 : index
    %39 = vector.load %arg9[%c0_23, %c0_24] : memref<1x128xf32, #tpu.memory_space<vmem>>, vector<1x128xf32>
    %40 = vector.shape_cast %39 : vector<1x128xf32> to vector<1x128xf32>
    %41 = vector.broadcast %40 : vector<1x128xf32> to vector<2x128xf32>
    %c0_25 = arith.constant 0 : index
    %c0_26 = arith.constant 0 : index
    %42 = vector.load %arg10[%c0_25, %c0_26] : memref<1x32xf32, #tpu.memory_space<vmem>>, vector<1x32xf32>
    %c0_27 = arith.constant 0 : index
    %c0_28 = arith.constant 0 : index
    %43 = vector.load %arg11[%c0_27, %c0_28] : memref<1x1xf32, #tpu.memory_space<vmem>>, vector<1x1xf32>
    %cst_29 = arith.constant 0.000000e+00 : f32
    %44 = vector.broadcast %cst_29 : f32 to vector<2x32xf32>
    %cst_30 = arith.constant 0.000000e+00 : f32
    %45 = vector.broadcast %cst_30 : f32 to vector<2x32xf32>
    %cst_31 = arith.constant 0.000000e+00 : f32
    %46 = vector.broadcast %cst_31 : f32 to vector<2x32xf32>
    %cst_32 = arith.constant 0.000000e+00 : f32
    %47 = vector.broadcast %cst_32 : f32 to vector<2x32xf32>
    %48 = vector.extract_strided_slice %36 {offsets = [0, 0, 0], sizes = [2, 1, 128], strides = [1, 1, 1]} : vector<2x8x128xf32> to vector<2x1x128xf32>
    %49 = vector.shape_cast %48 : vector<2x1x128xf32> to vector<2x128xf32>
    %cst_33 = arith.constant dense<0.000000e+00> : vector<2x128xf32>
    %50 = tpu.matmul %44, %37, %cst_33 {dimension_numbers = #tpu.dot_dimension_numbers<[1], [0], [0], [1], [0, 0, 1, 1], [], []>} : vector<2x32xf32>, vector<32x128xf32>, vector<2x128xf32> -> vector<2x128xf32>
    %51 = arith.addf %49, %50 : vector<2x128xf32>
    %52 = vector.extract_strided_slice %51 {offsets = [0, 0], sizes = [2, 32], strides = [1, 1]} : vector<2x128xf32> to vector<2x32xf32>
    %53 = arith.negf %52 : vector<2x32xf32>
    %54 = math.exp %53 : vector<2x32xf32>
    %cst_34 = arith.constant 1.000000e+00 : f32
    %55 = vector.broadcast %cst_34 : f32 to vector<2x32xf32>
    %56 = arith.addf %55, %54 : vector<2x32xf32>
    %57 = arith.divf %55, %56 : vector<2x32xf32>
    %58 = vector.extract_strided_slice %51 {offsets = [0, 32], sizes = [2, 32], strides = [1, 1]} : vector<2x128xf32> to vector<2x32xf32>
    %59 = arith.negf %58 : vector<2x32xf32>
    %60 = math.exp %59 : vector<2x32xf32>
    %cst_35 = arith.constant 1.000000e+00 : f32
    %61 = vector.broadcast %cst_35 : f32 to vector<2x32xf32>
    %62 = arith.addf %61, %60 : vector<2x32xf32>
    %63 = arith.divf %61, %62 : vector<2x32xf32>
    %64 = vector.extract_strided_slice %51 {offsets = [0, 64], sizes = [2, 32], strides = [1, 1]} : vector<2x128xf32> to vector<2x32xf32>
    %65 = math.tanh %64 : vector<2x32xf32>
    %66 = vector.extract_strided_slice %51 {offsets = [0, 96], sizes = [2, 32], strides = [1, 1]} : vector<2x128xf32> to vector<2x32xf32>
    %67 = arith.negf %66 : vector<2x32xf32>
    %68 = math.exp %67 : vector<2x32xf32>
    %cst_36 = arith.constant 1.000000e+00 : f32
    %69 = vector.broadcast %cst_36 : f32 to vector<2x32xf32>
    %70 = arith.addf %69, %68 : vector<2x32xf32>
    %71 = arith.divf %69, %70 : vector<2x32xf32>
    %72 = arith.mulf %63, %45 : vector<2x32xf32>
    %73 = arith.mulf %57, %65 : vector<2x32xf32>
    %74 = arith.addf %72, %73 : vector<2x32xf32>
    %75 = math.tanh %74 : vector<2x32xf32>
    %76 = arith.mulf %71, %75 : vector<2x32xf32>
    %77 = tpu.concatenate %76, %46 in 1 : vector<2x32xf32>, vector<2x32xf32> -> vector<2x64xf32>
    %cst_37 = arith.constant dense<0.000000e+00> : vector<2x128xf32>
    %78 = tpu.matmul %77, %38, %cst_37 {dimension_numbers = #tpu.dot_dimension_numbers<[1], [0], [0], [1], [0, 0, 1, 1], [], []>} : vector<2x64xf32>, vector<64x128xf32>, vector<2x128xf32> -> vector<2x128xf32>
    %79 = arith.addf %78, %41 : vector<2x128xf32>
    %80 = vector.extract_strided_slice %79 {offsets = [0, 0], sizes = [2, 32], strides = [1, 1]} : vector<2x128xf32> to vector<2x32xf32>
    %81 = arith.negf %80 : vector<2x32xf32>
    %82 = math.exp %81 : vector<2x32xf32>
    %cst_38 = arith.constant 1.000000e+00 : f32
    %83 = vector.broadcast %cst_38 : f32 to vector<2x32xf32>
    %84 = arith.addf %83, %82 : vector<2x32xf32>
    %85 = arith.divf %83, %84 : vector<2x32xf32>
    %86 = vector.extract_strided_slice %79 {offsets = [0, 32], sizes = [2, 32], strides = [1, 1]} : vector<2x128xf32> to vector<2x32xf32>
    %87 = arith.negf %86 : vector<2x32xf32>
    %88 = math.exp %87 : vector<2x32xf32>
    %cst_39 = arith.constant 1.000000e+00 : f32
    %89 = vector.broadcast %cst_39 : f32 to vector<2x32xf32>
    %90 = arith.addf %89, %88 : vector<2x32xf32>
    %91 = arith.divf %89, %90 : vector<2x32xf32>
    %92 = vector.extract_strided_slice %79 {offsets = [0, 64], sizes = [2, 32], strides = [1, 1]} : vector<2x128xf32> to vector<2x32xf32>
    %93 = math.tanh %92 : vector<2x32xf32>
    %94 = vector.extract_strided_slice %79 {offsets = [0, 96], sizes = [2, 32], strides = [1, 1]} : vector<2x128xf32> to vector<2x32xf32>
    %95 = arith.negf %94 : vector<2x32xf32>
    %96 = math.exp %95 : vector<2x32xf32>
    %cst_40 = arith.constant 1.000000e+00 : f32
    %97 = vector.broadcast %cst_40 : f32 to vector<2x32xf32>
    %98 = arith.addf %97, %96 : vector<2x32xf32>
    %99 = arith.divf %97, %98 : vector<2x32xf32>
    %100 = arith.mulf %91, %47 : vector<2x32xf32>
    %101 = arith.mulf %85, %93 : vector<2x32xf32>
    %102 = arith.addf %100, %101 : vector<2x32xf32>
    %103 = math.tanh %102 : vector<2x32xf32>
    %104 = arith.mulf %99, %103 : vector<2x32xf32>
    %105 = vector.broadcast %42 : vector<1x32xf32> to vector<2x32xf32>
    %106 = arith.mulf %104, %105 : vector<2x32xf32>
    %cst_41 = arith.constant dense<0.000000e+00> : vector<2xf32>
    %107 = vector.multi_reduction <add>, %106, %cst_41 [1] : vector<2x32xf32> to vector<2xf32>
    %108 = vector.shape_cast %107 : vector<2xf32> to vector<2x1xf32>
    %109 = vector.broadcast %43 : vector<1x1xf32> to vector<2x1xf32>
    %110 = arith.addf %108, %109 : vector<2x1xf32>
    %111 = vector.extract_strided_slice %36 {offsets = [0, 1, 0], sizes = [2, 1, 128], strides = [1, 1, 1]} : vector<2x8x128xf32> to vector<2x1x128xf32>
    %112 = vector.shape_cast %111 : vector<2x1x128xf32> to vector<2x128xf32>
    %cst_42 = arith.constant dense<0.000000e+00> : vector<2x128xf32>
    %113 = tpu.matmul %76, %37, %cst_42 {dimension_numbers = #tpu.dot_dimension_numbers<[1], [0], [0], [1], [0, 0, 1, 1], [], []>} : vector<2x32xf32>, vector<32x128xf32>, vector<2x128xf32> -> vector<2x128xf32>
    %114 = arith.addf %112, %113 : vector<2x128xf32>
    %115 = vector.extract_strided_slice %114 {offsets = [0, 0], sizes = [2, 32], strides = [1, 1]} : vector<2x128xf32> to vector<2x32xf32>
    %116 = arith.negf %115 : vector<2x32xf32>
    %117 = math.exp %116 : vector<2x32xf32>
    %cst_43 = arith.constant 1.000000e+00 : f32
    %118 = vector.broadcast %cst_43 : f32 to vector<2x32xf32>
    %119 = arith.addf %118, %117 : vector<2x32xf32>
    %120 = arith.divf %118, %119 : vector<2x32xf32>
    %121 = vector.extract_strided_slice %114 {offsets = [0, 32], sizes = [2, 32], strides = [1, 1]} : vector<2x128xf32> to vector<2x32xf32>
    %122 = arith.negf %121 : vector<2x32xf32>
    %123 = math.exp %122 : vector<2x32xf32>
    %cst_44 = arith.constant 1.000000e+00 : f32
    %124 = vector.broadcast %cst_44 : f32 to vector<2x32xf32>
    %125 = arith.addf %124, %123 : vector<2x32xf32>
    %126 = arith.divf %124, %125 : vector<2x32xf32>
    %127 = vector.extract_strided_slice %114 {offsets = [0, 64], sizes = [2, 32], strides = [1, 1]} : vector<2x128xf32> to vector<2x32xf32>
    %128 = math.tanh %127 : vector<2x32xf32>
    %129 = vector.extract_strided_slice %114 {offsets = [0, 96], sizes = [2, 32], strides = [1, 1]} : vector<2x128xf32> to vector<2x32xf32>
    %130 = arith.negf %129 : vector<2x32xf32>
    %131 = math.exp %130 : vector<2x32xf32>
    %cst_45 = arith.constant 1.000000e+00 : f32
    %132 = vector.broadcast %cst_45 : f32 to vector<2x32xf32>
    %133 = arith.addf %132, %131 : vector<2x32xf32>
    %134 = arith.divf %132, %133 : vector<2x32xf32>
    %135 = arith.mulf %126, %74 : vector<2x32xf32>
    %136 = arith.mulf %120, %128 : vector<2x32xf32>
    %137 = arith.addf %135, %136 : vector<2x32xf32>
    %138 = math.tanh %137 : vector<2x32xf32>
    %139 = arith.mulf %134, %138 : vector<2x32xf32>
    %140 = tpu.concatenate %139, %104 in 1 : vector<2x32xf32>, vector<2x32xf32> -> vector<2x64xf32>
    %cst_46 = arith.constant dense<0.000000e+00> : vector<2x128xf32>
    %141 = tpu.matmul %140, %38, %cst_46 {dimension_numbers = #tpu.dot_dimension_numbers<[1], [0], [0], [1], [0, 0, 1, 1], [], []>} : vector<2x64xf32>, vector<64x128xf32>, vector<2x128xf32> -> vector<2x128xf32>
    %142 = arith.addf %141, %41 : vector<2x128xf32>
    %143 = vector.extract_strided_slice %142 {offsets = [0, 0], sizes = [2, 32], strides = [1, 1]} : vector<2x128xf32> to vector<2x32xf32>
    %144 = arith.negf %143 : vector<2x32xf32>
    %145 = math.exp %144 : vector<2x32xf32>
    %cst_47 = arith.constant 1.000000e+00 : f32
    %146 = vector.broadcast %cst_47 : f32 to vector<2x32xf32>
    %147 = arith.addf %146, %145 : vector<2x32xf32>
    %148 = arith.divf %146, %147 : vector<2x32xf32>
    %149 = vector.extract_strided_slice %142 {offsets = [0, 32], sizes = [2, 32], strides = [1, 1]} : vector<2x128xf32> to vector<2x32xf32>
    %150 = arith.negf %149 : vector<2x32xf32>
    %151 = math.exp %150 : vector<2x32xf32>
    %cst_48 = arith.constant 1.000000e+00 : f32
    %152 = vector.broadcast %cst_48 : f32 to vector<2x32xf32>
    %153 = arith.addf %152, %151 : vector<2x32xf32>
    %154 = arith.divf %152, %153 : vector<2x32xf32>
    %155 = vector.extract_strided_slice %142 {offsets = [0, 64], sizes = [2, 32], strides = [1, 1]} : vector<2x128xf32> to vector<2x32xf32>
    %156 = math.tanh %155 : vector<2x32xf32>
    %157 = vector.extract_strided_slice %142 {offsets = [0, 96], sizes = [2, 32], strides = [1, 1]} : vector<2x128xf32> to vector<2x32xf32>
    %158 = arith.negf %157 : vector<2x32xf32>
    %159 = math.exp %158 : vector<2x32xf32>
    %cst_49 = arith.constant 1.000000e+00 : f32
    %160 = vector.broadcast %cst_49 : f32 to vector<2x32xf32>
    %161 = arith.addf %160, %159 : vector<2x32xf32>
    %162 = arith.divf %160, %161 : vector<2x32xf32>
    %163 = arith.mulf %154, %102 : vector<2x32xf32>
    %164 = arith.mulf %148, %156 : vector<2x32xf32>
    %165 = arith.addf %163, %164 : vector<2x32xf32>
    %166 = math.tanh %165 : vector<2x32xf32>
    %167 = arith.mulf %162, %166 : vector<2x32xf32>
    %168 = vector.broadcast %42 : vector<1x32xf32> to vector<2x32xf32>
    %169 = arith.mulf %167, %168 : vector<2x32xf32>
    %cst_50 = arith.constant dense<0.000000e+00> : vector<2xf32>
    %170 = vector.multi_reduction <add>, %169, %cst_50 [1] : vector<2x32xf32> to vector<2xf32>
    %171 = vector.shape_cast %170 : vector<2xf32> to vector<2x1xf32>
    %172 = vector.broadcast %43 : vector<1x1xf32> to vector<2x1xf32>
    %173 = arith.addf %171, %172 : vector<2x1xf32>
    %174 = vector.extract_strided_slice %36 {offsets = [0, 2, 0], sizes = [2, 1, 128], strides = [1, 1, 1]} : vector<2x8x128xf32> to vector<2x1x128xf32>
    %175 = vector.shape_cast %174 : vector<2x1x128xf32> to vector<2x128xf32>
    %cst_51 = arith.constant dense<0.000000e+00> : vector<2x128xf32>
    %176 = tpu.matmul %139, %37, %cst_51 {dimension_numbers = #tpu.dot_dimension_numbers<[1], [0], [0], [1], [0, 0, 1, 1], [], []>} : vector<2x32xf32>, vector<32x128xf32>, vector<2x128xf32> -> vector<2x128xf32>
    %177 = arith.addf %175, %176 : vector<2x128xf32>
    %178 = vector.extract_strided_slice %177 {offsets = [0, 0], sizes = [2, 32], strides = [1, 1]} : vector<2x128xf32> to vector<2x32xf32>
    %179 = arith.negf %178 : vector<2x32xf32>
    %180 = math.exp %179 : vector<2x32xf32>
    %cst_52 = arith.constant 1.000000e+00 : f32
    %181 = vector.broadcast %cst_52 : f32 to vector<2x32xf32>
    %182 = arith.addf %181, %180 : vector<2x32xf32>
    %183 = arith.divf %181, %182 : vector<2x32xf32>
    %184 = vector.extract_strided_slice %177 {offsets = [0, 32], sizes = [2, 32], strides = [1, 1]} : vector<2x128xf32> to vector<2x32xf32>
    %185 = arith.negf %184 : vector<2x32xf32>
    %186 = math.exp %185 : vector<2x32xf32>
    %cst_53 = arith.constant 1.000000e+00 : f32
    %187 = vector.broadcast %cst_53 : f32 to vector<2x32xf32>
    %188 = arith.addf %187, %186 : vector<2x32xf32>
    %189 = arith.divf %187, %188 : vector<2x32xf32>
    %190 = vector.extract_strided_slice %177 {offsets = [0, 64], sizes = [2, 32], strides = [1, 1]} : vector<2x128xf32> to vector<2x32xf32>
    %191 = math.tanh %190 : vector<2x32xf32>
    %192 = vector.extract_strided_slice %177 {offsets = [0, 96], sizes = [2, 32], strides = [1, 1]} : vector<2x128xf32> to vector<2x32xf32>
    %193 = arith.negf %192 : vector<2x32xf32>
    %194 = math.exp %193 : vector<2x32xf32>
    %cst_54 = arith.constant 1.000000e+00 : f32
    %195 = vector.broadcast %cst_54 : f32 to vector<2x32xf32>
    %196 = arith.addf %195, %194 : vector<2x32xf32>
    %197 = arith.divf %195, %196 : vector<2x32xf32>
    %198 = arith.mulf %189, %137 : vector<2x32xf32>
    %199 = arith.mulf %183, %191 : vector<2x32xf32>
    %200 = arith.addf %198, %199 : vector<2x32xf32>
    %201 = math.tanh %200 : vector<2x32xf32>
    %202 = arith.mulf %197, %201 : vector<2x32xf32>
    %203 = tpu.concatenate %202, %167 in 1 : vector<2x32xf32>, vector<2x32xf32> -> vector<2x64xf32>
    %cst_55 = arith.constant dense<0.000000e+00> : vector<2x128xf32>
    %204 = tpu.matmul %203, %38, %cst_55 {dimension_numbers = #tpu.dot_dimension_numbers<[1], [0], [0], [1], [0, 0, 1, 1], [], []>} : vector<2x64xf32>, vector<64x128xf32>, vector<2x128xf32> -> vector<2x128xf32>
    %205 = arith.addf %204, %41 : vector<2x128xf32>
    %206 = vector.extract_strided_slice %205 {offsets = [0, 0], sizes = [2, 32], strides = [1, 1]} : vector<2x128xf32> to vector<2x32xf32>
    %207 = arith.negf %206 : vector<2x32xf32>
    %208 = math.exp %207 : vector<2x32xf32>
    %cst_56 = arith.constant 1.000000e+00 : f32
    %209 = vector.broadcast %cst_56 : f32 to vector<2x32xf32>
    %210 = arith.addf %209, %208 : vector<2x32xf32>
    %211 = arith.divf %209, %210 : vector<2x32xf32>
    %212 = vector.extract_strided_slice %205 {offsets = [0, 32], sizes = [2, 32], strides = [1, 1]} : vector<2x128xf32> to vector<2x32xf32>
    %213 = arith.negf %212 : vector<2x32xf32>
    %214 = math.exp %213 : vector<2x32xf32>
    %cst_57 = arith.constant 1.000000e+00 : f32
    %215 = vector.broadcast %cst_57 : f32 to vector<2x32xf32>
    %216 = arith.addf %215, %214 : vector<2x32xf32>
    %217 = arith.divf %215, %216 : vector<2x32xf32>
    %218 = vector.extract_strided_slice %205 {offsets = [0, 64], sizes = [2, 32], strides = [1, 1]} : vector<2x128xf32> to vector<2x32xf32>
    %219 = math.tanh %218 : vector<2x32xf32>
    %220 = vector.extract_strided_slice %205 {offsets = [0, 96], sizes = [2, 32], strides = [1, 1]} : vector<2x128xf32> to vector<2x32xf32>
    %221 = arith.negf %220 : vector<2x32xf32>
    %222 = math.exp %221 : vector<2x32xf32>
    %cst_58 = arith.constant 1.000000e+00 : f32
    %223 = vector.broadcast %cst_58 : f32 to vector<2x32xf32>
    %224 = arith.addf %223, %222 : vector<2x32xf32>
    %225 = arith.divf %223, %224 : vector<2x32xf32>
    %226 = arith.mulf %217, %165 : vector<2x32xf32>
    %227 = arith.mulf %211, %219 : vector<2x32xf32>
    %228 = arith.addf %226, %227 : vector<2x32xf32>
    %229 = math.tanh %228 : vector<2x32xf32>
    %230 = arith.mulf %225, %229 : vector<2x32xf32>
    %231 = vector.broadcast %42 : vector<1x32xf32> to vector<2x32xf32>
    %232 = arith.mulf %230, %231 : vector<2x32xf32>
    %cst_59 = arith.constant dense<0.000000e+00> : vector<2xf32>
    %233 = vector.multi_reduction <add>, %232, %cst_59 [1] : vector<2x32xf32> to vector<2xf32>
    %234 = vector.shape_cast %233 : vector<2xf32> to vector<2x1xf32>
    %235 = vector.broadcast %43 : vector<1x1xf32> to vector<2x1xf32>
    %236 = arith.addf %234, %235 : vector<2x1xf32>
    %237 = vector.extract_strided_slice %36 {offsets = [0, 3, 0], sizes = [2, 1, 128], strides = [1, 1, 1]} : vector<2x8x128xf32> to vector<2x1x128xf32>
    %238 = vector.shape_cast %237 : vector<2x1x128xf32> to vector<2x128xf32>
    %cst_60 = arith.constant dense<0.000000e+00> : vector<2x128xf32>
    %239 = tpu.matmul %202, %37, %cst_60 {dimension_numbers = #tpu.dot_dimension_numbers<[1], [0], [0], [1], [0, 0, 1, 1], [], []>} : vector<2x32xf32>, vector<32x128xf32>, vector<2x128xf32> -> vector<2x128xf32>
    %240 = arith.addf %238, %239 : vector<2x128xf32>
    %241 = vector.extract_strided_slice %240 {offsets = [0, 0], sizes = [2, 32], strides = [1, 1]} : vector<2x128xf32> to vector<2x32xf32>
    %242 = arith.negf %241 : vector<2x32xf32>
    %243 = math.exp %242 : vector<2x32xf32>
    %cst_61 = arith.constant 1.000000e+00 : f32
    %244 = vector.broadcast %cst_61 : f32 to vector<2x32xf32>
    %245 = arith.addf %244, %243 : vector<2x32xf32>
    %246 = arith.divf %244, %245 : vector<2x32xf32>
    %247 = vector.extract_strided_slice %240 {offsets = [0, 32], sizes = [2, 32], strides = [1, 1]} : vector<2x128xf32> to vector<2x32xf32>
    %248 = arith.negf %247 : vector<2x32xf32>
    %249 = math.exp %248 : vector<2x32xf32>
    %cst_62 = arith.constant 1.000000e+00 : f32
    %250 = vector.broadcast %cst_62 : f32 to vector<2x32xf32>
    %251 = arith.addf %250, %249 : vector<2x32xf32>
    %252 = arith.divf %250, %251 : vector<2x32xf32>
    %253 = vector.extract_strided_slice %240 {offsets = [0, 64], sizes = [2, 32], strides = [1, 1]} : vector<2x128xf32> to vector<2x32xf32>
    %254 = math.tanh %253 : vector<2x32xf32>
    %255 = vector.extract_strided_slice %240 {offsets = [0, 96], sizes = [2, 32], strides = [1, 1]} : vector<2x128xf32> to vector<2x32xf32>
    %256 = arith.negf %255 : vector<2x32xf32>
    %257 = math.exp %256 : vector<2x32xf32>
    %cst_63 = arith.constant 1.000000e+00 : f32
    %258 = vector.broadcast %cst_63 : f32 to vector<2x32xf32>
    %259 = arith.addf %258, %257 : vector<2x32xf32>
    %260 = arith.divf %258, %259 : vector<2x32xf32>
    %261 = arith.mulf %252, %200 : vector<2x32xf32>
    %262 = arith.mulf %246, %254 : vector<2x32xf32>
    %263 = arith.addf %261, %262 : vector<2x32xf32>
    %264 = math.tanh %263 : vector<2x32xf32>
    %265 = arith.mulf %260, %264 : vector<2x32xf32>
    %266 = tpu.concatenate %265, %230 in 1 : vector<2x32xf32>, vector<2x32xf32> -> vector<2x64xf32>
    %cst_64 = arith.constant dense<0.000000e+00> : vector<2x128xf32>
    %267 = tpu.matmul %266, %38, %cst_64 {dimension_numbers = #tpu.dot_dimension_numbers<[1], [0], [0], [1], [0, 0, 1, 1], [], []>} : vector<2x64xf32>, vector<64x128xf32>, vector<2x128xf32> -> vector<2x128xf32>
    %268 = arith.addf %267, %41 : vector<2x128xf32>
    %269 = vector.extract_strided_slice %268 {offsets = [0, 0], sizes = [2, 32], strides = [1, 1]} : vector<2x128xf32> to vector<2x32xf32>
    %270 = arith.negf %269 : vector<2x32xf32>
    %271 = math.exp %270 : vector<2x32xf32>
    %cst_65 = arith.constant 1.000000e+00 : f32
    %272 = vector.broadcast %cst_65 : f32 to vector<2x32xf32>
    %273 = arith.addf %272, %271 : vector<2x32xf32>
    %274 = arith.divf %272, %273 : vector<2x32xf32>
    %275 = vector.extract_strided_slice %268 {offsets = [0, 32], sizes = [2, 32], strides = [1, 1]} : vector<2x128xf32> to vector<2x32xf32>
    %276 = arith.negf %275 : vector<2x32xf32>
    %277 = math.exp %276 : vector<2x32xf32>
    %cst_66 = arith.constant 1.000000e+00 : f32
    %278 = vector.broadcast %cst_66 : f32 to vector<2x32xf32>
    %279 = arith.addf %278, %277 : vector<2x32xf32>
    %280 = arith.divf %278, %279 : vector<2x32xf32>
    %281 = vector.extract_strided_slice %268 {offsets = [0, 64], sizes = [2, 32], strides = [1, 1]} : vector<2x128xf32> to vector<2x32xf32>
    %282 = math.tanh %281 : vector<2x32xf32>
    %283 = vector.extract_strided_slice %268 {offsets = [0, 96], sizes = [2, 32], strides = [1, 1]} : vector<2x128xf32> to vector<2x32xf32>
    %284 = arith.negf %283 : vector<2x32xf32>
    %285 = math.exp %284 : vector<2x32xf32>
    %cst_67 = arith.constant 1.000000e+00 : f32
    %286 = vector.broadcast %cst_67 : f32 to vector<2x32xf32>
    %287 = arith.addf %286, %285 : vector<2x32xf32>
    %288 = arith.divf %286, %287 : vector<2x32xf32>
    %289 = arith.mulf %280, %228 : vector<2x32xf32>
    %290 = arith.mulf %274, %282 : vector<2x32xf32>
    %291 = arith.addf %289, %290 : vector<2x32xf32>
    %292 = math.tanh %291 : vector<2x32xf32>
    %293 = arith.mulf %288, %292 : vector<2x32xf32>
    %294 = vector.broadcast %42 : vector<1x32xf32> to vector<2x32xf32>
    %295 = arith.mulf %293, %294 : vector<2x32xf32>
    %cst_68 = arith.constant dense<0.000000e+00> : vector<2xf32>
    %296 = vector.multi_reduction <add>, %295, %cst_68 [1] : vector<2x32xf32> to vector<2xf32>
    %297 = vector.shape_cast %296 : vector<2xf32> to vector<2x1xf32>
    %298 = vector.broadcast %43 : vector<1x1xf32> to vector<2x1xf32>
    %299 = arith.addf %297, %298 : vector<2x1xf32>
    %300 = vector.extract_strided_slice %36 {offsets = [0, 4, 0], sizes = [2, 1, 128], strides = [1, 1, 1]} : vector<2x8x128xf32> to vector<2x1x128xf32>
    %301 = vector.shape_cast %300 : vector<2x1x128xf32> to vector<2x128xf32>
    %cst_69 = arith.constant dense<0.000000e+00> : vector<2x128xf32>
    %302 = tpu.matmul %265, %37, %cst_69 {dimension_numbers = #tpu.dot_dimension_numbers<[1], [0], [0], [1], [0, 0, 1, 1], [], []>} : vector<2x32xf32>, vector<32x128xf32>, vector<2x128xf32> -> vector<2x128xf32>
    %303 = arith.addf %301, %302 : vector<2x128xf32>
    %304 = vector.extract_strided_slice %303 {offsets = [0, 0], sizes = [2, 32], strides = [1, 1]} : vector<2x128xf32> to vector<2x32xf32>
    %305 = arith.negf %304 : vector<2x32xf32>
    %306 = math.exp %305 : vector<2x32xf32>
    %cst_70 = arith.constant 1.000000e+00 : f32
    %307 = vector.broadcast %cst_70 : f32 to vector<2x32xf32>
    %308 = arith.addf %307, %306 : vector<2x32xf32>
    %309 = arith.divf %307, %308 : vector<2x32xf32>
    %310 = vector.extract_strided_slice %303 {offsets = [0, 32], sizes = [2, 32], strides = [1, 1]} : vector<2x128xf32> to vector<2x32xf32>
    %311 = arith.negf %310 : vector<2x32xf32>
    %312 = math.exp %311 : vector<2x32xf32>
    %cst_71 = arith.constant 1.000000e+00 : f32
    %313 = vector.broadcast %cst_71 : f32 to vector<2x32xf32>
    %314 = arith.addf %313, %312 : vector<2x32xf32>
    %315 = arith.divf %313, %314 : vector<2x32xf32>
    %316 = vector.extract_strided_slice %303 {offsets = [0, 64], sizes = [2, 32], strides = [1, 1]} : vector<2x128xf32> to vector<2x32xf32>
    %317 = math.tanh %316 : vector<2x32xf32>
    %318 = vector.extract_strided_slice %303 {offsets = [0, 96], sizes = [2, 32], strides = [1, 1]} : vector<2x128xf32> to vector<2x32xf32>
    %319 = arith.negf %318 : vector<2x32xf32>
    %320 = math.exp %319 : vector<2x32xf32>
    %cst_72 = arith.constant 1.000000e+00 : f32
    %321 = vector.broadcast %cst_72 : f32 to vector<2x32xf32>
    %322 = arith.addf %321, %320 : vector<2x32xf32>
    %323 = arith.divf %321, %322 : vector<2x32xf32>
    %324 = arith.mulf %315, %263 : vector<2x32xf32>
    %325 = arith.mulf %309, %317 : vector<2x32xf32>
    %326 = arith.addf %324, %325 : vector<2x32xf32>
    %327 = math.tanh %326 : vector<2x32xf32>
    %328 = arith.mulf %323, %327 : vector<2x32xf32>
    %329 = tpu.concatenate %328, %293 in 1 : vector<2x32xf32>, vector<2x32xf32> -> vector<2x64xf32>
    %cst_73 = arith.constant dense<0.000000e+00> : vector<2x128xf32>
    %330 = tpu.matmul %329, %38, %cst_73 {dimension_numbers = #tpu.dot_dimension_numbers<[1], [0], [0], [1], [0, 0, 1, 1], [], []>} : vector<2x64xf32>, vector<64x128xf32>, vector<2x128xf32> -> vector<2x128xf32>
    %331 = arith.addf %330, %41 : vector<2x128xf32>
    %332 = vector.extract_strided_slice %331 {offsets = [0, 0], sizes = [2, 32], strides = [1, 1]} : vector<2x128xf32> to vector<2x32xf32>
    %333 = arith.negf %332 : vector<2x32xf32>
    %334 = math.exp %333 : vector<2x32xf32>
    %cst_74 = arith.constant 1.000000e+00 : f32
    %335 = vector.broadcast %cst_74 : f32 to vector<2x32xf32>
    %336 = arith.addf %335, %334 : vector<2x32xf32>
    %337 = arith.divf %335, %336 : vector<2x32xf32>
    %338 = vector.extract_strided_slice %331 {offsets = [0, 32], sizes = [2, 32], strides = [1, 1]} : vector<2x128xf32> to vector<2x32xf32>
    %339 = arith.negf %338 : vector<2x32xf32>
    %340 = math.exp %339 : vector<2x32xf32>
    %cst_75 = arith.constant 1.000000e+00 : f32
    %341 = vector.broadcast %cst_75 : f32 to vector<2x32xf32>
    %342 = arith.addf %341, %340 : vector<2x32xf32>
    %343 = arith.divf %341, %342 : vector<2x32xf32>
    %344 = vector.extract_strided_slice %331 {offsets = [0, 64], sizes = [2, 32], strides = [1, 1]} : vector<2x128xf32> to vector<2x32xf32>
    %345 = math.tanh %344 : vector<2x32xf32>
    %346 = vector.extract_strided_slice %331 {offsets = [0, 96], sizes = [2, 32], strides = [1, 1]} : vector<2x128xf32> to vector<2x32xf32>
    %347 = arith.negf %346 : vector<2x32xf32>
    %348 = math.exp %347 : vector<2x32xf32>
    %cst_76 = arith.constant 1.000000e+00 : f32
    %349 = vector.broadcast %cst_76 : f32 to vector<2x32xf32>
    %350 = arith.addf %349, %348 : vector<2x32xf32>
    %351 = arith.divf %349, %350 : vector<2x32xf32>
    %352 = arith.mulf %343, %291 : vector<2x32xf32>
    %353 = arith.mulf %337, %345 : vector<2x32xf32>
    %354 = arith.addf %352, %353 : vector<2x32xf32>
    %355 = math.tanh %354 : vector<2x32xf32>
    %356 = arith.mulf %351, %355 : vector<2x32xf32>
    %357 = vector.broadcast %42 : vector<1x32xf32> to vector<2x32xf32>
    %358 = arith.mulf %356, %357 : vector<2x32xf32>
    %cst_77 = arith.constant dense<0.000000e+00> : vector<2xf32>
    %359 = vector.multi_reduction <add>, %358, %cst_77 [1] : vector<2x32xf32> to vector<2xf32>
    %360 = vector.shape_cast %359 : vector<2xf32> to vector<2x1xf32>
    %361 = vector.broadcast %43 : vector<1x1xf32> to vector<2x1xf32>
    %362 = arith.addf %360, %361 : vector<2x1xf32>
    %363 = vector.extract_strided_slice %36 {offsets = [0, 5, 0], sizes = [2, 1, 128], strides = [1, 1, 1]} : vector<2x8x128xf32> to vector<2x1x128xf32>
    %364 = vector.shape_cast %363 : vector<2x1x128xf32> to vector<2x128xf32>
    %cst_78 = arith.constant dense<0.000000e+00> : vector<2x128xf32>
    %365 = tpu.matmul %328, %37, %cst_78 {dimension_numbers = #tpu.dot_dimension_numbers<[1], [0], [0], [1], [0, 0, 1, 1], [], []>} : vector<2x32xf32>, vector<32x128xf32>, vector<2x128xf32> -> vector<2x128xf32>
    %366 = arith.addf %364, %365 : vector<2x128xf32>
    %367 = vector.extract_strided_slice %366 {offsets = [0, 0], sizes = [2, 32], strides = [1, 1]} : vector<2x128xf32> to vector<2x32xf32>
    %368 = arith.negf %367 : vector<2x32xf32>
    %369 = math.exp %368 : vector<2x32xf32>
    %cst_79 = arith.constant 1.000000e+00 : f32
    %370 = vector.broadcast %cst_79 : f32 to vector<2x32xf32>
    %371 = arith.addf %370, %369 : vector<2x32xf32>
    %372 = arith.divf %370, %371 : vector<2x32xf32>
    %373 = vector.extract_strided_slice %366 {offsets = [0, 32], sizes = [2, 32], strides = [1, 1]} : vector<2x128xf32> to vector<2x32xf32>
    %374 = arith.negf %373 : vector<2x32xf32>
    %375 = math.exp %374 : vector<2x32xf32>
    %cst_80 = arith.constant 1.000000e+00 : f32
    %376 = vector.broadcast %cst_80 : f32 to vector<2x32xf32>
    %377 = arith.addf %376, %375 : vector<2x32xf32>
    %378 = arith.divf %376, %377 : vector<2x32xf32>
    %379 = vector.extract_strided_slice %366 {offsets = [0, 64], sizes = [2, 32], strides = [1, 1]} : vector<2x128xf32> to vector<2x32xf32>
    %380 = math.tanh %379 : vector<2x32xf32>
    %381 = vector.extract_strided_slice %366 {offsets = [0, 96], sizes = [2, 32], strides = [1, 1]} : vector<2x128xf32> to vector<2x32xf32>
    %382 = arith.negf %381 : vector<2x32xf32>
    %383 = math.exp %382 : vector<2x32xf32>
    %cst_81 = arith.constant 1.000000e+00 : f32
    %384 = vector.broadcast %cst_81 : f32 to vector<2x32xf32>
    %385 = arith.addf %384, %383 : vector<2x32xf32>
    %386 = arith.divf %384, %385 : vector<2x32xf32>
    %387 = arith.mulf %378, %326 : vector<2x32xf32>
    %388 = arith.mulf %372, %380 : vector<2x32xf32>
    %389 = arith.addf %387, %388 : vector<2x32xf32>
    %390 = math.tanh %389 : vector<2x32xf32>
    %391 = arith.mulf %386, %390 : vector<2x32xf32>
    %392 = tpu.concatenate %391, %356 in 1 : vector<2x32xf32>, vector<2x32xf32> -> vector<2x64xf32>
    %cst_82 = arith.constant dense<0.000000e+00> : vector<2x128xf32>
    %393 = tpu.matmul %392, %38, %cst_82 {dimension_numbers = #tpu.dot_dimension_numbers<[1], [0], [0], [1], [0, 0, 1, 1], [], []>} : vector<2x64xf32>, vector<64x128xf32>, vector<2x128xf32> -> vector<2x128xf32>
    %394 = arith.addf %393, %41 : vector<2x128xf32>
    %395 = vector.extract_strided_slice %394 {offsets = [0, 0], sizes = [2, 32], strides = [1, 1]} : vector<2x128xf32> to vector<2x32xf32>
    %396 = arith.negf %395 : vector<2x32xf32>
    %397 = math.exp %396 : vector<2x32xf32>
    %cst_83 = arith.constant 1.000000e+00 : f32
    %398 = vector.broadcast %cst_83 : f32 to vector<2x32xf32>
    %399 = arith.addf %398, %397 : vector<2x32xf32>
    %400 = arith.divf %398, %399 : vector<2x32xf32>
    %401 = vector.extract_strided_slice %394 {offsets = [0, 32], sizes = [2, 32], strides = [1, 1]} : vector<2x128xf32> to vector<2x32xf32>
    %402 = arith.negf %401 : vector<2x32xf32>
    %403 = math.exp %402 : vector<2x32xf32>
    %cst_84 = arith.constant 1.000000e+00 : f32
    %404 = vector.broadcast %cst_84 : f32 to vector<2x32xf32>
    %405 = arith.addf %404, %403 : vector<2x32xf32>
    %406 = arith.divf %404, %405 : vector<2x32xf32>
    %407 = vector.extract_strided_slice %394 {offsets = [0, 64], sizes = [2, 32], strides = [1, 1]} : vector<2x128xf32> to vector<2x32xf32>
    %408 = math.tanh %407 : vector<2x32xf32>
    %409 = vector.extract_strided_slice %394 {offsets = [0, 96], sizes = [2, 32], strides = [1, 1]} : vector<2x128xf32> to vector<2x32xf32>
    %410 = arith.negf %409 : vector<2x32xf32>
    %411 = math.exp %410 : vector<2x32xf32>
    %cst_85 = arith.constant 1.000000e+00 : f32
    %412 = vector.broadcast %cst_85 : f32 to vector<2x32xf32>
    %413 = arith.addf %412, %411 : vector<2x32xf32>
    %414 = arith.divf %412, %413 : vector<2x32xf32>
    %415 = arith.mulf %406, %354 : vector<2x32xf32>
    %416 = arith.mulf %400, %408 : vector<2x32xf32>
    %417 = arith.addf %415, %416 : vector<2x32xf32>
    %418 = math.tanh %417 : vector<2x32xf32>
    %419 = arith.mulf %414, %418 : vector<2x32xf32>
    %420 = vector.broadcast %42 : vector<1x32xf32> to vector<2x32xf32>
    %421 = arith.mulf %419, %420 : vector<2x32xf32>
    %cst_86 = arith.constant dense<0.000000e+00> : vector<2xf32>
    %422 = vector.multi_reduction <add>, %421, %cst_86 [1] : vector<2x32xf32> to vector<2xf32>
    %423 = vector.shape_cast %422 : vector<2xf32> to vector<2x1xf32>
    %424 = vector.broadcast %43 : vector<1x1xf32> to vector<2x1xf32>
    %425 = arith.addf %423, %424 : vector<2x1xf32>
    %426 = vector.extract_strided_slice %36 {offsets = [0, 6, 0], sizes = [2, 1, 128], strides = [1, 1, 1]} : vector<2x8x128xf32> to vector<2x1x128xf32>
    %427 = vector.shape_cast %426 : vector<2x1x128xf32> to vector<2x128xf32>
    %cst_87 = arith.constant dense<0.000000e+00> : vector<2x128xf32>
    %428 = tpu.matmul %391, %37, %cst_87 {dimension_numbers = #tpu.dot_dimension_numbers<[1], [0], [0], [1], [0, 0, 1, 1], [], []>} : vector<2x32xf32>, vector<32x128xf32>, vector<2x128xf32> -> vector<2x128xf32>
    %429 = arith.addf %427, %428 : vector<2x128xf32>
    %430 = vector.extract_strided_slice %429 {offsets = [0, 0], sizes = [2, 32], strides = [1, 1]} : vector<2x128xf32> to vector<2x32xf32>
    %431 = arith.negf %430 : vector<2x32xf32>
    %432 = math.exp %431 : vector<2x32xf32>
    %cst_88 = arith.constant 1.000000e+00 : f32
    %433 = vector.broadcast %cst_88 : f32 to vector<2x32xf32>
    %434 = arith.addf %433, %432 : vector<2x32xf32>
    %435 = arith.divf %433, %434 : vector<2x32xf32>
    %436 = vector.extract_strided_slice %429 {offsets = [0, 32], sizes = [2, 32], strides = [1, 1]} : vector<2x128xf32> to vector<2x32xf32>
    %437 = arith.negf %436 : vector<2x32xf32>
    %438 = math.exp %437 : vector<2x32xf32>
    %cst_89 = arith.constant 1.000000e+00 : f32
    %439 = vector.broadcast %cst_89 : f32 to vector<2x32xf32>
    %440 = arith.addf %439, %438 : vector<2x32xf32>
    %441 = arith.divf %439, %440 : vector<2x32xf32>
    %442 = vector.extract_strided_slice %429 {offsets = [0, 64], sizes = [2, 32], strides = [1, 1]} : vector<2x128xf32> to vector<2x32xf32>
    %443 = math.tanh %442 : vector<2x32xf32>
    %444 = vector.extract_strided_slice %429 {offsets = [0, 96], sizes = [2, 32], strides = [1, 1]} : vector<2x128xf32> to vector<2x32xf32>
    %445 = arith.negf %444 : vector<2x32xf32>
    %446 = math.exp %445 : vector<2x32xf32>
    %cst_90 = arith.constant 1.000000e+00 : f32
    %447 = vector.broadcast %cst_90 : f32 to vector<2x32xf32>
    %448 = arith.addf %447, %446 : vector<2x32xf32>
    %449 = arith.divf %447, %448 : vector<2x32xf32>
    %450 = arith.mulf %441, %389 : vector<2x32xf32>
    %451 = arith.mulf %435, %443 : vector<2x32xf32>
    %452 = arith.addf %450, %451 : vector<2x32xf32>
    %453 = math.tanh %452 : vector<2x32xf32>
    %454 = arith.mulf %449, %453 : vector<2x32xf32>
    %455 = tpu.concatenate %454, %419 in 1 : vector<2x32xf32>, vector<2x32xf32> -> vector<2x64xf32>
    %cst_91 = arith.constant dense<0.000000e+00> : vector<2x128xf32>
    %456 = tpu.matmul %455, %38, %cst_91 {dimension_numbers = #tpu.dot_dimension_numbers<[1], [0], [0], [1], [0, 0, 1, 1], [], []>} : vector<2x64xf32>, vector<64x128xf32>, vector<2x128xf32> -> vector<2x128xf32>
    %457 = arith.addf %456, %41 : vector<2x128xf32>
    %458 = vector.extract_strided_slice %457 {offsets = [0, 0], sizes = [2, 32], strides = [1, 1]} : vector<2x128xf32> to vector<2x32xf32>
    %459 = arith.negf %458 : vector<2x32xf32>
    %460 = math.exp %459 : vector<2x32xf32>
    %cst_92 = arith.constant 1.000000e+00 : f32
    %461 = vector.broadcast %cst_92 : f32 to vector<2x32xf32>
    %462 = arith.addf %461, %460 : vector<2x32xf32>
    %463 = arith.divf %461, %462 : vector<2x32xf32>
    %464 = vector.extract_strided_slice %457 {offsets = [0, 32], sizes = [2, 32], strides = [1, 1]} : vector<2x128xf32> to vector<2x32xf32>
    %465 = arith.negf %464 : vector<2x32xf32>
    %466 = math.exp %465 : vector<2x32xf32>
    %cst_93 = arith.constant 1.000000e+00 : f32
    %467 = vector.broadcast %cst_93 : f32 to vector<2x32xf32>
    %468 = arith.addf %467, %466 : vector<2x32xf32>
    %469 = arith.divf %467, %468 : vector<2x32xf32>
    %470 = vector.extract_strided_slice %457 {offsets = [0, 64], sizes = [2, 32], strides = [1, 1]} : vector<2x128xf32> to vector<2x32xf32>
    %471 = math.tanh %470 : vector<2x32xf32>
    %472 = vector.extract_strided_slice %457 {offsets = [0, 96], sizes = [2, 32], strides = [1, 1]} : vector<2x128xf32> to vector<2x32xf32>
    %473 = arith.negf %472 : vector<2x32xf32>
    %474 = math.exp %473 : vector<2x32xf32>
    %cst_94 = arith.constant 1.000000e+00 : f32
    %475 = vector.broadcast %cst_94 : f32 to vector<2x32xf32>
    %476 = arith.addf %475, %474 : vector<2x32xf32>
    %477 = arith.divf %475, %476 : vector<2x32xf32>
    %478 = arith.mulf %469, %417 : vector<2x32xf32>
    %479 = arith.mulf %463, %471 : vector<2x32xf32>
    %480 = arith.addf %478, %479 : vector<2x32xf32>
    %481 = math.tanh %480 : vector<2x32xf32>
    %482 = arith.mulf %477, %481 : vector<2x32xf32>
    %483 = vector.broadcast %42 : vector<1x32xf32> to vector<2x32xf32>
    %484 = arith.mulf %482, %483 : vector<2x32xf32>
    %cst_95 = arith.constant dense<0.000000e+00> : vector<2xf32>
    %485 = vector.multi_reduction <add>, %484, %cst_95 [1] : vector<2x32xf32> to vector<2xf32>
    %486 = vector.shape_cast %485 : vector<2xf32> to vector<2x1xf32>
    %487 = vector.broadcast %43 : vector<1x1xf32> to vector<2x1xf32>
    %488 = arith.addf %486, %487 : vector<2x1xf32>
    %489 = vector.extract_strided_slice %36 {offsets = [0, 7, 0], sizes = [2, 1, 128], strides = [1, 1, 1]} : vector<2x8x128xf32> to vector<2x1x128xf32>
    %490 = vector.shape_cast %489 : vector<2x1x128xf32> to vector<2x128xf32>
    %cst_96 = arith.constant dense<0.000000e+00> : vector<2x128xf32>
    %491 = tpu.matmul %454, %37, %cst_96 {dimension_numbers = #tpu.dot_dimension_numbers<[1], [0], [0], [1], [0, 0, 1, 1], [], []>} : vector<2x32xf32>, vector<32x128xf32>, vector<2x128xf32> -> vector<2x128xf32>
    %492 = arith.addf %490, %491 : vector<2x128xf32>
    %493 = vector.extract_strided_slice %492 {offsets = [0, 0], sizes = [2, 32], strides = [1, 1]} : vector<2x128xf32> to vector<2x32xf32>
    %494 = arith.negf %493 : vector<2x32xf32>
    %495 = math.exp %494 : vector<2x32xf32>
    %cst_97 = arith.constant 1.000000e+00 : f32
    %496 = vector.broadcast %cst_97 : f32 to vector<2x32xf32>
    %497 = arith.addf %496, %495 : vector<2x32xf32>
    %498 = arith.divf %496, %497 : vector<2x32xf32>
    %499 = vector.extract_strided_slice %492 {offsets = [0, 32], sizes = [2, 32], strides = [1, 1]} : vector<2x128xf32> to vector<2x32xf32>
    %500 = arith.negf %499 : vector<2x32xf32>
    %501 = math.exp %500 : vector<2x32xf32>
    %cst_98 = arith.constant 1.000000e+00 : f32
    %502 = vector.broadcast %cst_98 : f32 to vector<2x32xf32>
    %503 = arith.addf %502, %501 : vector<2x32xf32>
    %504 = arith.divf %502, %503 : vector<2x32xf32>
    %505 = vector.extract_strided_slice %492 {offsets = [0, 64], sizes = [2, 32], strides = [1, 1]} : vector<2x128xf32> to vector<2x32xf32>
    %506 = math.tanh %505 : vector<2x32xf32>
    %507 = vector.extract_strided_slice %492 {offsets = [0, 96], sizes = [2, 32], strides = [1, 1]} : vector<2x128xf32> to vector<2x32xf32>
    %508 = arith.negf %507 : vector<2x32xf32>
    %509 = math.exp %508 : vector<2x32xf32>
    %cst_99 = arith.constant 1.000000e+00 : f32
    %510 = vector.broadcast %cst_99 : f32 to vector<2x32xf32>
    %511 = arith.addf %510, %509 : vector<2x32xf32>
    %512 = arith.divf %510, %511 : vector<2x32xf32>
    %513 = arith.mulf %504, %452 : vector<2x32xf32>
    %514 = arith.mulf %498, %506 : vector<2x32xf32>
    %515 = arith.addf %513, %514 : vector<2x32xf32>
    %516 = math.tanh %515 : vector<2x32xf32>
    %517 = arith.mulf %512, %516 : vector<2x32xf32>
    %518 = tpu.concatenate %517, %482 in 1 : vector<2x32xf32>, vector<2x32xf32> -> vector<2x64xf32>
    %cst_100 = arith.constant dense<0.000000e+00> : vector<2x128xf32>
    %519 = tpu.matmul %518, %38, %cst_100 {dimension_numbers = #tpu.dot_dimension_numbers<[1], [0], [0], [1], [0, 0, 1, 1], [], []>} : vector<2x64xf32>, vector<64x128xf32>, vector<2x128xf32> -> vector<2x128xf32>
    %520 = arith.addf %519, %41 : vector<2x128xf32>
    %521 = vector.extract_strided_slice %520 {offsets = [0, 0], sizes = [2, 32], strides = [1, 1]} : vector<2x128xf32> to vector<2x32xf32>
    %522 = arith.negf %521 : vector<2x32xf32>
    %523 = math.exp %522 : vector<2x32xf32>
    %cst_101 = arith.constant 1.000000e+00 : f32
    %524 = vector.broadcast %cst_101 : f32 to vector<2x32xf32>
    %525 = arith.addf %524, %523 : vector<2x32xf32>
    %526 = arith.divf %524, %525 : vector<2x32xf32>
    %527 = vector.extract_strided_slice %520 {offsets = [0, 32], sizes = [2, 32], strides = [1, 1]} : vector<2x128xf32> to vector<2x32xf32>
    %528 = arith.negf %527 : vector<2x32xf32>
    %529 = math.exp %528 : vector<2x32xf32>
    %cst_102 = arith.constant 1.000000e+00 : f32
    %530 = vector.broadcast %cst_102 : f32 to vector<2x32xf32>
    %531 = arith.addf %530, %529 : vector<2x32xf32>
    %532 = arith.divf %530, %531 : vector<2x32xf32>
    %533 = vector.extract_strided_slice %520 {offsets = [0, 64], sizes = [2, 32], strides = [1, 1]} : vector<2x128xf32> to vector<2x32xf32>
    %534 = math.tanh %533 : vector<2x32xf32>
    %535 = vector.extract_strided_slice %520 {offsets = [0, 96], sizes = [2, 32], strides = [1, 1]} : vector<2x128xf32> to vector<2x32xf32>
    %536 = arith.negf %535 : vector<2x32xf32>
    %537 = math.exp %536 : vector<2x32xf32>
    %cst_103 = arith.constant 1.000000e+00 : f32
    %538 = vector.broadcast %cst_103 : f32 to vector<2x32xf32>
    %539 = arith.addf %538, %537 : vector<2x32xf32>
    %540 = arith.divf %538, %539 : vector<2x32xf32>
    %541 = arith.mulf %532, %480 : vector<2x32xf32>
    %542 = arith.mulf %526, %534 : vector<2x32xf32>
    %543 = arith.addf %541, %542 : vector<2x32xf32>
    %544 = math.tanh %543 : vector<2x32xf32>
    %545 = arith.mulf %540, %544 : vector<2x32xf32>
    %546 = vector.broadcast %42 : vector<1x32xf32> to vector<2x32xf32>
    %547 = arith.mulf %545, %546 : vector<2x32xf32>
    %cst_104 = arith.constant dense<0.000000e+00> : vector<2xf32>
    %548 = vector.multi_reduction <add>, %547, %cst_104 [1] : vector<2x32xf32> to vector<2xf32>
    %549 = vector.shape_cast %548 : vector<2xf32> to vector<2x1xf32>
    %550 = vector.broadcast %43 : vector<1x1xf32> to vector<2x1xf32>
    %551 = arith.addf %549, %550 : vector<2x1xf32>
    %552 = tpu.concatenate %110, %173, %236, %299, %362, %425, %488, %551 in 1 : vector<2x1xf32>, vector<2x1xf32>, vector<2x1xf32>, vector<2x1xf32>, vector<2x1xf32>, vector<2x1xf32>, vector<2x1xf32>, vector<2x1xf32> -> vector<2x8xf32>
    %cst_105 = arith.constant dense<0xFF800000> : vector<2xf32>
    %553 = vector.multi_reduction <maximumf>, %552, %cst_105 [1] : vector<2x8xf32> to vector<2xf32>
    %cst_106 = arith.constant 0xFF800000 : f32
    %554 = vector.broadcast %cst_106 : f32 to vector<2xf32>
    %555 = arith.maximumf %554, %553 : vector<2xf32>
    %556 = vector.shape_cast %555 : vector<2xf32> to vector<2x1xf32>
    %557 = vector.broadcast %556 : vector<2x1xf32> to vector<2x8xf32>
    %558 = arith.subf %552, %557 : vector<2x8xf32>
    %559 = math.exp %558 : vector<2x8xf32>
    %cst_107 = arith.constant dense<0.000000e+00> : vector<2xf32>
    %560 = vector.multi_reduction <add>, %559, %cst_107 [1] : vector<2x8xf32> to vector<2xf32>
    %561 = vector.shape_cast %560 : vector<2xf32> to vector<2x1xf32>
    %562 = vector.broadcast %561 : vector<2x1xf32> to vector<2x8xf32>
    %563 = arith.divf %559, %562 : vector<2x8xf32>
    %cst_108 = arith.constant 0.000000e+00 : f32
    %564 = vector.broadcast %cst_108 : f32 to vector<2x32xf32>
    %565 = vector.extract_strided_slice %563 {offsets = [0, 0], sizes = [2, 1], strides = [1, 1]} : vector<2x8xf32> to vector<2x1xf32>
    %566 = vector.broadcast %565 : vector<2x1xf32> to vector<2x32xf32>
    %567 = arith.mulf %566, %104 : vector<2x32xf32>
    %568 = arith.addf %564, %567 : vector<2x32xf32>
    %569 = vector.extract_strided_slice %563 {offsets = [0, 1], sizes = [2, 1], strides = [1, 1]} : vector<2x8xf32> to vector<2x1xf32>
    %570 = vector.broadcast %569 : vector<2x1xf32> to vector<2x32xf32>
    %571 = arith.mulf %570, %167 : vector<2x32xf32>
    %572 = arith.addf %568, %571 : vector<2x32xf32>
    %573 = vector.extract_strided_slice %563 {offsets = [0, 2], sizes = [2, 1], strides = [1, 1]} : vector<2x8xf32> to vector<2x1xf32>
    %574 = vector.broadcast %573 : vector<2x1xf32> to vector<2x32xf32>
    %575 = arith.mulf %574, %230 : vector<2x32xf32>
    %576 = arith.addf %572, %575 : vector<2x32xf32>
    %577 = vector.extract_strided_slice %563 {offsets = [0, 3], sizes = [2, 1], strides = [1, 1]} : vector<2x8xf32> to vector<2x1xf32>
    %578 = vector.broadcast %577 : vector<2x1xf32> to vector<2x32xf32>
    %579 = arith.mulf %578, %293 : vector<2x32xf32>
    %580 = arith.addf %576, %579 : vector<2x32xf32>
    %581 = vector.extract_strided_slice %563 {offsets = [0, 4], sizes = [2, 1], strides = [1, 1]} : vector<2x8xf32> to vector<2x1xf32>
    %582 = vector.broadcast %581 : vector<2x1xf32> to vector<2x32xf32>
    %583 = arith.mulf %582, %356 : vector<2x32xf32>
    %584 = arith.addf %580, %583 : vector<2x32xf32>
    %585 = vector.extract_strided_slice %563 {offsets = [0, 5], sizes = [2, 1], strides = [1, 1]} : vector<2x8xf32> to vector<2x1xf32>
    %586 = vector.broadcast %585 : vector<2x1xf32> to vector<2x32xf32>
    %587 = arith.mulf %586, %419 : vector<2x32xf32>
    %588 = arith.addf %584, %587 : vector<2x32xf32>
    %589 = vector.extract_strided_slice %563 {offsets = [0, 6], sizes = [2, 1], strides = [1, 1]} : vector<2x8xf32> to vector<2x1xf32>
    %590 = vector.broadcast %589 : vector<2x1xf32> to vector<2x32xf32>
    %591 = arith.mulf %590, %482 : vector<2x32xf32>
    %592 = arith.addf %588, %591 : vector<2x32xf32>
    %593 = vector.extract_strided_slice %563 {offsets = [0, 7], sizes = [2, 1], strides = [1, 1]} : vector<2x8xf32> to vector<2x1xf32>
    %594 = vector.broadcast %593 : vector<2x1xf32> to vector<2x32xf32>
    %595 = arith.mulf %594, %545 : vector<2x32xf32>
    %596 = arith.addf %592, %595 : vector<2x32xf32>
    %597 = arith.addf %596, %545 : vector<2x32xf32>
    %c0_109 = arith.constant 0 : index
    %c0_110 = arith.constant 0 : index
    %598 = vector.load %arg12[%c0_109, %c0_110] : memref<32x32xbf16, #tpu.memory_space<vmem>>, vector<32x32xbf16>
    %599 = arith.truncf %597 : vector<2x32xf32> to vector<2x32xbf16>
    %cst_111 = arith.constant dense<0.000000e+00> : vector<2x32xf32>
    %600 = tpu.matmul %599, %598, %cst_111 {dimension_numbers = #tpu.dot_dimension_numbers<[1], [0], [0], [1], [0, 0, 1, 1], [], []>} : vector<2x32xbf16>, vector<32x32xbf16>, vector<2x32xf32> -> vector<2x32xf32>
    %c0_112 = arith.constant 0 : index
    %c0_113 = arith.constant 0 : index
    %601 = vector.load %arg13[%c0_112, %c0_113] : memref<1x32xf32, #tpu.memory_space<vmem>>, vector<1x32xf32>
    %602 = vector.broadcast %601 : vector<1x32xf32> to vector<2x32xf32>
    %603 = arith.addf %600, %602 : vector<2x32xf32>
    %c0_114 = arith.constant 0 : index
    %c0_115 = arith.constant 0 : index
    %604 = vector.load %arg14[%c0_114, %c0_115] : memref<1x32xf32, #tpu.memory_space<vmem>>, vector<1x32xf32>
    %c0_116 = arith.constant 0 : index
    %c0_117 = arith.constant 0 : index
    %605 = vector.load %arg15[%c0_116, %c0_117] : memref<1x32xf32, #tpu.memory_space<vmem>>, vector<1x32xf32>
    %cst_118 = arith.constant dense<0.000000e+00> : vector<2xf32>
    %606 = vector.multi_reduction <add>, %603, %cst_118 [1] : vector<2x32xf32> to vector<2xf32>
    %607 = vector.shape_cast %606 : vector<2xf32> to vector<2x1xf32>
    %cst_119 = arith.constant 3.200000e+01 : f32
    %608 = vector.broadcast %cst_119 : f32 to vector<2x1xf32>
    %609 = arith.divf %607, %608 : vector<2x1xf32>
    %610 = vector.broadcast %609 : vector<2x1xf32> to vector<2x32xf32>
    %611 = arith.subf %603, %610 : vector<2x32xf32>
    %612 = arith.mulf %611, %611 : vector<2x32xf32>
    %cst_120 = arith.constant dense<0.000000e+00> : vector<2xf32>
    %613 = vector.multi_reduction <add>, %612, %cst_120 [1] : vector<2x32xf32> to vector<2xf32>
    %614 = vector.shape_cast %613 : vector<2xf32> to vector<2x1xf32>
    %cst_121 = arith.constant 3.200000e+01 : f32
    %615 = vector.broadcast %cst_121 : f32 to vector<2x1xf32>
    %616 = arith.divf %614, %615 : vector<2x1xf32>
    %617 = vector.broadcast %609 : vector<2x1xf32> to vector<2x32xf32>
    %618 = arith.subf %603, %617 : vector<2x32xf32>
    %cst_122 = arith.constant 9.99999974E-6 : f32
    %619 = vector.broadcast %cst_122 : f32 to vector<2x1xf32>
    %620 = arith.addf %616, %619 : vector<2x1xf32>
    %621 = math.rsqrt %620 : vector<2x1xf32>
    %622 = vector.broadcast %621 : vector<2x1xf32> to vector<2x32xf32>
    %623 = arith.mulf %618, %622 : vector<2x32xf32>
    %624 = vector.broadcast %604 : vector<1x32xf32> to vector<2x32xf32>
    %625 = arith.mulf %623, %624 : vector<2x32xf32>
    %626 = vector.broadcast %605 : vector<1x32xf32> to vector<2x32xf32>
    %627 = arith.addf %625, %626 : vector<2x32xf32>
    %cst_123 = arith.constant 5.000000e-01 : f32
    %628 = vector.broadcast %cst_123 : f32 to vector<2x32xf32>
    %629 = arith.mulf %628, %627 : vector<2x32xf32>
    %cst_124 = arith.constant 0.707106769 : f32
    %630 = vector.broadcast %cst_124 : f32 to vector<2x32xf32>
    %631 = arith.mulf %627, %630 : vector<2x32xf32>
    %632 = math.erf %631 : vector<2x32xf32>
    %cst_125 = arith.constant 1.000000e+00 : f32
    %633 = vector.broadcast %cst_125 : f32 to vector<2x32xf32>
    %634 = arith.addf %633, %632 : vector<2x32xf32>
    %635 = arith.mulf %629, %634 : vector<2x32xf32>
    %c0_126 = arith.constant 0 : index
    %c0_127 = arith.constant 0 : index
    %636 = vector.load %arg16[%c0_126, %c0_127] : memref<32x128xbf16, #tpu.memory_space<vmem>>, vector<32x128xbf16>
    %637 = arith.truncf %635 : vector<2x32xf32> to vector<2x32xbf16>
    %cst_128 = arith.constant dense<0.000000e+00> : vector<2x128xf32>
    %638 = tpu.matmul %637, %636, %cst_128 {dimension_numbers = #tpu.dot_dimension_numbers<[1], [0], [0], [1], [0, 0, 1, 1], [], []>} : vector<2x32xbf16>, vector<32x128xbf16>, vector<2x128xf32> -> vector<2x128xf32>
    %c0_129 = arith.constant 0 : index
    %c0_130 = arith.constant 0 : index
    %639 = vector.load %arg17[%c0_129, %c0_130] : memref<1x128xf32, #tpu.memory_space<vmem>>, vector<1x128xf32>
    %640 = vector.broadcast %639 : vector<1x128xf32> to vector<2x128xf32>
    %641 = arith.addf %638, %640 : vector<2x128xf32>
    %c0_131 = arith.constant 0 : index
    %c0_132 = arith.constant 0 : index
    %642 = vector.load %arg18[%c0_131, %c0_132] : memref<2x128xf32, #tpu.memory_space<vmem>>, vector<2x128xf32>
    tpu.vector_store %arg18[%c0_131, %c0_132], %641 {strides = array<i32>} : memref<2x128xf32, #tpu.memory_space<vmem>>, vector<2x128xf32>,
    return
  }
}

</mosaic_0001>

<bundles_post_ra>
// kernel: tpu_custom_call.1
= control target key start
LH: loop header
LB: loop body
LE: loop exit
PB: predicated region body
PF: predicated region fallthrough
CT: control target
= control target key end

     0   :  { %s4642_s0 = inlined_call_operand.hbm [shape: bf16[16,12], index: 0, kind: input, shape index: {}]   ;;  %s4643_s1 = inlined_call_operand.hbm [shape: bf16[12,32], index: 1, kind: input, shape index: {}]   ;;  %s4644_s2 = inlined_call_operand.vmem [shape: f32[1,32], index: 2, kind: input, shape index: {}]   ;;  %s4645_s3 = inlined_call_operand.hbm [shape: f32[1,32], index: 3, kind: input, shape index: {}]   ;;  %s4646_s4 = inlined_call_operand.hbm [shape: f32[1,32], index: 4, kind: input, shape index: {}]   ;;  %s4647_s5 = inlined_call_operand.vmem [shape: bf16[32,128], index: 5, kind: input, shape index: {}]   ;;  %s4648_s6 = inlined_call_operand.hbm [shape: f32[1,128], index: 6, kind: input, shape index: {}]   ;;  %s4649_s7 = inlined_call_operand.hbm [shape: f32[32,128], index: 7, kind: input, shape index: {}]   ;;  %s4650_s8 = inlined_call_operand.hbm [shape: f32[64,128], index: 8, kind: input, shape index: {}]   ;;  %s4651_s9 = inlined_call_operand.hbm [shape: f32[1,128], index: 9, kind: input, shape index: {}]   ;;  %s4652_s10 = inlined_call_operand.hbm [shape: f32[1,32], index: 10, kind: input, shape index: {}]   ;;  %s4653_s11 = inlined_call_operand.<no memory space> [shape: f32[1,1], index: 11, kind: input, shape index: {}]   ;;  %s4654_s12 = inlined_call_operand.vmem [shape: bf16[32,32], index: 12, kind: input, shape index: {}]   ;;  %s4655_s13 = inlined_call_operand.hbm [shape: f32[1,32], index: 13, kind: input, shape index: {}]   ;;  %s4656_s14 = inlined_call_operand.vmem [shape: f32[1,32], index: 14, kind: input, shape index: {}]   ;;  %s4657_s15 = inlined_call_operand.vmem [shape: f32[1,32], index: 15, kind: input, shape index: {}]   ;;  %s4658_s16 = inlined_call_operand.vmem [shape: bf16[32,128], index: 16, kind: input, shape index: {}]   ;;  %s4659_s17 = inlined_call_operand.vmem [shape: f32[1,128], index: 17, kind: input, shape index: {}]   ;;  %s4660_s18 = inlined_call_operand.hbm [shape: f32[2,128], index: 18, kind: output, shape index: {}]  }
   0x1   :  { %4665 = sst [smem:[#allocation28_spill]] %s4642_s0  ;;  %v23_v0 = vstv %s4653_s11 }
   0x2   :  { %4666 = sst [smem:[#allocation29_spill]] %s4643_s1  ;;  %24 = vst [vmem:[#allocation2] sm:$0x1] %v23_v0 }
   0x3   :  { %4667 = sst [smem:[#allocation30_spill]] %s4644_s2 }
   0x4   :  { %25 = vsyncpa [#allocation4], 0 }
   0x5   :  { %26 = vsyncpa [#allocation7], 0 }
   0x6   :  { %27 = vsyncpa [#allocation10], 0 }
   0x7   :  { %28 = vsyncpa [#allocation13], 0 }
   0x8   :  { %29 = vsyncpa [#allocation16], 0 }
   0x9   :  { %30 = vsyncpa [#allocation19], 0 }
   0xa   :  { %31 = vsyncpa [#allocation5], 0  ;;  %s3868_s29 = smov [#allocation6]   ;;  %s3869_s0 = smov [#allocation9]  }
   0xb   :  { %s49_s30 = sshll.u32 %s3868_s29, 4  ;;  %s74_s19 = sshll.u32 %s3869_s0, 4  ;;  %s50_s30 = int_to_ptr.vmem [resolvable:$true] %s49_s30  ;;  %s4000_s19 = int_to_ptr.vmem [resolvable:$true] %s74_s19 }
   0xc   :  { %s4668_s21 = sld [smem:[#allocation29_spill]] }
  0x12   :  { %s3612_s22 = scalar_lea.hbm %s4668_s21, 128 }
  0x13   :  { %p3613_p0 = scmp.ne.s32.totalorder %s4668_s21, %s3612_s22  ;;  %p3616_p1 = scmp.lt.u32.totalorder %s3612_s22, %s4668_s21 }
  0x15   :  { %p3618_p2 = pnand %p3616_p1, %p3613_p0 }
  0x17   :  { %3621 = shalt.err (!%p3618_p2)
}
  0x18   :  { %s3622_s25 = scalar_lea.vmem %s50_s30, 128  ;;  %p3627_p4 = scmp.lt.s32.totalorder %s50_s30, %s50_s30 }
  0x19   :  { %p3623_p3 = scmp.ne.s32.totalorder %s50_s30, %s3622_s25  ;;  %p3628_p5 = scmp.lt.s32.totalorder %s3622_s25, %s3622_s25 }
  0x1b   :  { %p3629_p6 = por %p3628_p5, %p3627_p4 }
  0x1d   :  { %p3630_p7 = pnand %p3629_p6, %p3623_p3 }
  0x1f   :  { %3633 = shalt.err (!%p3630_p7)
}
  0x20   :  { %s4663_s26 = smov 64   ;;  %s3871_s27 = smov 4  }
  0x21   :  { %55 = dma.hbm_to_vmem [thread:$0]  %s4668_s21, 128, %s50_s30, [#allocation7], %s4663_s26, %s4663_s26, %s3871_s27  }
  0x22   :  { %s3634_s20 = scalar_lea.hbm %s4646_s4, 16 }
  0x23   :  { %p3635_p8 = scmp.ne.s32.totalorder %s4646_s4, %s3634_s20  ;;  %p3638_p9 = scmp.lt.u32.totalorder %s3634_s20, %s4646_s4 }
  0x25   :  { %p3640_p10 = pnand %p3638_p9, %p3635_p8 }
  0x27   :  { %3643 = shalt.err (!%p3640_p10)
}
  0x28   :  { %s3644_s24 = scalar_lea.vmem %s4000_s19, 16  ;;  %s3648_s30 = scalar_lea.vmem %s4000_s19, 32 }
  0x29   :  { %p3645_p11 = scmp.ne.s32.totalorder %s4000_s19, %s3644_s24  ;;  %p3649_p12 = scmp.lt.s32.totalorder %s4000_s19, %s4000_s19 }
  0x2a   :  { %p3650_p13 = scmp.lt.s32.totalorder %s3648_s30, %s3644_s24 }
  0x2c   :  { %p3651_p0 = por %p3650_p13, %p3649_p12 }
  0x2e   :  { %p3652_p1 = pnand %p3651_p0, %p3645_p11 }
  0x30   :  { %3655 = shalt.err (!%p3652_p1)
}
  0x31   :  { %77 = dma.hbm_to_vmem [thread:$0]  %s4646_s4, 16, %s4000_s19, [#allocation10]  }
  0x32   :  { %s3872_s28 = smov [#allocation12]   ;;  %s3656_s20 = scalar_lea.hbm %s4649_s7, 512 }
  0x33   :  { %s95_s29 = sshll.u32 %s3872_s28, 4  ;;  %p3657_p2 = scmp.ne.s32.totalorder %s4649_s7, %s3656_s20  ;;  %s96_s29 = int_to_ptr.vmem [resolvable:$true] %s95_s29 }
  0x34   :  { %p3660_p3 = scmp.lt.u32.totalorder %s3656_s20, %s4649_s7 }
  0x36   :  { %p3662_p4 = pnand %p3660_p3, %p3657_p2 }
  0x38   :  { %3665 = shalt.err (!%p3662_p4)
}
  0x39   :  { %s3666_s24 = scalar_lea.vmem %s96_s29, 512  ;;  %p3671_p6 = scmp.lt.s32.totalorder %s96_s29, %s96_s29 }
  0x3a   :  { %p3667_p5 = scmp.ne.s32.totalorder %s96_s29, %s3666_s24  ;;  %p3672_p7 = scmp.lt.s32.totalorder %s3666_s24, %s3666_s24 }
  0x3c   :  { %p3673_p8 = por %p3672_p7, %p3671_p6 }
  0x3e   :  { %p3674_p9 = pnand %p3673_p8, %p3667_p5 }
  0x40   :  { %3677 = shalt.err (!%p3674_p9)
}
  0x41   :  { %s3873_s4 = smov 128   ;;  %s3874_s19 = smov 8  }
  0x42   :  { %101 = dma.hbm_to_vmem [thread:$0]  %s4649_s7, 512, %s96_s29, [#allocation13], %s3873_s4, %s3873_s4, %s3874_s19  }
  0x43   :  { %s3875_s25 = smov [#allocation15]   ;;  %s3876_s0 = smov [#allocation3]  }
  0x44   :  { %s120_s28 = sshll.u32 %s3875_s25, 4  ;;  %s37_s1 = sshll.u32 %s3876_s0, 4  ;;  %s121_s28 = int_to_ptr.vmem [resolvable:$true] %s120_s28  ;;  %s38_s1 = int_to_ptr.vmem [resolvable:$true] %s37_s1 }
  0x45   :  { %s3678_s11 = scalar_lea.hbm %s4651_s9, 16 }
  0x46   :  { %p3679_p10 = scmp.ne.s32.totalorder %s4651_s9, %s3678_s11  ;;  %p3682_p11 = scmp.lt.u32.totalorder %s3678_s11, %s4651_s9 }
  0x48   :  { %p3684_p12 = pnand %p3682_p11, %p3679_p10 }
  0x4a   :  { %3687 = shalt.err (!%p3684_p12)
}
  0x4b   :  { %s3688_s7 = scalar_lea.vmem %s121_s28, 16  ;;  %s3692_s29 = scalar_lea.vmem %s121_s28, 32 }
  0x4c   :  { %p3689_p13 = scmp.ne.s32.totalorder %s121_s28, %s3688_s7  ;;  %p3693_p0 = scmp.lt.s32.totalorder %s121_s28, %s121_s28 }
  0x4d   :  { %p3694_p1 = scmp.lt.s32.totalorder %s3692_s29, %s3688_s7 }
  0x4f   :  { %p3695_p2 = por %p3694_p1, %p3693_p0 }
  0x51   :  { %p3696_p3 = pnand %p3695_p2, %p3689_p13 }
  0x53   :  { %3699 = shalt.err (!%p3696_p3)
}
  0x54   :  { %123 = dma.hbm_to_vmem [thread:$0]  %s4651_s9, 16, %s121_s28, [#allocation16]  }
  0x55   :  { %s4669_s20 = sld [smem:[#allocation28_spill]] }
  0x5b   :  { %s3700_s26 = scalar_lea.hbm %s4669_s20, 128 }
  0x5c   :  { %p3701_p4 = scmp.ne.s32.totalorder %s4669_s20, %s3700_s26  ;;  %p3704_p5 = scmp.lt.u32.totalorder %s3700_s26, %s4669_s20 }
  0x5e   :  { %p3706_p6 = pnand %p3704_p5, %p3701_p4 }
  0x60   :  { %3709 = shalt.err (!%p3706_p6)
}
  0x61   :  { %s3710_s24 = scalar_lea.vmem %s38_s1, 128  ;;  %p3715_p8 = scmp.lt.s32.totalorder %s38_s1, %s38_s1 }
  0x62   :  { %p3711_p7 = scmp.ne.s32.totalorder %s38_s1, %s3710_s24  ;;  %p3716_p9 = scmp.lt.s32.totalorder %s3710_s24, %s3710_s24 }
  0x64   :  { %p3717_p10 = por %p3716_p9, %p3715_p8 }
  0x66   :  { %p3718_p11 = pnand %p3717_p10, %p3711_p7 }
  0x68   :  { %3721 = shalt.err (!%p3718_p11)
}
  0x69   :  { %s4670_s9 = smov 64   ;;  %s3877_s29 = smov [#allocation8]  }
  0x6a   :  { %43 = dma.hbm_to_vmem [thread:$0]  %s4669_s20, 128, %s38_s1, [#allocation4], %s4670_s9, %s4670_s9, %s3871_s27  }
  0x6b   :  { %s64_s30 = sshll.u32 %s3877_s29, 4  ;;  %s3878_s21 = smov [#allocation11]   ;;  %s65_s30 = int_to_ptr.vmem [resolvable:$true] %s64_s30 }
  0x6c   :  { %s86_s25 = sshll.u32 %s3878_s21, 4  ;;  %s3722_s22 = scalar_lea.hbm %s4645_s3, 16  ;;  %s87_s25 = int_to_ptr.vmem [resolvable:$true] %s86_s25 }
  0x6d   :  { %p3723_p12 = scmp.ne.s32.totalorder %s4645_s3, %s3722_s22  ;;  %p3726_p13 = scmp.lt.u32.totalorder %s3722_s22, %s4645_s3 }
  0x6f   :  { %p3728_p0 = pnand %p3726_p13, %p3723_p12 }
  0x71   :  { %3731 = shalt.err (!%p3728_p0)
}
  0x72   :  { %s3732_s1 = scalar_lea.vmem %s65_s30, 16  ;;  %s3736_s20 = scalar_lea.vmem %s65_s30, 32 }
  0x73   :  { %p3733_p1 = scmp.ne.s32.totalorder %s65_s30, %s3732_s1  ;;  %p3737_p2 = scmp.lt.s32.totalorder %s65_s30, %s65_s30 }
  0x74   :  { %p3738_p3 = scmp.lt.s32.totalorder %s3736_s20, %s3732_s1 }
  0x76   :  { %p3739_p4 = por %p3738_p3, %p3737_p2 }
  0x78   :  { %p3740_p5 = pnand %p3739_p4, %p3733_p1 }
  0x7a   :  { %3743 = shalt.err (!%p3740_p5)
}
  0x7b   :  { %67 = dma.hbm_to_vmem [thread:$0]  %s4645_s3, 16, %s65_s30, [#allocation7]  }
  0x7c   :  { %s3744_s0 = scalar_lea.hbm %s4648_s6, 16 }
  0x7d   :  { %p3745_p6 = scmp.ne.s32.totalorder %s4648_s6, %s3744_s0  ;;  %p3748_p7 = scmp.lt.u32.totalorder %s3744_s0, %s4648_s6 }
  0x7f   :  { %p3750_p8 = pnand %p3748_p7, %p3745_p6 }
  0x81   :  { %3753 = shalt.err (!%p3750_p8)
}
  0x82   :  { %s3754_s23 = scalar_lea.vmem %s87_s25, 16  ;;  %s3758_s24 = scalar_lea.vmem %s87_s25, 32 }
  0x83   :  { %p3755_p9 = scmp.ne.s32.totalorder %s87_s25, %s3754_s23  ;;  %p3759_p10 = scmp.lt.s32.totalorder %s87_s25, %s87_s25 }
  0x84   :  { %p3760_p11 = scmp.lt.s32.totalorder %s3758_s24, %s3754_s23 }
  0x86   :  { %p3761_p12 = por %p3760_p11, %p3759_p10 }
  0x88   :  { %p3762_p13 = pnand %p3761_p12, %p3755_p9 }
  0x8a   :  { %3765 = shalt.err (!%p3762_p13)
}
  0x8b   :  { %89 = dma.hbm_to_vmem [thread:$0]  %s4648_s6, 16, %s87_s25, [#allocation10]  }
  0x8c   :  { %s3879_s1 = smov [#allocation14]   ;;  %s3880_s28 = smov [#allocation17]  }
  0x8d   :  { %s107_s20 = sshll.u32 %s3879_s1, 4  ;;  %s130_s7 = sshll.u32 %s3880_s28, 4  ;;  %s108_s20 = int_to_ptr.vmem [resolvable:$true] %s107_s20  ;;  %s131_s7 = int_to_ptr.vmem [resolvable:$true] %s130_s7 }
  0x8e   :  { %s3766_s0 = scalar_lea.hbm %s4650_s8, 1024 }
  0x8f   :  { %p3767_p0 = scmp.ne.s32.totalorder %s4650_s8, %s3766_s0  ;;  %p3770_p1 = scmp.lt.u32.totalorder %s3766_s0, %s4650_s8 }
  0x91   :  { %p3772_p2 = pnand %p3770_p1, %p3767_p0 }
  0x93   :  { %3775 = shalt.err (!%p3772_p2)
}
  0x94   :  { %s3776_s6 = scalar_lea.vmem %s108_s20, 1024  ;;  %p3781_p4 = scmp.lt.s32.totalorder %s108_s20, %s108_s20 }
  0x95   :  { %p3777_p3 = scmp.ne.s32.totalorder %s108_s20, %s3776_s6  ;;  %p3782_p5 = scmp.lt.s32.totalorder %s3776_s6, %s3776_s6 }
  0x97   :  { %p3783_p6 = por %p3782_p5, %p3781_p4 }
  0x99   :  { %p3784_p7 = pnand %p3783_p6, %p3777_p3 }
  0x9b   :  { %3787 = shalt.err (!%p3784_p7)
}
  0x9c   :  { %113 = dma.hbm_to_vmem [thread:$0]  %s4650_s8, 1024, %s108_s20, [#allocation13], %s3873_s4, %s3873_s4, %s3874_s19  }
  0x9d   :  { %s3788_s30 = scalar_lea.hbm %s4652_s10, 16 }
  0x9e   :  { %p3789_p8 = scmp.ne.s32.totalorder %s4652_s10, %s3788_s30  ;;  %p3792_p9 = scmp.lt.u32.totalorder %s3788_s30, %s4652_s10 }
  0xa0   :  { %p3794_p10 = pnand %p3792_p9, %p3789_p8 }
  0xa2   :  { %3797 = shalt.err (!%p3794_p10)
}
  0xa3   :  { %s3798_s0 = scalar_lea.vmem %s131_s7, 16  ;;  %s3802_s26 = scalar_lea.vmem %s131_s7, 32 }
  0xa4   :  { %p3799_p11 = scmp.ne.s32.totalorder %s131_s7, %s3798_s0  ;;  %p3803_p12 = scmp.lt.s32.totalorder %s131_s7, %s131_s7 }
  0xa5   :  { %p3804_p13 = scmp.lt.s32.totalorder %s3802_s26, %s3798_s0 }
  0xa7   :  { %p3805_p0 = por %p3804_p13, %p3803_p12 }
  0xa9   :  { %p3806_p1 = pnand %p3805_p0, %p3799_p11 }
  0xab   :  { %3809 = shalt.err (!%p3806_p1)
}
  0xac   :  { %133 = dma.hbm_to_vmem [thread:$0]  %s4652_s10, 16, %s131_s7, [#allocation16]  }
  0xad   :  { %s3881_s19 = smov [#allocation18]   ;;  %s3810_s2 = scalar_lea.hbm %s4655_s13, 16 }
  0xae   :  { %s144_s20 = sshll.u32 %s3881_s19, 4  ;;  %p3811_p2 = scmp.ne.s32.totalorder %s4655_s13, %s3810_s2  ;;  %s145_s20 = int_to_ptr.vmem [resolvable:$true] %s144_s20 }
  0xaf   :  { %p3814_p3 = scmp.lt.u32.totalorder %s3810_s2, %s4655_s13 }
  0xb1   :  { %p3816_p4 = pnand %p3814_p3, %p3811_p2 }
  0xb3   :  { %3819 = shalt.err (!%p3816_p4)
}
  0xb4   :  { %s3820_s3 = scalar_lea.vmem %s145_s20, 16  ;;  %s3824_s10 = scalar_lea.vmem %s145_s20, 32 }
  0xb5   :  { %p3821_p5 = scmp.ne.s32.totalorder %s145_s20, %s3820_s3  ;;  %p3825_p6 = scmp.lt.s32.totalorder %s145_s20, %s145_s20 }
  0xb6   :  { %p3826_p7 = scmp.lt.s32.totalorder %s3824_s10, %s3820_s3 }
  0xb8   :  { %p3827_p8 = por %p3826_p7, %p3825_p6 }
  0xba   :  { %p3828_p9 = pnand %p3827_p8, %p3821_p5 }
  0xbc   :  { %3831 = shalt.err (!%p3828_p9)
}
  0xbd   :  { %147 = dma.hbm_to_vmem [thread:$0]  %s4655_s13, 16, %s145_s20, [#allocation19]  }
  0xbe   :  { %3854 = dma.done.wait [#allocation4], 128  }
  0xbf   :  { %3855 = vsyncadd [#allocation4], 4294967168 }
  0xc0   :  { %3856 = dma.done.wait [#allocation7], 144  }
  0xc1   :  { %3857 = vsyncadd [#allocation7], 4294967152 }
  0xc2   :  { %3858 = dma.done.wait [#allocation10], 32  }
  0xc3   :  { %3859 = vsyncadd [#allocation10], 4294967264 }
  0xc4   :  { %3860 = dma.done.wait [#allocation13], 1536  }
  0xc5   :  { %3861 = vsyncadd [#allocation13], 4294965760 }
  0xc6   :  { %3862 = dma.done.wait [#allocation16], 32  }
  0xc7   :  { %3863 = vsyncadd [#allocation16], 4294967264 }
  0xc8   :  { %3864 = dma.done.wait [#allocation19], 16  }
  0xc9   :  { %3865 = vsyncadd [#allocation19], 4294967280  ;;  %v3882_v1 = vmov 0.0   ;;  %vm3883_vm0 = vmmov 0   ;;  %vm212_vm1 = vcmask 1045504   ;;  %v3400_v4 = vld [vmem:[#allocation3] sm:$0xff]  }
  0xca   :  { %2943 = vmatprep.subr.bf16.mxu0 %v3882_v1  ;;  %2945 = vmatprep.mubr.msk.bf16.mxu0 %vm3883_vm0, %v3882_v1  ;;  %v3399_v2 = vld [vmem:[#allocation6] sm:$0x3f]   ;;  %vm208_vm2 = vcmask 97280   ;;  %s4671_s28 = sld [smem:[#allocation30_spill]]  ;;  %vm259_vm3 = vcmask 261120   ;;  %v3401_v24 = vld [vmem:[%s4647_s5] sm:$0xff]  }
  0xcb   :  { %2949 = vmatprep.subr.bf16.mxu1 %v3882_v1  ;;  %2953 = vmatprep.mubr.msk.bf16.mxu1 %vm3883_vm0, %v3882_v1  ;;  %v214_v3 = vsel %vm212_vm1, %v3399_v2, 0  ;;  %v371_v25 = vld [vmem:[#allocation12] sm:$0xff]  ;;  %v372_v26 = vld [vmem:[#allocation12 + $0x8] sm:$0xff]  ;;  %v3884_v27 = vmov 0.0|0.0   ;;  %v373_v29 = vld [vmem:[#allocation12 + $0x10] sm:$0xff]  ;;  %vm522_vm4 = vcmask 1041409  }
  0xcc   :  { %2944 = vmatpush3.bf16.msra.mxu0 %v214_v3  ;;  %v4159_v28 = vpack.c.bf16 %v372_v26, %v371_v25  ;;  %v374_v30 = vld [vmem:[#allocation12 + $0x18] sm:$0xff]  ;;  %2950 = vmatpush3.bf16.msra.mxu1 %v3401_v24  ;;  %v379_v25 = vld [vmem:[#allocation14 + $0x20] sm:$0xff]  ;;  %v380_v26 = vld [vmem:[#allocation14 + $0x28] sm:$0xff]  ;;  %vm528_vm5 = vcmask 523264   ;;  %vm785_vm6 = vcmask 1042434   ;;  %vm1043_vm7 = vcmask 1043459  }
  0xcd   :  { %3213 = vmatprep.subr.bf16.mxu0 %v3884_v27  ;;  %v3402_v31 = vld [vmem:[%s4647_s5 + $0x8] sm:$0xff]   ;;  %2951 = vmatprep.subr.bf16.mxu1 %v3882_v1  ;;  %v4166_v32 = vpack.c.bf16 %v374_v30, %v373_v29  ;;  %v2762_v41 = vld [vmem:[#allocation8] ss:$0 sm:$0xff]  ;;  %v2763_v45 = vld [vmem:[#allocation9] ss:$0 sm:$0xff]  ;;  %s3885_s5 = smov 32   ;;  %v4206_v30 = vpack.c.bf16 %v380_v26, %v379_v25 }
  0xce   :  { %v2764_v52 = vld [vmem:[#allocation11] ss:$0 sm:$0xff]  ;;  %vm1302_vm8 = vcmask 1044484   ;;  %vm1561_vm9 = vcmask 1045509   ;;  %vm1820_vm10 = vcmask 1046534   ;;  %vm2079_vm11 = vcmask 1047559  }
  0xcf   :  { %2946 = vmatmul.mubr.msk.bf16.vlgmr.msra.gmra.mrb[0].mxu0 %vm208_vm2, %v3400_v4  ;;  %vm2353_vm12 = vcmask 1040384   ;;  %s3886_s8 = smov 96   ;;  %vm639_vm13 = vcmask 254976   ;;  %s3888_s4 = smov 6   ;;  %vm2490_vm14 = vcmask 7168   ;;  %vm2492_vm15 = vcmask 15360  }
  0xd0   :  { %2965 = vmatprep.mubr.msk.f32.mxu0 %vm3883_vm0, %v3882_v1  ;;  %v2758_v5 = vld [vmem:[%s4671_s28] ss:$0 sm:$0xff]  ;;  %3215 = vmatpush3.bf16.msra.mxu0 %v4159_v28  ;;  %s3889_s19 = smov 1   ;;  %s3890_s20 = smov 3   ;;  %vm2494_vm1 = vcmask 23552   ;;  %vm2496_vm2 = vcmask 31744  }
  0xd1   :  { %3216 = vmatprep.subr.bf16.mxu0 %v3884_v27  ;;  %2952 = vmatpush3.bf16.msra.mxu1 %v3402_v31  ;;  %v381_v31 = vld [vmem:[#allocation14 + $0x30] sm:$0xff]  ;;  %s3891_s22 = smov 5   ;;  %s3892_s11 = smov 7  }
  0xd2   :  { %3219 = vmatprep.subr.bf16.mxu1 %v3884_v27 }
  0xd4   :  { %3218 = vmatpush3.bf16.msra.mxu0 %v4166_v32 }
  0xd5   :  { %3231 = vmatprep.subr.bf16.mxu0 %v3884_v27 }
  0xd7   :  { %2966 = vmatmul.mubr.f32.vlgmr.msra.gmra.mrb[4].mxu0 %v3882_v1 }
  0xd8   :  { %3233 = vmatpush3.bf16.msra.mxu0 %v4159_v28  ;;  %2995 = vmatprep.mubr.msk.f32.mxu0 %vm3883_vm0, %v3882_v1 }
  0xd9   :  { %3234 = vmatprep.subr.bf16.mxu0 %v3884_v27 }
  0xdc   :  { %3236 = vmatpush3.bf16.msra.mxu0 %v4166_v32 }
  0xdd   :  { %3237 = vmatprep.subr.bf16.mxu0 %v3884_v27 }
 0x1a2   :  { %v250_v6 = vpop.f32.mrb[0].mxu0 }
 0x1a3   :  { %v251_v7 = vadd.f32 %v2758_v5, %v250_v6  ;;  %v2947_v8 = vpop.f32.mrb[1].mxu0 }
 0x1a4   :  { %v253_v9 = vpop.f32.mrb[2].mxu0 }
 0x1a5   :  { %v254_v10 = vadd.f32 %v2758_v5, %v253_v9  ;;  %v2948_v11 = vpop.f32.mrb[3].mxu0  ;;  %v260_v12 = vsel %vm259_vm3, %v251_v7, 0.0 }
 0x1a6   :  { %261 = vadd.xlane.f32.xlu0 %v260_v12 }
 0x1a7   :  { %v263_v13 = vsel %vm259_vm3, %v254_v10, 0.0 }
 0x1aa   :  { %264 = vadd.xlane.f32.xlu0 %v263_v13  ;;  %v461_v50 = vpop.f32.mrb[4].mxu0 }
 0x1ab   :  { %v2967_v51 = vpop.f32.mrb[5].mxu0  ;;  %v466_v56 = vrot.slane %v461_v50, 1 }
 0x1ac   :  { %v4239_v51 = vld [vmem:[#allocation15] ss:$0 sm:$0xff] }
 0x233   :  { %v262_v14 = vpop.xlane.xlu0 %261 }
 0x234   :  { %v267_v15 = vmul.f32 0.03125, %v262_v14 }
 0x236   :  { %v269_v16 = vsub.f32 %v251_v7, %v267_v15 }
 0x237   :  { %v265_v17 = vpop.xlane.xlu0 %264 }
 0x238   :  { %v268_v18 = vmul.f32 0.03125, %v265_v17  ;;  %v271_v19 = vmul.f32 %v269_v16, %v269_v16 }
 0x23a   :  { %v270_v20 = vsub.f32 %v254_v10, %v268_v18  ;;  %v273_v21 = vsel %vm259_vm3, %v271_v19, 0.0  ;;  %v375_v19 = vld [vmem:[#allocation14] sm:$0xff] }
 0x23b   :  { %274 = vadd.xlane.f32.xlu1 %v273_v21  ;;  %v377_v21 = vld [vmem:[#allocation14 + $0x10] sm:$0xff] }
 0x23c   :  { %v272_v22 = vmul.f32 %v270_v20, %v270_v20 }
 0x23e   :  { %v276_v23 = vsel %vm259_vm3, %v272_v22, 0.0 }
 0x23f   :  { %277 = vadd.xlane.f32.xlu1 %v276_v23  ;;  %v378_v23 = vld [vmem:[#allocation14 + $0x18] sm:$0xff] }
 0x240   :  { %v4201_v24 = vpack.c.bf16 %v378_v23, %v377_v21 }
 0x2c8   :  { %v275_v33 = vpop.xlane.xlu1 %274 }
 0x2c9   :  { %v279_v34 = vmul.f32 0.03125, %v275_v33  ;;  %v382_v33 = vld [vmem:[#allocation14 + $0x38] sm:$0xff] }
 0x2cb   :  { %v281_v35 = vadd.f32 1e-05, %v279_v34 }
 0x2cc   :  { %v278_v36 = vpop.xlane.xlu1 %277 }
 0x2cd   :  { %3407 = vrsqrt.f32 %v281_v35  ;;  %v280_v37 = vmul.f32 0.03125, %v278_v36  ;;  %v4211_v35 = vpack.c.bf16 %v382_v33, %v381_v31 }
 0x2cf   :  { %v282_v38 = vadd.f32 1e-05, %v280_v37 }
 0x2d1   :  { %3409 = vrsqrt.f32 %v282_v38 }
 0x2d7   :  { %v3408_v39 = vpop.eup %3407 }
 0x2d8   :  { %v285_v40 = vmul.f32 %v3408_v39, %v269_v16 }
 0x2da   :  { %v293_v44 = vmul.f32 %v2762_v41, %v285_v40 }
 0x2db   :  { %v3410_v42 = vpop.eup %3409 }
 0x2dc   :  { %v286_v43 = vmul.f32 %v3410_v42, %v270_v20  ;;  %v301_v47 = vadd.f32 %v2763_v45, %v293_v44  ;;  %v376_v20 = vld [vmem:[#allocation14 + $0x8] sm:$0xff] }
 0x2dd   :  { %v4198_v22 = vpack.c.bf16 %v376_v20, %v375_v19 }
 0x2de   :  { %v294_v46 = vmul.f32 %v2762_v41, %v286_v43 }
 0x2e0   :  { %v302_v48 = vadd.f32 %v2763_v45, %v294_v46 }
 0x2e2   :  { %v307_v49 = vpack.c.bf16 %v302_v48, %v301_v47 }
 0x2e4   :  { %2954 = vmatmul.mubr.msk.bf16.vlgmr.msra.gmra.mrb[0].mxu1 %vm259_vm3, %v307_v49 }
 0x2e5   :  { %2984 = vmatprep.mubr.msk.f32.mxu1 %vm3883_vm0, %v3882_v1  ;;  %3221 = vmatpush3.bf16.msra.mxu1 %v4198_v22 }
 0x2e6   :  { %3222 = vmatprep.subr.bf16.mxu1 %v3884_v27 }
 0x2e9   :  { %3224 = vmatpush3.bf16.msra.mxu1 %v4201_v24 }
 0x2ea   :  { %3225 = vmatprep.subr.bf16.mxu1 %v3884_v27 }
 0x2ed   :  { %3227 = vmatpush3.bf16.msra.mxu1 %v4206_v30 }
 0x2ee   :  { %3228 = vmatprep.subr.bf16.mxu1 %v3884_v27 }
 0x2f1   :  { %3230 = vmatpush3.bf16.msra.mxu1 %v4211_v35 }
 0x2f2   :  { %3249 = vmatprep.subr.bf16.mxu1 %v3884_v27 }
 0x3b7   :  { %v364_v53 = vpop.f32.mrb[0].mxu1 }
 0x3b8   :  { %v4182_v54 = vadd.f32 %v2764_v52, %v364_v53  ;;  %v2955_v55 = vpop.f32.mrb[1].mxu1 }
 0x3b9   :  { %v367_v57 = vpop.f32.mrb[2].mxu1 }
 0x3ba   :  { %v469_v58 = vadd.f32 %v461_v50, %v4182_v54  ;;  %v4185_v59 = vadd.f32 %v2764_v52, %v367_v57  ;;  %v2956_v60 = vpop.f32.mrb[3].mxu1 }
 0x3bc   :  { %3411 = vtanh.f32 %v469_v58  ;;  %v470_v61 = vadd.f32 %v466_v56, %v4185_v59  ;;  %v2769_v2 = vmul.f32 -1.442695, %v469_v58 }
 0x3be   :  { %3413 = vtanh.f32 %v470_v61  ;;  %v2770_v0 = vmul.f32 -1.442695, %v470_v61 }
 0x3c0   :  { %3415 = vpow2.f32 %v2770_v0 }
 0x3c1   :  { %3417 = vpow2.f32 %v2769_v2 }
 0x3c6   :  { %v3412_v62 = vpop.eup %3411 }
 0x3c7   :  { %489 = vrot.lane.b32.xlu1 %v3412_v62, %s4670_s9 }
 0x3c8   :  { %v3414_v63 = vpop.eup %3413 }
 0x3c9   :  { %491 = vrot.lane.b32.xlu0 %v3414_v63, %s4670_s9 }
 0x3ca   :  { %v3416_v3 = vpop.eup %3415 }
 0x3cb   :  { %v478_v4 = vadd.f32 1.0, %v3416_v3  ;;  %v3418_v5 = vpop.eup %3417 }
 0x3cc   :  { %v477_v6 = vadd.f32 1.0, %v3418_v5 }
 0x3cd   :  { %3419 = vrcp.f32 %v478_v4 }
 0x3ce   :  { %3421 = vrcp.f32 %v477_v6 }
 0x3d7   :  { %v3420_v7 = vpop.eup %3419 }
 0x3d8   :  { %v3422_v11 = vpop.eup %3421  ;;  %v486_v13 = vmul.f32 0.0, %v3420_v7 }
 0x3d9   :  { %v485_v16 = vmul.f32 0.0, %v3422_v11 }
 0x439   :  { %v490_v10 = vpop.permute.xlu1 %489 }
 0x43a   :  { %v495_v12 = vmul.f32 %v3422_v11, %v490_v10 }
 0x43b   :  { %v492_v8 = vpop.permute.xlu0 %491 }
 0x43c   :  { %v496_v9 = vmul.f32 %v3420_v7, %v492_v8 }
 0x43e   :  { %501 = vrot.lane.b32.xlu1 %v496_v9, %s3885_s5 }
 0x442   :  { %499 = vrot.lane.b32.xlu1 %v495_v12, %s3885_s5 }
 0x4b0   :  { %v502_v14 = vpop.permute.xlu1 %501 }
 0x4b1   :  { %v4192_v15 = vadd.f32 %v502_v14, %v486_v13 }
 0x4b3   :  { %3423 = vtanh.f32 %v4192_v15  ;;  %v745_v13 = vrot.slane %v4192_v15, 7 }
 0x4b4   :  { %v500_v17 = vpop.permute.xlu1 %499 }
 0x4b5   :  { %v4195_v18 = vadd.f32 %v500_v17, %v485_v16 }
 0x4b7   :  { %3425 = vtanh.f32 %v4195_v18  ;;  %v744_v16 = vrot.slane %v4195_v18, 7 }
 0x4bd   :  { %v3424_v29 = vpop.eup %3423 }
 0x4be   :  { %513 = vrot.lane.b32.xlu0 %v3424_v29, %s4670_s9 }
 0x4c1   :  { %v3426_v34 = vpop.eup %3425 }
 0x4c2   :  { %511 = vrot.lane.b32.xlu1 %v3426_v34, %s4670_s9 }
 0x530   :  { %v514_v36 = vpop.permute.xlu0 %513 }
 0x531   :  { %v518_v37 = vmul.f32 %v3420_v7, %v514_v36 }
 0x533   :  { %v521_v39 = vrot.slane %v518_v37, 7 }
 0x534   :  { %v512_v38 = vpop.permute.xlu1 %511 }
 0x535   :  { %v517_v40 = vmul.f32 %v3422_v11, %v512_v38 }
 0x537   :  { %v523_v41 = vsel %vm522_vm4, %v521_v39, %v517_v40 }
 0x538   :  { %524 = vrot.lane.b32.xlu0 %v523_v41, %s3885_s5 }
 0x5aa   :  { %v525_v42 = vpop.permute.xlu0 %524 }
 0x5ab   :  { %v527_v43 = vsel %vm259_vm3, %v525_v42, 0.0  ;;  %2996 = vmatmul.mubr.msk.f32.vlgmr.msra.gmra.mrb[6].mxu0 %vm259_vm3, %v525_v42 }
 0x5ac   :  { %2985 = vmatmul.mubr.msk.f32.vlgmr.msra.gmra.mrb[4].mxu1 %vm528_vm5, %v527_v43  ;;  %3239 = vmatpush3.bf16.msra.mxu0 %v4198_v22 }
 0x5ad   :  { %3240 = vmatprep.subr.bf16.mxu0 %v3884_v27  ;;  %3251 = vmatpush3.bf16.msra.mxu1 %v4159_v28 }
 0x5ae   :  { %3252 = vmatprep.subr.bf16.mxu1 %v3884_v27  ;;  %3025 = vmatprep.mubr.msk.f32.mxu1 %vm3883_vm0, %v3882_v1 }
 0x5af   :  { %3014 = vmatprep.mubr.msk.f32.mxu0 %vm3883_vm0, %v3882_v1 }
 0x5b0   :  { %3242 = vmatpush3.bf16.msra.mxu0 %v4201_v24 }
 0x5b1   :  { %3243 = vmatprep.subr.bf16.mxu0 %v3884_v27  ;;  %3254 = vmatpush3.bf16.msra.mxu1 %v4166_v32 }
 0x5b2   :  { %3255 = vmatprep.subr.bf16.mxu1 %v3884_v27 }
 0x5b4   :  { %3245 = vmatpush3.bf16.msra.mxu0 %v4206_v30 }
 0x5b5   :  { %3246 = vmatprep.subr.bf16.mxu0 %v3884_v27 }
 0x5b8   :  { %3248 = vmatpush3.bf16.msra.mxu0 %v4211_v35 }
 0x5b9   :  { %3267 = vmatprep.subr.bf16.mxu0 %v3884_v27 }
 0x67e   :  { %v718_v44 = vpop.f32.mrb[6].mxu0 }
 0x67f   :  { %v723_v45 = vrot.slane %v718_v44, 7  ;;  %v727_v46 = vadd.f32 %v718_v44, %v4185_v59  ;;  %v598_v47 = vpop.f32.mrb[4].mxu1  ;;  %v2997_v48 = vpop.f32.mrb[7].mxu0 }
 0x680   :  { %v2986_v49 = vpop.f32.mrb[5].mxu1  ;;  %v599_v52 = vadd.f32 %v4239_v51, %v598_v47 }
 0x681   :  { %v726_v50 = vadd.f32 %v723_v45, %v4182_v54  ;;  %3427 = vtanh.f32 %v727_v46  ;;  %v2777_v57 = vmul.f32 -1.442695, %v727_v46 }
 0x682   :  { %v2772_v60 = vmul.f32 -1.442695, %v599_v52 }
 0x683   :  { %3429 = vtanh.f32 %v726_v50  ;;  %v2776_v58 = vmul.f32 -1.442695, %v726_v50 }
 0x684   :  { %3431 = vtanh.f32 %v599_v52 }
 0x685   :  { %3433 = vpow2.f32 %v2777_v57 }
 0x686   :  { %3435 = vpow2.f32 %v2776_v58 }
 0x687   :  { %3437 = vpow2.f32 %v2772_v60 }
 0x68b   :  { %v3428_v53 = vpop.eup %3427 }
 0x68c   :  { %754 = vrot.lane.b32.xlu0 %v3428_v53, %s4670_s9 }
 0x68d   :  { %v3430_v55 = vpop.eup %3429 }
 0x68e   :  { %752 = vrot.lane.b32.xlu1 %v3430_v55, %s4670_s9  ;;  %v3432_v56 = vpop.eup %3431 }
 0x68f   :  { %v3434_v61 = vpop.eup %3433 }
 0x690   :  { %v3436_v62 = vpop.eup %3435  ;;  %v735_v63 = vadd.f32 1.0, %v3434_v61 }
 0x691   :  { %v734_v0 = vadd.f32 1.0, %v3436_v62  ;;  %v3438_v2 = vpop.eup %3437 }
 0x692   :  { %611 = vrot.lane.b32.xlu1 %v3432_v56, %s4670_s9  ;;  %3439 = vrcp.f32 %v735_v63  ;;  %v605_v3 = vadd.f32 1.0, %v3438_v2 }
 0x693   :  { %3441 = vrcp.f32 %v734_v0 }
 0x694   :  { %3443 = vrcp.f32 %v605_v3 }
 0x69c   :  { %v3440_v4 = vpop.eup %3439 }
 0x69d   :  { %v3442_v7 = vpop.eup %3441  ;;  %v749_v14 = vmul.f32 %v3440_v4, %v745_v13 }
 0x69e   :  { %v3444_v10 = vpop.eup %3443  ;;  %v748_v20 = vmul.f32 %v3442_v7, %v744_v16 }
 0x69f   :  { %v609_v25 = vmul.f32 0.0, %v3444_v10 }
 0x6fe   :  { %v755_v5 = vpop.permute.xlu0 %754 }
 0x6ff   :  { %v759_v6 = vmul.f32 %v3440_v4, %v755_v5 }
 0x700   :  { %v753_v8 = vpop.permute.xlu1 %752 }
 0x701   :  { %764 = vrot.lane.b32.xlu1 %v759_v6, %s3885_s5  ;;  %v758_v9 = vmul.f32 %v3442_v7, %v753_v8 }
 0x703   :  { %762 = vrot.lane.b32.xlu0 %v758_v9, %s3885_s5 }
 0x704   :  { %v612_v11 = vpop.permute.xlu1 %611 }
 0x705   :  { %v614_v12 = vmul.f32 %v3444_v10, %v612_v11 }
 0x707   :  { %616 = vrot.lane.b32.xlu0 %v614_v12, %s3885_s5 }
 0x773   :  { %v765_v17 = vpop.permute.xlu1 %764 }
 0x774   :  { %v4250_v19 = vadd.f32 %v765_v17, %v749_v14 }
 0x775   :  { %v763_v21 = vpop.permute.xlu0 %762 }
 0x776   :  { %3445 = vtanh.f32 %v4250_v19  ;;  %v4253_v23 = vadd.f32 %v763_v21, %v748_v20 }
 0x778   :  { %3447 = vtanh.f32 %v4253_v23 }
 0x779   :  { %v617_v26 = vpop.permute.xlu0 %616 }
 0x77a   :  { %v4256_v29 = vadd.f32 %v617_v26, %v609_v25  ;;  %v1002_v26 = vrot.slane %v4253_v23, 7 }
 0x77c   :  { %3449 = vtanh.f32 %v4256_v29 }
 0x780   :  { %v3446_v15 = vpop.eup %3445 }
 0x781   :  { %776 = vrot.lane.b32.xlu0 %v3446_v15, %s4670_s9  ;;  %v1003_v15 = vrot.slane %v4250_v19, 7 }
 0x782   :  { %v3448_v18 = vpop.eup %3447 }
 0x783   :  { %774 = vrot.lane.b32.xlu1 %v3448_v18, %s4670_s9 }
 0x786   :  { %v3450_v31 = vpop.eup %3449 }
 0x787   :  { %622 = vrot.lane.b32.xlu1 %v3450_v31, %s4670_s9 }
 0x7f3   :  { %v777_v33 = vpop.permute.xlu0 %776 }
 0x7f4   :  { %v781_v34 = vmul.f32 %v3440_v4, %v777_v33 }
 0x7f5   :  { %v775_v37 = vpop.permute.xlu1 %774 }
 0x7f6   :  { %v784_v36 = vrot.slane %v781_v34, 7  ;;  %v780_v38 = vmul.f32 %v3442_v7, %v775_v37 }
 0x7f8   :  { %v903_v39 = vrot.slane %v780_v38, 1  ;;  %v786_v40 = vsel %vm785_vm6, %v784_v36, %v780_v38  ;;  %vm2502_vm6 = vcmask 56320  }
 0x7f9   :  { %787 = vrot.lane.b32.xlu0 %v786_v40, %s3885_s5  ;;  %v623_v41 = vpop.permute.xlu1 %622 }
 0x7fa   :  { %v4263_v42 = vmul.f32 %v3444_v10, %v623_v41  ;;  %v904_v43 = vsel %vm522_vm4, %v781_v34, %v903_v39 }
 0x7fc   :  { %v791_v44 = vrot.slane %v4263_v42, 7 }
 0x7fd   :  { %905 = vrot.lane.b32.xlu0 %v904_v43, %s3885_s5 }
 0x7fe   :  { %792 = vrot.lane.b32.xlu1 %v791_v44, %s4670_s9 }
 0x86b   :  { %v788_v45 = vpop.permute.xlu0 %787 }
 0x86f   :  { %v906_v46 = vpop.permute.xlu0 %905 }
 0x870   :  { %3026 = vmatmul.mubr.msk.f32.vlgmr.msra.gmra.mrb[6].mxu1 %vm259_vm3, %v906_v46  ;;  %v793_v47 = vpop.permute.xlu1 %792 }
 0x871   :  { %v795_v48 = vsel %vm259_vm3, %v788_v45, %v793_v47  ;;  %3257 = vmatpush3.bf16.msra.mxu1 %v4198_v22  ;;  %3044 = vmatprep.mubr.msk.f32.mxu1 %vm3883_vm0, %v3882_v1 }
 0x872   :  { %v797_v49 = vrot.slane %v795_v48, 1  ;;  %3258 = vmatprep.subr.bf16.mxu1 %v3884_v27 }
 0x874   :  { %3015 = vmatmul.mubr.msk.f32.vlgmr.msra.gmra.mrb[8].mxu0 %vm528_vm5, %v797_v49 }
 0x875   :  { %3260 = vmatpush3.bf16.msra.mxu1 %v4201_v24  ;;  %3269 = vmatpush3.bf16.msra.mxu0 %v4159_v28 }
 0x876   :  { %3261 = vmatprep.subr.bf16.mxu1 %v3884_v27  ;;  %3270 = vmatprep.subr.bf16.mxu0 %v3884_v27 }
 0x877   :  { %3055 = vmatprep.mubr.msk.f32.mxu0 %vm3883_vm0, %v3882_v1 }
 0x879   :  { %3263 = vmatpush3.bf16.msra.mxu1 %v4206_v30  ;;  %3272 = vmatpush3.bf16.msra.mxu0 %v4166_v32 }
 0x87a   :  { %3264 = vmatprep.subr.bf16.mxu1 %v3884_v27  ;;  %3273 = vmatprep.subr.bf16.mxu0 %v3884_v27 }
 0x87d   :  { %3266 = vmatpush3.bf16.msra.mxu1 %v4211_v35 }
 0x87e   :  { %3285 = vmatprep.subr.bf16.mxu1 %v3884_v27 }
 0x943   :  { %v975_v50 = vpop.f32.mrb[6].mxu1 }
 0x944   :  { %v980_v52 = vrot.slane %v975_v50, 6  ;;  %v981_v53 = vrot.slane %v975_v50, 7  ;;  %v3027_v55 = vpop.f32.mrb[7].mxu1 }
 0x946   :  { %v984_v56 = vadd.f32 %v980_v52, %v4182_v54  ;;  %v985_v57 = vadd.f32 %v981_v53, %v4185_v59 }
 0x947   :  { %v866_v58 = vpop.f32.mrb[8].mxu0 }
 0x948   :  { %3451 = vtanh.f32 %v984_v56  ;;  %v3016_v60 = vpop.f32.mrb[9].mxu0  ;;  %v867_v61 = vadd.f32 %v4239_v51, %v866_v58  ;;  %v2781_v2 = vmul.f32 -1.442695, %v984_v56  ;;  %v2782_v3 = vmul.f32 -1.442695, %v985_v57 }
 0x949   :  { %3453 = vtanh.f32 %v985_v57 }
 0x94a   :  { %3455 = vtanh.f32 %v867_v61  ;;  %v2779_v4 = vmul.f32 -1.442695, %v867_v61 }
 0x94b   :  { %3457 = vpow2.f32 %v2781_v2 }
 0x94c   :  { %3459 = vpow2.f32 %v2782_v3 }
 0x94d   :  { %3461 = vpow2.f32 %v2779_v4 }
 0x952   :  { %v3452_v62 = vpop.eup %3451 }
 0x953   :  { %v3454_v63 = vpop.eup %3453  ;;  %1010 = vrot.lane.b32.xlu1 %v3452_v62, %s4670_s9 }
 0x954   :  { %1012 = vrot.lane.b32.xlu0 %v3454_v63, %s4670_s9  ;;  %v3456_v0 = vpop.eup %3455 }
 0x955   :  { %v3458_v5 = vpop.eup %3457 }
 0x956   :  { %v3460_v6 = vpop.eup %3459  ;;  %v992_v7 = vadd.f32 1.0, %v3458_v5 }
 0x957   :  { %879 = vrot.lane.b32.xlu1 %v3456_v0, %s4670_s9  ;;  %v993_v8 = vadd.f32 1.0, %v3460_v6  ;;  %v3462_v9 = vpop.eup %3461 }
 0x958   :  { %3463 = vrcp.f32 %v992_v7  ;;  %v873_v10 = vadd.f32 1.0, %v3462_v9 }
 0x959   :  { %3465 = vrcp.f32 %v993_v8 }
 0x95a   :  { %3467 = vrcp.f32 %v873_v10 }
 0x962   :  { %v3464_v11 = vpop.eup %3463 }
 0x963   :  { %v3466_v13 = vpop.eup %3465  ;;  %v1006_v18 = vmul.f32 %v3464_v11, %v1002_v26 }
 0x964   :  { %v3468_v20 = vpop.eup %3467  ;;  %v1007_v33 = vmul.f32 %v3466_v13, %v1003_v15 }
 0x965   :  { %v877_v38 = vmul.f32 %v3468_v20, %v4256_v29 }
 0x9c5   :  { %v1011_v12 = vpop.permute.xlu1 %1010 }
 0x9c6   :  { %v1013_v14 = vpop.permute.xlu0 %1012  ;;  %v1016_v16 = vmul.f32 %v3464_v11, %v1011_v12 }
 0x9c7   :  { %v1017_v17 = vmul.f32 %v3466_v13, %v1013_v14 }
 0x9c8   :  { %1020 = vrot.lane.b32.xlu0 %v1016_v16, %s3885_s5 }
 0x9c9   :  { %1022 = vrot.lane.b32.xlu1 %v1017_v17, %s3885_s5  ;;  %v880_v21 = vpop.permute.xlu1 %879 }
 0x9ca   :  { %v882_v25 = vmul.f32 %v3468_v20, %v880_v21 }
 0x9cc   :  { %884 = vrot.lane.b32.xlu0 %v882_v25, %s3885_s5 }
 0xa3a   :  { %v1021_v31 = vpop.permute.xlu0 %1020 }
 0xa3b   :  { %v4299_v34 = vadd.f32 %v1021_v31, %v1006_v18  ;;  %v1023_v36 = vpop.permute.xlu1 %1022 }
 0xa3c   :  { %v4301_v37 = vadd.f32 %v1023_v36, %v1007_v33 }
 0xa3d   :  { %3469 = vtanh.f32 %v4299_v34 }
 0xa3e   :  { %3471 = vtanh.f32 %v4301_v37  ;;  %v885_v39 = vpop.permute.xlu0 %884 }
 0xa3f   :  { %v4306_v40 = vadd.f32 %v885_v39, %v877_v38 }
 0xa41   :  { %3473 = vtanh.f32 %v4306_v40 }
 0xa47   :  { %v3470_v19 = vpop.eup %3469 }
 0xa48   :  { %v3472_v23 = vpop.eup %3471  ;;  %1032 = vrot.lane.b32.xlu1 %v3470_v19, %s4670_s9 }
 0xa49   :  { %1034 = vrot.lane.b32.xlu0 %v3472_v23, %s4670_s9  ;;  %v1261_v23 = vrot.slane %v4299_v34, 7 }
 0xa4b   :  { %v3474_v41 = vpop.eup %3473 }
 0xa4c   :  { %890 = vrot.lane.b32.xlu1 %v3474_v41, %s4670_s9  ;;  %v1262_v41 = vrot.slane %v4301_v37, 7 }
 0xaba   :  { %v1033_v43 = vpop.permute.xlu1 %1032 }
 0xabb   :  { %v1035_v44 = vpop.permute.xlu0 %1034  ;;  %v1038_v45 = vmul.f32 %v3464_v11, %v1033_v43 }
 0xabc   :  { %v1039_v46 = vmul.f32 %v3466_v13, %v1035_v44 }
 0xabd   :  { %v1161_v48 = vrot.slane %v1038_v45, 2 }
 0xabe   :  { %v1042_v29 = vrot.slane %v1039_v46, 7  ;;  %v891_v47 = vpop.permute.xlu1 %890  ;;  %v1162_v49 = vrot.slane %v1039_v46, 1 }
 0xabf   :  { %v4312_v50 = vmul.f32 %v3468_v20, %v891_v47 }
 0xac0   :  { %v1044_v52 = vsel %vm1043_vm7, %v1042_v29, %v1038_v45  ;;  %v1163_v55 = vsel %vm522_vm4, %v1162_v49, %v1161_v48  ;;  %vm2504_vm7 = vcmask 58368  }
 0xac1   :  { %1045 = vrot.lane.b32.xlu0 %v1044_v52, %s3885_s5  ;;  %v1049_v53 = vrot.slane %v4312_v50, 6 }
 0xac3   :  { %1050 = vrot.lane.b32.xlu1 %v1049_v53, %s4670_s9 }
 0xac5   :  { %1164 = vrot.lane.b32.xlu0 %v1163_v55, %s3885_s5 }
 0xb33   :  { %v1046_v56 = vpop.permute.xlu0 %1045 }
 0xb35   :  { %v1051_v57 = vpop.permute.xlu1 %1050 }
 0xb36   :  { %v1053_v58 = vsel %vm259_vm3, %v1046_v56, %v1051_v57 }
 0xb37   :  { %v1165_v60 = vpop.permute.xlu0 %1164  ;;  %v1055_v61 = vrot.slane %v1053_v58, 2 }
 0xb38   :  { %3056 = vmatmul.mubr.msk.f32.vlgmr.msra.gmra.mrb[10].mxu0 %vm259_vm3, %v1165_v60 }
 0xb39   :  { %3275 = vmatpush3.bf16.msra.mxu0 %v4198_v22  ;;  %3074 = vmatprep.mubr.msk.f32.mxu0 %vm3883_vm0, %v3882_v1 }
 0xb3a   :  { %3045 = vmatmul.mubr.msk.f32.vlgmr.msra.gmra.mrb[8].mxu1 %vm528_vm5, %v1055_v61  ;;  %3276 = vmatprep.subr.bf16.mxu0 %v3884_v27 }
 0xb3b   :  { %3287 = vmatpush3.bf16.msra.mxu1 %v4159_v28  ;;  %3085 = vmatprep.mubr.msk.f32.mxu1 %vm3883_vm0, %v3882_v1 }
 0xb3c   :  { %3288 = vmatprep.subr.bf16.mxu1 %v3884_v27 }
 0xb3d   :  { %3278 = vmatpush3.bf16.msra.mxu0 %v4201_v24 }
 0xb3e   :  { %3279 = vmatprep.subr.bf16.mxu0 %v3884_v27 }
 0xb3f   :  { %3290 = vmatpush3.bf16.msra.mxu1 %v4166_v32 }
 0xb40   :  { %3291 = vmatprep.subr.bf16.mxu1 %v3884_v27 }
 0xb41   :  { %3281 = vmatpush3.bf16.msra.mxu0 %v4206_v30 }
 0xb42   :  { %3282 = vmatprep.subr.bf16.mxu0 %v3884_v27 }
 0xb45   :  { %3284 = vmatpush3.bf16.msra.mxu0 %v4211_v35 }
 0xb46   :  { %3303 = vmatprep.subr.bf16.mxu0 %v3884_v27 }
 0xc0b   :  { %v1234_v62 = vpop.f32.mrb[10].mxu0 }
 0xc0c   :  { %v1239_v63 = vrot.slane %v1234_v62, 5  ;;  %v1240_v0 = vrot.slane %v1234_v62, 6  ;;  %v3057_v2 = vpop.f32.mrb[11].mxu0 }
 0xc0d   :  { %v1124_v3 = vpop.f32.mrb[8].mxu1 }
 0xc0e   :  { %v1243_v4 = vadd.f32 %v1239_v63, %v4182_v54  ;;  %v1244_v5 = vadd.f32 %v1240_v0, %v4185_v59  ;;  %v3046_v6 = vpop.f32.mrb[9].mxu1  ;;  %v1125_v7 = vadd.f32 %v4239_v51, %v1124_v3 }
 0xc10   :  { %3475 = vtanh.f32 %v1243_v4  ;;  %v2786_v11 = vmul.f32 -1.442695, %v1243_v4  ;;  %v2787_v12 = vmul.f32 -1.442695, %v1244_v5  ;;  %v2784_v13 = vmul.f32 -1.442695, %v1125_v7 }
 0xc11   :  { %3477 = vtanh.f32 %v1244_v5 }
 0xc12   :  { %3479 = vtanh.f32 %v1125_v7 }
 0xc13   :  { %3481 = vpow2.f32 %v2786_v11 }
 0xc14   :  { %3483 = vpow2.f32 %v2787_v12 }
 0xc15   :  { %3485 = vpow2.f32 %v2784_v13 }
 0xc1a   :  { %v3476_v8 = vpop.eup %3475 }
 0xc1b   :  { %v3478_v9 = vpop.eup %3477  ;;  %1269 = vrot.lane.b32.xlu1 %v3476_v8, %s4670_s9 }
 0xc1c   :  { %1271 = vrot.lane.b32.xlu0 %v3478_v9, %s4670_s9  ;;  %v3480_v10 = vpop.eup %3479 }
 0xc1d   :  { %v3482_v14 = vpop.eup %3481 }
 0xc1e   :  { %v3484_v16 = vpop.eup %3483  ;;  %v1251_v17 = vadd.f32 1.0, %v3482_v14 }
 0xc1f   :  { %1137 = vrot.lane.b32.xlu1 %v3480_v10, %s4670_s9  ;;  %v1252_v20 = vadd.f32 1.0, %v3484_v16  ;;  %v3486_v21 = vpop.eup %3485 }
 0xc20   :  { %3487 = vrcp.f32 %v1251_v17  ;;  %v1131_v25 = vadd.f32 1.0, %v3486_v21 }
 0xc21   :  { %3489 = vrcp.f32 %v1252_v20 }
 0xc22   :  { %3491 = vrcp.f32 %v1131_v25 }
 0xc2a   :  { %v3488_v26 = vpop.eup %3487 }
 0xc2b   :  { %v3490_v18 = vpop.eup %3489  ;;  %v1265_v43 = vmul.f32 %v3488_v26, %v1261_v23 }
 0xc2c   :  { %v3492_v38 = vpop.eup %3491  ;;  %v1266_v44 = vmul.f32 %v3490_v18, %v1262_v41 }
 0xc2d   :  { %v1135_v48 = vmul.f32 %v3492_v38, %v4306_v40 }
 0xc8d   :  { %v1270_v15 = vpop.permute.xlu1 %1269 }
 0xc8e   :  { %v1272_v31 = vpop.permute.xlu0 %1271  ;;  %v1275_v33 = vmul.f32 %v3488_v26, %v1270_v15 }
 0xc8f   :  { %v1276_v36 = vmul.f32 %v3490_v18, %v1272_v31 }
 0xc90   :  { %1279 = vrot.lane.b32.xlu0 %v1275_v33, %s3885_s5 }
 0xc91   :  { %1281 = vrot.lane.b32.xlu1 %v1276_v36, %s3885_s5  ;;  %v1138_v39 = vpop.permute.xlu1 %1137 }
 0xc92   :  { %v1140_v19 = vmul.f32 %v3492_v38, %v1138_v39 }
 0xc94   :  { %1142 = vrot.lane.b32.xlu0 %v1140_v19, %s3885_s5 }
 0xd02   :  { %v1280_v45 = vpop.permute.xlu0 %1279 }
 0xd03   :  { %v1282_v46 = vpop.permute.xlu1 %1281  ;;  %v4349_v29 = vadd.f32 %v1280_v45, %v1265_v43 }
 0xd04   :  { %v4351_v47 = vadd.f32 %v1282_v46, %v1266_v44 }
 0xd05   :  { %3493 = vtanh.f32 %v4349_v29 }
 0xd06   :  { %3495 = vtanh.f32 %v4351_v47  ;;  %v1143_v49 = vpop.permute.xlu0 %1142 }
 0xd07   :  { %v4356_v52 = vadd.f32 %v1143_v49, %v1135_v48 }
 0xd09   :  { %3497 = vtanh.f32 %v4356_v52 }
 0xd0f   :  { %v3494_v34 = vpop.eup %3493 }
 0xd10   :  { %v3496_v37 = vpop.eup %3495  ;;  %1291 = vrot.lane.b32.xlu1 %v3494_v34, %s4670_s9 }
 0xd11   :  { %1293 = vrot.lane.b32.xlu0 %v3496_v37, %s4670_s9 }
 0xd13   :  { %v3498_v53 = vpop.eup %3497 }
 0xd14   :  { %1148 = vrot.lane.b32.xlu1 %v3498_v53, %s4670_s9  ;;  %v1520_v53 = vrot.slane %v4349_v29, 7 }
 0xd82   :  { %v1292_v55 = vpop.permute.xlu1 %1291 }
 0xd83   :  { %v1294_v56 = vpop.permute.xlu0 %1293  ;;  %v1297_v58 = vmul.f32 %v3488_v26, %v1292_v55  ;;  %v1521_v55 = vrot.slane %v4351_v47, 7 }
 0xd84   :  { %v1298_v57 = vmul.f32 %v3490_v18, %v1294_v56 }
 0xd85   :  { %v1420_v62 = vrot.slane %v1297_v58, 3 }
 0xd86   :  { %v1301_v40 = vrot.slane %v1298_v57, 7  ;;  %v1149_v60 = vpop.permute.xlu1 %1148  ;;  %v1421_v61 = vrot.slane %v1298_v57, 2 }
 0xd87   :  { %v4362_v63 = vmul.f32 %v3492_v38, %v1149_v60 }
 0xd88   :  { %v1303_v0 = vsel %vm1302_vm8, %v1301_v40, %v1297_v58  ;;  %v1422_v3 = vsel %vm522_vm4, %v1421_v61, %v1420_v62 }
 0xd89   :  { %1304 = vrot.lane.b32.xlu0 %v1303_v0, %s3885_s5  ;;  %v1308_v2 = vrot.slane %v4362_v63, 5 }
 0xd8b   :  { %1309 = vrot.lane.b32.xlu1 %v1308_v2, %s4670_s9 }
 0xd8d   :  { %1423 = vrot.lane.b32.xlu0 %v1422_v3, %s3885_s5 }
 0xdfb   :  { %v1305_v4 = vpop.permute.xlu0 %1304 }
 0xdfd   :  { %v1310_v5 = vpop.permute.xlu1 %1309 }
 0xdfe   :  { %v1312_v6 = vsel %vm259_vm3, %v1305_v4, %v1310_v5 }
 0xdff   :  { %v1424_v7 = vpop.permute.xlu0 %1423  ;;  %v1314_v8 = vrot.slane %v1312_v6, 3 }
 0xe00   :  { %3086 = vmatmul.mubr.msk.f32.vlgmr.msra.gmra.mrb[10].mxu1 %vm259_vm3, %v1424_v7 }
 0xe01   :  { %3293 = vmatpush3.bf16.msra.mxu1 %v4198_v22  ;;  %3104 = vmatprep.mubr.msk.f32.mxu1 %vm3883_vm0, %v3882_v1 }
 0xe02   :  { %3075 = vmatmul.mubr.msk.f32.vlgmr.msra.gmra.mrb[12].mxu0 %vm528_vm5, %v1314_v8  ;;  %3294 = vmatprep.subr.bf16.mxu1 %v3884_v27 }
 0xe03   :  { %3305 = vmatpush3.bf16.msra.mxu0 %v4159_v28  ;;  %3115 = vmatprep.mubr.msk.f32.mxu0 %vm3883_vm0, %v3882_v1 }
 0xe04   :  { %3306 = vmatprep.subr.bf16.mxu0 %v3884_v27 }
 0xe05   :  { %3296 = vmatpush3.bf16.msra.mxu1 %v4201_v24 }
 0xe06   :  { %3297 = vmatprep.subr.bf16.mxu1 %v3884_v27 }
 0xe07   :  { %3308 = vmatpush3.bf16.msra.mxu0 %v4166_v32 }
 0xe08   :  { %3309 = vmatprep.subr.bf16.mxu0 %v3884_v27 }
 0xe09   :  { %3299 = vmatpush3.bf16.msra.mxu1 %v4206_v30 }
 0xe0a   :  { %3300 = vmatprep.subr.bf16.mxu1 %v3884_v27 }
 0xe0d   :  { %3302 = vmatpush3.bf16.msra.mxu1 %v4211_v35 }
 0xe0e   :  { %3321 = vmatprep.subr.bf16.mxu1 %v3884_v27 }
 0xed3   :  { %v1493_v9 = vpop.f32.mrb[10].mxu1 }
 0xed4   :  { %v1498_v10 = vrot.slane %v1493_v9, 4  ;;  %v1499_v11 = vrot.slane %v1493_v9, 5  ;;  %v3087_v12 = vpop.f32.mrb[11].mxu1 }
 0xed5   :  { %v1383_v13 = vpop.f32.mrb[12].mxu0 }
 0xed6   :  { %v1502_v14 = vadd.f32 %v1498_v10, %v4182_v54  ;;  %v1503_v16 = vadd.f32 %v1499_v11, %v4185_v59  ;;  %v3076_v17 = vpop.f32.mrb[13].mxu0  ;;  %v1384_v20 = vadd.f32 %v4239_v51, %v1383_v13 }
 0xed8   :  { %3499 = vtanh.f32 %v1502_v14  ;;  %v2791_v15 = vmul.f32 -1.442695, %v1502_v14  ;;  %v2792_v18 = vmul.f32 -1.442695, %v1503_v16  ;;  %v2789_v31 = vmul.f32 -1.442695, %v1384_v20 }
 0xed9   :  { %3501 = vtanh.f32 %v1503_v16 }
 0xeda   :  { %3503 = vtanh.f32 %v1384_v20 }
 0xedb   :  { %3505 = vpow2.f32 %v2791_v15 }
 0xedc   :  { %3507 = vpow2.f32 %v2792_v18 }
 0xedd   :  { %3509 = vpow2.f32 %v2789_v31 }
 0xee2   :  { %v3500_v21 = vpop.eup %3499 }
 0xee3   :  { %v3502_v25 = vpop.eup %3501  ;;  %1528 = vrot.lane.b32.xlu1 %v3500_v21, %s4670_s9 }
 0xee4   :  { %1530 = vrot.lane.b32.xlu0 %v3502_v25, %s4670_s9  ;;  %v3504_v26 = vpop.eup %3503 }
 0xee5   :  { %v3506_v33 = vpop.eup %3505 }
 0xee6   :  { %v3508_v36 = vpop.eup %3507  ;;  %v1510_v38 = vadd.f32 1.0, %v3506_v33 }
 0xee7   :  { %1396 = vrot.lane.b32.xlu1 %v3504_v26, %s4670_s9  ;;  %v1511_v39 = vadd.f32 1.0, %v3508_v36  ;;  %v3510_v19 = vpop.eup %3509 }
 0xee8   :  { %3511 = vrcp.f32 %v1510_v38  ;;  %v1390_v23 = vadd.f32 1.0, %v3510_v19 }
 0xee9   :  { %3513 = vrcp.f32 %v1511_v39 }
 0xeea   :  { %3515 = vrcp.f32 %v1390_v23 }
 0xef2   :  { %v3512_v41 = vpop.eup %3511 }
 0xef3   :  { %v3514_v44 = vpop.eup %3513  ;;  %v1524_v56 = vmul.f32 %v3512_v41, %v1520_v53 }
 0xef4   :  { %v3516_v49 = vpop.eup %3515  ;;  %v1525_v58 = vmul.f32 %v3514_v44, %v1521_v55 }
 0xef5   :  { %v1394_v62 = vmul.f32 %v3516_v49, %v4356_v52 }
 0xf55   :  { %v1529_v43 = vpop.permute.xlu1 %1528 }
 0xf56   :  { %v1531_v45 = vpop.permute.xlu0 %1530  ;;  %v1534_v46 = vmul.f32 %v3512_v41, %v1529_v43 }
 0xf57   :  { %v1535_v48 = vmul.f32 %v3514_v44, %v1531_v45 }
 0xf58   :  { %1538 = vrot.lane.b32.xlu0 %v1534_v46, %s3885_s5 }
 0xf59   :  { %1540 = vrot.lane.b32.xlu1 %v1535_v48, %s3885_s5  ;;  %v1397_v34 = vpop.permute.xlu1 %1396 }
 0xf5a   :  { %v1399_v37 = vmul.f32 %v3516_v49, %v1397_v34 }
 0xf5c   :  { %1401 = vrot.lane.b32.xlu0 %v1399_v37, %s3885_s5 }
 0xfca   :  { %v1539_v57 = vpop.permute.xlu0 %1538 }
 0xfcb   :  { %v4399_v40 = vadd.f32 %v1539_v57, %v1524_v56  ;;  %v1541_v60 = vpop.permute.xlu1 %1540 }
 0xfcc   :  { %v4401_v61 = vadd.f32 %v1541_v60, %v1525_v58 }
 0xfcd   :  { %3517 = vtanh.f32 %v4399_v40 }
 0xfce   :  { %3519 = vtanh.f32 %v4401_v61  ;;  %v1402_v0 = vpop.permute.xlu0 %1401 }
 0xfcf   :  { %v4406_v2 = vadd.f32 %v1402_v0, %v1394_v62 }
 0xfd1   :  { %3521 = vtanh.f32 %v4406_v2 }
 0xfd7   :  { %v3518_v29 = vpop.eup %3517 }
 0xfd8   :  { %v3520_v47 = vpop.eup %3519  ;;  %1550 = vrot.lane.b32.xlu1 %v3518_v29, %s4670_s9 }
 0xfd9   :  { %1552 = vrot.lane.b32.xlu0 %v3520_v47, %s4670_s9 }
 0xfdb   :  { %v3522_v3 = vpop.eup %3521 }
 0xfdc   :  { %1407 = vrot.lane.b32.xlu1 %v3522_v3, %s4670_s9 }
0x104a   :  { %v1551_v4 = vpop.permute.xlu1 %1550 }
0x104b   :  { %v1553_v5 = vpop.permute.xlu0 %1552  ;;  %v1556_v6 = vmul.f32 %v3512_v41, %v1551_v4  ;;  %v1779_v4 = vrot.slane %v4399_v40, 7 }
0x104c   :  { %v1557_v7 = vmul.f32 %v3514_v44, %v1553_v5  ;;  %v1780_v5 = vrot.slane %v4401_v61, 7 }
0x104d   :  { %v1679_v9 = vrot.slane %v1556_v6, 4 }
0x104e   :  { %v1560_v52 = vrot.slane %v1557_v7, 7  ;;  %v1408_v8 = vpop.permute.xlu1 %1407  ;;  %v1680_v10 = vrot.slane %v1557_v7, 3 }
0x104f   :  { %v4412_v11 = vmul.f32 %v3516_v49, %v1408_v8 }
0x1050   :  { %v1562_v12 = vsel %vm1561_vm9, %v1560_v52, %v1556_v6  ;;  %v1681_v14 = vsel %vm522_vm4, %v1680_v10, %v1679_v9 }
0x1051   :  { %1563 = vrot.lane.b32.xlu0 %v1562_v12, %s3885_s5  ;;  %v1567_v13 = vrot.slane %v4412_v11, 4 }
0x1053   :  { %1568 = vrot.lane.b32.xlu1 %v1567_v13, %s4670_s9 }
0x1055   :  { %1682 = vrot.lane.b32.xlu0 %v1681_v14, %s3885_s5 }
0x10c3   :  { %v1564_v16 = vpop.permute.xlu0 %1563 }
0x10c5   :  { %v1569_v17 = vpop.permute.xlu1 %1568 }
0x10c6   :  { %v1571_v20 = vsel %vm259_vm3, %v1564_v16, %v1569_v17 }
0x10c7   :  { %v1683_v21 = vpop.permute.xlu0 %1682  ;;  %v1573_v25 = vrot.slane %v1571_v20, 4 }
0x10c8   :  { %3116 = vmatmul.mubr.msk.f32.vlgmr.msra.gmra.mrb[14].mxu0 %vm259_vm3, %v1683_v21 }
0x10c9   :  { %3311 = vmatpush3.bf16.msra.mxu0 %v4198_v22  ;;  %3134 = vmatprep.mubr.msk.f32.mxu0 %vm3883_vm0, %v3882_v1 }
0x10ca   :  { %3105 = vmatmul.mubr.msk.f32.vlgmr.msra.gmra.mrb[12].mxu1 %vm528_vm5, %v1573_v25  ;;  %3312 = vmatprep.subr.bf16.mxu0 %v3884_v27 }
0x10cb   :  { %3323 = vmatpush3.bf16.msra.mxu1 %v4159_v28  ;;  %3145 = vmatprep.mubr.msk.f32.mxu1 %vm3883_vm0, %v3882_v1 }
0x10cc   :  { %3324 = vmatprep.subr.bf16.mxu1 %v3884_v27 }
0x10cd   :  { %3314 = vmatpush3.bf16.msra.mxu0 %v4201_v24 }
0x10ce   :  { %3315 = vmatprep.subr.bf16.mxu0 %v3884_v27 }
0x10cf   :  { %3326 = vmatpush3.bf16.msra.mxu1 %v4166_v32 }
0x10d0   :  { %3327 = vmatprep.subr.bf16.mxu1 %v3884_v27 }
0x10d1   :  { %3317 = vmatpush3.bf16.msra.mxu0 %v4206_v30 }
0x10d2   :  { %3318 = vmatprep.subr.bf16.mxu0 %v3884_v27 }
0x10d5   :  { %3320 = vmatpush3.bf16.msra.mxu0 %v4211_v35 }
0x10d6   :  { %3339 = vmatprep.subr.bf16.mxu0 %v3884_v27 }
0x119b   :  { %v1752_v26 = vpop.f32.mrb[14].mxu0 }
0x119c   :  { %v1757_v15 = vrot.slane %v1752_v26, 3  ;;  %v1758_v18 = vrot.slane %v1752_v26, 4  ;;  %v3117_v31 = vpop.f32.mrb[15].mxu0 }
0x119d   :  { %v1642_v33 = vpop.f32.mrb[12].mxu1 }
0x119e   :  { %v1761_v36 = vadd.f32 %v1757_v15, %v4182_v54  ;;  %v1762_v38 = vadd.f32 %v1758_v18, %v4185_v59  ;;  %v3106_v39 = vpop.f32.mrb[13].mxu1  ;;  %v1643_v19 = vadd.f32 %v4239_v51, %v1642_v33 }
0x11a0   :  { %3523 = vtanh.f32 %v1761_v36  ;;  %v2796_v44 = vmul.f32 -1.442695, %v1761_v36  ;;  %v2797_v45 = vmul.f32 -1.442695, %v1762_v38  ;;  %v2794_v46 = vmul.f32 -1.442695, %v1643_v19 }
0x11a1   :  { %3525 = vtanh.f32 %v1762_v38 }
0x11a2   :  { %3527 = vtanh.f32 %v1643_v19 }
0x11a3   :  { %3529 = vpow2.f32 %v2796_v44 }
0x11a4   :  { %3531 = vpow2.f32 %v2797_v45 }
0x11a5   :  { %3533 = vpow2.f32 %v2794_v46 }
0x11aa   :  { %v3524_v23 = vpop.eup %3523 }
0x11ab   :  { %v3526_v41 = vpop.eup %3525  ;;  %1787 = vrot.lane.b32.xlu1 %v3524_v23, %s4670_s9 }
0x11ac   :  { %1789 = vrot.lane.b32.xlu0 %v3526_v41, %s4670_s9  ;;  %v3528_v43 = vpop.eup %3527 }
0x11ad   :  { %v3530_v48 = vpop.eup %3529 }
0x11ae   :  { %v3532_v49 = vpop.eup %3531  ;;  %v1769_v34 = vadd.f32 1.0, %v3530_v48 }
0x11af   :  { %1655 = vrot.lane.b32.xlu1 %v3528_v43, %s4670_s9  ;;  %v1770_v37 = vadd.f32 1.0, %v3532_v49  ;;  %v3534_v53 = vpop.eup %3533 }
0x11b0   :  { %3535 = vrcp.f32 %v1769_v34  ;;  %v1649_v55 = vadd.f32 1.0, %v3534_v53 }
0x11b1   :  { %3537 = vrcp.f32 %v1770_v37 }
0x11b2   :  { %3539 = vrcp.f32 %v1649_v55 }
0x11ba   :  { %v3536_v56 = vpop.eup %3535 }
0x11bb   :  { %v3538_v58 = vpop.eup %3537  ;;  %v1783_v6 = vmul.f32 %v3536_v56, %v1779_v4 }
0x11bc   :  { %v3540_v29 = vpop.eup %3539  ;;  %v1784_v7 = vmul.f32 %v3538_v58, %v1780_v5 }
0x11bd   :  { %v1653_v12 = vmul.f32 %v3540_v29, %v4406_v2 }
0x121d   :  { %v1788_v57 = vpop.permute.xlu1 %1787 }
0x121e   :  { %v1790_v60 = vpop.permute.xlu0 %1789  ;;  %v1793_v62 = vmul.f32 %v3536_v56, %v1788_v57 }
0x121f   :  { %v1794_v0 = vmul.f32 %v3538_v58, %v1790_v60 }
0x1220   :  { %1797 = vrot.lane.b32.xlu0 %v1793_v62, %s3885_s5 }
0x1221   :  { %1799 = vrot.lane.b32.xlu1 %v1794_v0, %s3885_s5  ;;  %v1656_v47 = vpop.permute.xlu1 %1655 }
0x1222   :  { %v1658_v3 = vmul.f32 %v3540_v29, %v1656_v47 }
0x1224   :  { %1660 = vrot.lane.b32.xlu0 %v1658_v3, %s3885_s5 }
0x1292   :  { %v1798_v52 = vpop.permute.xlu0 %1797 }
0x1293   :  { %v1800_v8 = vpop.permute.xlu1 %1799  ;;  %v4449_v9 = vadd.f32 %v1798_v52, %v1783_v6 }
0x1294   :  { %v4451_v10 = vadd.f32 %v1800_v8, %v1784_v7 }
0x1295   :  { %3541 = vtanh.f32 %v4449_v9 }
0x1296   :  { %3543 = vtanh.f32 %v4451_v10  ;;  %v1661_v13 = vpop.permute.xlu0 %1660 }
0x1297   :  { %v4456_v14 = vadd.f32 %v1661_v13, %v1653_v12 }
0x1299   :  { %3545 = vtanh.f32 %v4456_v14 }
0x129f   :  { %v3542_v40 = vpop.eup %3541 }
0x12a0   :  { %v3544_v61 = vpop.eup %3543  ;;  %1809 = vrot.lane.b32.xlu1 %v3542_v40, %s4670_s9 }
0x12a1   :  { %1811 = vrot.lane.b32.xlu0 %v3544_v61, %s4670_s9  ;;  %v2039_v61 = vrot.slane %v4451_v10, 7 }
0x12a3   :  { %v3546_v16 = vpop.eup %3545 }
0x12a4   :  { %1666 = vrot.lane.b32.xlu1 %v3546_v16, %s4670_s9 }
0x1312   :  { %v1810_v17 = vpop.permute.xlu1 %1809 }
0x1313   :  { %v1812_v20 = vpop.permute.xlu0 %1811  ;;  %v1815_v25 = vmul.f32 %v3536_v56, %v1810_v17 }
0x1314   :  { %v1816_v21 = vmul.f32 %v3538_v58, %v1812_v20  ;;  %v2038_v20 = vrot.slane %v4449_v9, 7 }
0x1315   :  { %v1938_v18 = vrot.slane %v1815_v25, 5 }
0x1316   :  { %v1819_v2 = vrot.slane %v1816_v21, 7  ;;  %v1667_v26 = vpop.permute.xlu1 %1666  ;;  %v1939_v15 = vrot.slane %v1816_v21, 4 }
0x1317   :  { %v4462_v31 = vmul.f32 %v3540_v29, %v1667_v26 }
0x1318   :  { %v1821_v33 = vsel %vm1820_vm10, %v1819_v2, %v1815_v25  ;;  %v1940_v38 = vsel %vm522_vm4, %v1939_v15, %v1938_v18 }
0x1319   :  { %1822 = vrot.lane.b32.xlu0 %v1821_v33, %s3885_s5  ;;  %v1826_v36 = vrot.slane %v4462_v31, 3 }
0x131b   :  { %1827 = vrot.lane.b32.xlu1 %v1826_v36, %s4670_s9 }
0x131d   :  { %1941 = vrot.lane.b32.xlu0 %v1940_v38, %s3885_s5 }
0x138b   :  { %v1823_v39 = vpop.permute.xlu0 %1822 }
0x138d   :  { %v1828_v19 = vpop.permute.xlu1 %1827 }
0x138e   :  { %v1830_v23 = vsel %vm259_vm3, %v1823_v39, %v1828_v19 }
0x138f   :  { %v1942_v41 = vpop.permute.xlu0 %1941  ;;  %v1832_v43 = vrot.slane %v1830_v23, 5 }
0x1390   :  { %3146 = vmatmul.mubr.msk.f32.vlgmr.msra.gmra.mrb[14].mxu1 %vm259_vm3, %v1942_v41 }
0x1391   :  { %3329 = vmatpush3.bf16.msra.mxu1 %v4198_v22  ;;  %3164 = vmatprep.mubr.msk.f32.mxu1 %vm3883_vm0, %v3882_v1 }
0x1392   :  { %3135 = vmatmul.mubr.msk.f32.vlgmr.msra.gmra.mrb[16].mxu0 %vm528_vm5, %v1832_v43  ;;  %3330 = vmatprep.subr.bf16.mxu1 %v3884_v27 }
0x1393   :  { %3341 = vmatpush3.bf16.msra.mxu0 %v4159_v28  ;;  %3175 = vmatprep.mubr.msk.f32.mxu0 %vm3883_vm0, %v3882_v1 }
0x1394   :  { %3342 = vmatprep.subr.bf16.mxu0 %v3884_v27 }
0x1395   :  { %3332 = vmatpush3.bf16.msra.mxu1 %v4201_v24 }
0x1396   :  { %3333 = vmatprep.subr.bf16.mxu1 %v3884_v27 }
0x1397   :  { %3344 = vmatpush3.bf16.msra.mxu0 %v4166_v32 }
0x1398   :  { %3345 = vmatprep.subr.bf16.mxu0 %v3884_v27 }
0x1399   :  { %3335 = vmatpush3.bf16.msra.mxu1 %v4206_v30 }
0x139a   :  { %3336 = vmatprep.subr.bf16.mxu1 %v3884_v27 }
0x139d   :  { %3338 = vmatpush3.bf16.msra.mxu1 %v4211_v35 }
0x139e   :  { %3197 = vmatprep.subr.bf16.mxu1 %v3882_v1 }
0x1463   :  { %v2011_v28 = vpop.f32.mrb[14].mxu1 }
0x1464   :  { %v2016_v44 = vrot.slane %v2011_v28, 2  ;;  %v2017_v45 = vrot.slane %v2011_v28, 3  ;;  %v3147_v46 = vpop.f32.mrb[15].mxu1 }
0x1465   :  { %v1901_v48 = vpop.f32.mrb[16].mxu0 }
0x1466   :  { %v2021_v49 = vadd.f32 %v2017_v45, %v4185_v59  ;;  %v3136_v34 = vpop.f32.mrb[17].mxu0  ;;  %v2020_v32 = vadd.f32 %v2016_v44, %v4182_v54  ;;  %v1902_v37 = vadd.f32 %v4239_v51, %v1901_v48 }
0x1468   :  { %3547 = vtanh.f32 %v2021_v49  ;;  %v2802_v57 = vmul.f32 -1.442695, %v2021_v49  ;;  %v2801_v58 = vmul.f32 -1.442695, %v2020_v32  ;;  %v2799_v60 = vmul.f32 -1.442695, %v1902_v37 }
0x1469   :  { %3549 = vtanh.f32 %v2020_v32 }
0x146a   :  { %3551 = vtanh.f32 %v1902_v37 }
0x146b   :  { %3553 = vpow2.f32 %v2802_v57 }
0x146c   :  { %3555 = vpow2.f32 %v2801_v58 }
0x146d   :  { %3557 = vpow2.f32 %v2799_v60 }
0x1472   :  { %v3548_v53 = vpop.eup %3547 }
0x1473   :  { %2048 = vrot.lane.b32.xlu1 %v3548_v53, %s4670_s9  ;;  %v3550_v55 = vpop.eup %3549 }
0x1474   :  { %v3552_v56 = vpop.eup %3551 }
0x1475   :  { %1914 = vrot.lane.b32.xlu0 %v3552_v56, %s4670_s9  ;;  %v3554_v62 = vpop.eup %3553  ;;  %v4533_v56 = vld [vmem:[#allocation15] ss:$0 sm:$0xff] }
0x1476   :  { %v3556_v0 = vpop.eup %3555  ;;  %v2029_v51 = vadd.f32 1.0, %v3554_v62 }
0x1477   :  { %2046 = vrot.lane.b32.xlu1 %v3550_v55, %s4670_s9  ;;  %v3558_v29 = vpop.eup %3557  ;;  %v2028_v47 = vadd.f32 1.0, %v3556_v0 }
0x1478   :  { %3559 = vrcp.f32 %v2029_v51  ;;  %v1908_v3 = vadd.f32 1.0, %v3558_v29 }
0x1479   :  { %3561 = vrcp.f32 %v2028_v47 }
0x147a   :  { %3563 = vrcp.f32 %v1908_v3 }
0x1482   :  { %v3560_v4 = vpop.eup %3559 }
0x1483   :  { %v3562_v7 = vpop.eup %3561  ;;  %v2043_v16 = vmul.f32 %v3560_v4, %v2039_v61 }
0x1484   :  { %v3564_v52 = vpop.eup %3563  ;;  %v2042_v2 = vmul.f32 %v3562_v7, %v2038_v20 }
0x1485   :  { %v1912_v25 = vmul.f32 %v3564_v52, %v4456_v14 }
0x14e5   :  { %v2049_v5 = vpop.permute.xlu1 %2048 }
0x14e6   :  { %v2053_v6 = vmul.f32 %v3560_v4, %v2049_v5 }
0x14e7   :  { %v1915_v8 = vpop.permute.xlu0 %1914 }
0x14e8   :  { %2058 = vrot.lane.b32.xlu0 %v2053_v6, %s3885_s5  ;;  %v1917_v13 = vmul.f32 %v3564_v52, %v1915_v8 }
0x14e9   :  { %v2047_v12 = vpop.permute.xlu1 %2046 }
0x14ea   :  { %v2052_v40 = vmul.f32 %v3562_v7, %v2047_v12  ;;  %1919 = vrot.lane.b32.xlu1 %v1917_v13, %s3885_s5 }
0x14ec   :  { %2056 = vrot.lane.b32.xlu0 %v2052_v40, %s3885_s5 }
0x155a   :  { %v2059_v17 = vpop.permute.xlu0 %2058 }
0x155b   :  { %v4499_v21 = vadd.f32 %v2059_v17, %v2043_v16 }
0x155c   :  { %v1920_v26 = vpop.permute.xlu1 %1919 }
0x155d   :  { %3565 = vtanh.f32 %v4499_v21  ;;  %v4503_v18 = vadd.f32 %v1920_v26, %v1912_v25  ;;  %v2298_v26 = vrot.slane %v4499_v21, 7 }
0x155e   :  { %v2057_v15 = vpop.permute.xlu0 %2056 }
0x155f   :  { %v4505_v33 = vadd.f32 %v2057_v15, %v2042_v2  ;;  %3567 = vtanh.f32 %v4503_v18 }
0x1561   :  { %3569 = vtanh.f32 %v4505_v33  ;;  %v2297_v15 = vrot.slane %v4505_v33, 7 }
0x1567   :  { %v3566_v10 = vpop.eup %3565 }
0x1568   :  { %2070 = vrot.lane.b32.xlu1 %v3566_v10, %s4670_s9 }
0x1569   :  { %v3568_v9 = vpop.eup %3567 }
0x156a   :  { %1925 = vrot.lane.b32.xlu0 %v3568_v9, %s4670_s9 }
0x156b   :  { %v3570_v36 = vpop.eup %3569 }
0x156c   :  { %2068 = vrot.lane.b32.xlu1 %v3570_v36, %s4670_s9 }
0x15da   :  { %v2071_v14 = vpop.permute.xlu1 %2070 }
0x15db   :  { %v2075_v38 = vmul.f32 %v3560_v4, %v2071_v14 }
0x15dc   :  { %v1926_v39 = vpop.permute.xlu0 %1925 }
0x15dd   :  { %v4512_v19 = vmul.f32 %v3564_v52, %v1926_v39  ;;  %v2078_v41 = vrot.slane %v2075_v38, 7  ;;  %v2198_v46 = vrot.slane %v2075_v38, 5 }
0x15de   :  { %v2069_v23 = vpop.permute.xlu1 %2068 }
0x15df   :  { %v2074_v43 = vmul.f32 %v3562_v7, %v2069_v23  ;;  %v2085_v28 = vrot.slane %v4512_v19, 2 }
0x15e1   :  { %v2197_v44 = vrot.slane %v2074_v43, 6  ;;  %v2080_v45 = vsel %vm2079_vm11, %v2078_v41, %v2074_v43  ;;  %2086 = vrot.lane.b32.xlu1 %v2085_v28, %s4670_s9 }
0x15e2   :  { %2081 = vrot.lane.b32.xlu0 %v2080_v45, %s3885_s5 }
0x15e3   :  { %v2199_v48 = vsel %vm522_vm4, %v2198_v46, %v2197_v44  ;;  %vm2498_vm4 = vcmask 39936  }
0x15e6   :  { %2200 = vrot.lane.b32.xlu0 %v2199_v48, %s3885_s5 }
0x1653   :  { %v2087_v49 = vpop.permute.xlu1 %2086 }
0x1654   :  { %v2082_v34 = vpop.permute.xlu0 %2081 }
0x1655   :  { %v2089_v32 = vsel %vm259_vm3, %v2082_v34, %v2087_v49 }
0x1656   :  { %v2091_v37 = vrot.slane %v2089_v32, 6 }
0x1658   :  { %3165 = vmatmul.mubr.msk.f32.vlgmr.msra.gmra.mrb[16].mxu1 %vm528_vm5, %v2091_v37  ;;  %v2201_v53 = vpop.permute.xlu0 %2200 }
0x1659   :  { %3176 = vmatmul.mubr.msk.f32.vlgmr.msra.gmra.mrb[18].mxu0 %vm259_vm3, %v2201_v53  ;;  %3201 = vmatprep.mubr.msk.bf16.mxu1 %vm3883_vm0, %v3882_v1 }
0x165a   :  { %3347 = vmatpush3.bf16.msra.mxu0 %v4198_v22  ;;  %3194 = vmatprep.mubr.msk.f32.mxu0 %vm3883_vm0, %v3882_v1 }
0x165b   :  { %3348 = vmatprep.subr.bf16.mxu0 %v3884_v27 }
0x165e   :  { %3350 = vmatpush3.bf16.msra.mxu0 %v4201_v24 }
0x165f   :  { %3351 = vmatprep.subr.bf16.mxu0 %v3884_v27 }
0x1662   :  { %3353 = vmatpush3.bf16.msra.mxu0 %v4206_v30 }
0x1663   :  { %3354 = vmatprep.subr.bf16.mxu0 %v3884_v27 }
0x1666   :  { %3356 = vmatpush3.bf16.msra.mxu0 %v4211_v35 }
0x172b   :  { %v2160_v55 = vpop.f32.mrb[16].mxu1 }
0x172c   :  { %v2161_v22 = vadd.f32 %v4533_v56, %v2160_v55  ;;  %v3166_v57 = vpop.f32.mrb[17].mxu1  ;;  %v2270_v58 = vpop.f32.mrb[18].mxu0 }
0x172d   :  { %v2275_v60 = vrot.slane %v2270_v58, 1  ;;  %v2276_v62 = vrot.slane %v2270_v58, 2  ;;  %v3177_v0 = vpop.f32.mrb[19].mxu0 }
0x172e   :  { %3571 = vtanh.f32 %v2161_v22  ;;  %v2804_v29 = vmul.f32 -1.442695, %v2161_v22 }
0x172f   :  { %v2279_v24 = vadd.f32 %v2275_v60, %v4182_v54  ;;  %v2280_v51 = vadd.f32 %v2276_v62, %v4185_v59 }
0x1731   :  { %3573 = vtanh.f32 %v2279_v24  ;;  %v2806_v47 = vmul.f32 -1.442695, %v2279_v24  ;;  %v2807_v3 = vmul.f32 -1.442695, %v2280_v51 }
0x1732   :  { %3575 = vtanh.f32 %v2280_v51  ;;  %v2773_v51 = vld [vmem:[#allocation17] ss:$0 sm:$0xff] }
0x1733   :  { %3577 = vpow2.f32 %v2804_v29 }
0x1734   :  { %3579 = vpow2.f32 %v2806_v47 }
0x1735   :  { %3581 = vpow2.f32 %v2807_v3 }
0x1738   :  { %v3572_v27 = vpop.eup %3571 }
0x1739   :  { %2173 = vrot.lane.b32.xlu1 %v3572_v27, %s4670_s9 }
0x173b   :  { %v3574_v30 = vpop.eup %3573 }
0x173c   :  { %v3576_v35 = vpop.eup %3575 }
0x173d   :  { %2307 = vrot.lane.b32.xlu0 %v3576_v35, %s4670_s9  ;;  %2305 = vrot.lane.b32.xlu1 %v3574_v30, %s4670_s9  ;;  %v3578_v54 = vpop.eup %3577 }
0x173e   :  { %v3580_v4 = vpop.eup %3579  ;;  %v2167_v59 = vadd.f32 1.0, %v3578_v54 }
0x173f   :  { %v3582_v5 = vpop.eup %3581  ;;  %v2287_v6 = vadd.f32 1.0, %v3580_v4 }
0x1740   :  { %3583 = vrcp.f32 %v2167_v59  ;;  %v2288_v7 = vadd.f32 1.0, %v3582_v5 }
0x1741   :  { %3585 = vrcp.f32 %v2287_v6 }
0x1742   :  { %3587 = vrcp.f32 %v2288_v7 }
0x174a   :  { %v3584_v52 = vpop.eup %3583 }
0x174b   :  { %v3586_v13 = vpop.eup %3585  ;;  %v2171_v25 = vmul.f32 %v3584_v52, %v4503_v18 }
0x174c   :  { %v3588_v40 = vpop.eup %3587  ;;  %v2301_v36 = vmul.f32 %v3586_v13, %v2297_v15 }
0x174d   :  { %v2302_v9 = vmul.f32 %v3588_v40, %v2298_v26 }
0x17ab   :  { %v2174_v8 = vpop.permute.xlu1 %2173 }
0x17ac   :  { %v2176_v12 = vmul.f32 %v3584_v52, %v2174_v8 }
0x17ae   :  { %2178 = vrot.lane.b32.xlu0 %v2176_v12, %s3885_s5 }
0x17af   :  { %v2308_v61 = vpop.permute.xlu0 %2307  ;;  %v2306_v16 = vpop.permute.xlu1 %2305 }
0x17b0   :  { %v2312_v17 = vmul.f32 %v3588_v40, %v2308_v61  ;;  %v2311_v20 = vmul.f32 %v3586_v13, %v2306_v16 }
0x17b2   :  { %2317 = vrot.lane.b32.xlu1 %v2312_v17, %s3885_s5  ;;  %2315 = vrot.lane.b32.xlu0 %v2311_v20, %s3885_s5 }
0x1820   :  { %v2179_v2 = vpop.permute.xlu0 %2178 }
0x1821   :  { %v2181_v10 = vadd.f32 %v2179_v2, %v2171_v25 }
0x1823   :  { %3589 = vtanh.f32 %v2181_v10 }
0x1824   :  { %v2318_v14 = vpop.permute.xlu1 %2317  ;;  %v2316_v38 = vpop.permute.xlu0 %2315 }
0x1825   :  { %v2322_v39 = vadd.f32 %v2318_v14, %v2302_v9  ;;  %v2321_v23 = vadd.f32 %v2316_v38, %v2301_v36 }
0x1827   :  { %3591 = vtanh.f32 %v2322_v39 }
0x1828   :  { %3593 = vtanh.f32 %v2321_v23 }
0x182d   :  { %v3590_v41 = vpop.eup %3589 }
0x182e   :  { %2184 = vrot.lane.b32.xlu1 %v3590_v41, %s4670_s9 }
0x1831   :  { %v3592_v43 = vpop.eup %3591 }
0x1832   :  { %v3594_v18 = vpop.eup %3593  ;;  %2329 = vrot.lane.b32.xlu0 %v3592_v43, %s4670_s9 }
0x1833   :  { %2327 = vrot.lane.b32.xlu1 %v3594_v18, %s4670_s9 }
0x18a0   :  { %v2185_v21 = vpop.permute.xlu1 %2184 }
0x18a1   :  { %v4550_v45 = vmul.f32 %v3584_v52, %v2185_v21 }
0x18a3   :  { %v2345_v49 = vrot.slane %v4550_v45, 1 }
0x18a4   :  { %v2330_v33 = vpop.permute.xlu0 %2329 }
0x18a5   :  { %v2334_v28 = vmul.f32 %v3588_v40, %v2330_v33  ;;  %v2328_v44 = vpop.permute.xlu1 %2327  ;;  %v2774_v33 = vld [vmem:[#allocation2] ss:$0 sm:$0xff] }
0x18a6   :  { %v2333_v46 = vmul.f32 %v3586_v13, %v2328_v44 }
0x18a7   :  { %v2337_v48 = vrot.slane %v2334_v28, 7 }
0x18a8   :  { %2338 = vrot.lane.b32.xlu0 %v2333_v46, %s3885_s5 }
0x18a9   :  { %2340 = vrot.lane.b32.xlu1 %v2337_v48, %s3885_s5 }
0x18ac   :  { %2346 = vrot.lane.b32.xlu0 %v2345_v49, %s4670_s9 }
0x191a   :  { %v2339_v34 = vpop.permute.xlu0 %2338 }
0x191b   :  { %v2341_v32 = vpop.permute.xlu1 %2340 }
0x191e   :  { %v2347_v37 = vpop.permute.xlu0 %2346 }
0x191f   :  { %v2349_v53 = vsel %vm259_vm3, %v2339_v34, %v2347_v37  ;;  %v2350_v55 = vsel %vm259_vm3, %v2341_v32, %v2347_v37 }
0x1920   :  { %v2354_v22 = vrot.slane %v2349_v53, 7  ;;  %v2355_v57 = vrot.slane %v2350_v55, 7 }
0x1922   :  { %v2356_v58 = vsel %vm2353_vm12, %v2354_v22, %v2355_v57 }
0x1923   :  { %3195 = vmatmul.mubr.msk.f32.vlgmr.msra.gmra.mrb[20].mxu0 %vm528_vm5, %v2356_v58  ;;  %vm2500_vm5 = vcmask 48128  }
0x19f6   :  { %v2425_v60 = vpop.f32.mrb[20].mxu0 }
0x19f7   :  { %v2426_v62 = vadd.f32 %v4533_v56, %v2425_v60  ;;  %v3196_v0 = vpop.f32.mrb[21].mxu0 }
0x19f9   :  { %3595 = vtanh.f32 %v2426_v62  ;;  %v2809_v27 = vmul.f32 -1.442695, %v2426_v62 }
0x19fb   :  { %3597 = vpow2.f32 %v2809_v27 }
0x1a03   :  { %v3596_v24 = vpop.eup %3595 }
0x1a04   :  { %2438 = vrot.lane.b32.xlu1 %v3596_v24, %s4670_s9 }
0x1a05   :  { %v3598_v30 = vpop.eup %3597 }
0x1a06   :  { %v2432_v35 = vadd.f32 1.0, %v3598_v30 }
0x1a08   :  { %631 = vrot.lane.b32.xlu1 %v2773_v51, %s3886_s8  ;;  %3599 = vrcp.f32 %v2432_v35 }
0x1a12   :  { %v3600_v29 = vpop.eup %3599 }
0x1a13   :  { %v2436_v5 = vmul.f32 %v3600_v29, %v2181_v10 }
0x1a76   :  { %v2439_v47 = vpop.permute.xlu1 %2438 }
0x1a77   :  { %v2441_v3 = vmul.f32 %v3600_v29, %v2439_v47 }
0x1a79   :  { %2443 = vrot.lane.b32.xlu0 %v2441_v3, %s3885_s5 }
0x1a7a   :  { %v632_v54 = vpop.permute.xlu1 %631 }
0x1a7b   :  { %v894_v56 = vmul.f32 %v4312_v50, %v632_v54  ;;  %v1411_v4 = vmul.f32 %v4412_v11, %v632_v54  ;;  %v1929_v59 = vmul.f32 %v4512_v19, %v632_v54  ;;  %v1152_v8 = vmul.f32 %v4362_v63, %v632_v54 }
0x1a7c   :  { %v1670_v12 = vmul.f32 %v4462_v31, %v632_v54  ;;  %v2188_v13 = vmul.f32 %v4550_v45, %v632_v54  ;;  %v634_v40 = vmul.f32 %v632_v54, %v4263_v42 }
0x1a7d   :  { %896 = vrot.lane.b32.xlu1 %v894_v56, %s3885_s5 }
0x1a81   :  { %1413 = vrot.lane.b32.xlu1 %v1411_v4, %s3885_s5 }
0x1a85   :  { %1931 = vrot.lane.b32.xlu1 %v1929_v59, %s3885_s5 }
0x1aeb   :  { %v2444_v6 = vpop.permute.xlu0 %2443 }
0x1aec   :  { %v2446_v7 = vadd.f32 %v2444_v6, %v2436_v5 }
0x1aee   :  { %3601 = vtanh.f32 %v2446_v7 }
0x1aef   :  { %v897_v61 = vpop.permute.xlu1 %896 }
0x1af0   :  { %v899_v23 = vsel %vm639_vm13, %v897_v61, 0.0  ;;  %v3893_v61 = vmov 1  }
0x1af1   :  { %3392 = vset.pattern.permute.xlu1 %v3893_v61 }
0x1af3   :  { %v1414_v26 = vpop.permute.xlu1 %1413 }
0x1af4   :  { %v1416_v10 = vsel %vm639_vm13, %v1414_v26, 0.0  ;;  %v3895_v26 = vmov 2  }
0x1af7   :  { %v1932_v41 = vpop.permute.xlu1 %1931 }
0x1af8   :  { %v3602_v52 = vpop.eup %3601  ;;  %v1934_v43 = vsel %vm639_vm13, %v1932_v41, 0.0 }
0x1af9   :  { %2449 = vrot.lane.b32.xlu0 %v3602_v52, %s4670_s9  ;;  %s3887_s9 = smov 2  }
0x1afd   :  { %1154 = vrot.lane.b32.xlu0 %v1152_v8, %s3885_s5 }
0x1b01   :  { %1672 = vrot.lane.b32.xlu0 %v1670_v12, %s3885_s5 }
0x1b05   :  { %2190 = vrot.lane.b32.xlu0 %v2188_v13, %s3885_s5 }
0x1b09   :  { %636 = vrot.lane.b32.xlu0 %v634_v40, %s3885_s5 }
0x1b6b   :  { %v2450_v16 = vpop.permute.xlu0 %2449 }
0x1b6c   :  { %v4577_v17 = vmul.f32 %v3600_v29, %v2450_v16  ;;  %v3894_v16 = vmov 0  }
0x1b6d   :  { %3391 = vset.pattern.permute.xlu0 %v3894_v16 }
0x1b6e   :  { %v2453_v20 = vmul.f32 %v4577_v17, %v632_v54 }
0x1b6f   :  { %v1155_v25 = vpop.permute.xlu0 %1154 }
0x1b70   :  { %v1157_v2 = vsel %vm639_vm13, %v1155_v25, 0.0  ;;  %2455 = vrot.lane.b32.xlu1 %v2453_v20, %s3885_s5 }
0x1b71   :  { %1158 = vadd.xlane.f32.xlu0 %v1157_v2 }
0x1b73   :  { %v1673_v15 = vpop.permute.xlu0 %1672 }
0x1b74   :  { %v1675_v36 = vsel %vm639_vm13, %v1673_v15, 0.0  ;;  %v3896_v15 = vmov 7  }
0x1b75   :  { %1417 = vadd.xlane.f32.xlu0 %v1416_v10  ;;  %v3897_v10 = vmov 3  }
0x1b77   :  { %v2191_v9 = vpop.permute.xlu0 %2190 }
0x1b78   :  { %v2193_v14 = vsel %vm639_vm13, %v2191_v9, 0.0  ;;  %v3898_v9 = vmov 4  }
0x1b79   :  { %1676 = vadd.xlane.f32.xlu0 %v1675_v36  ;;  %v3899_v36 = vmov 5  }
0x1b7b   :  { %v637_v38 = vpop.permute.xlu0 %636 }
0x1b7c   :  { %v640_v39 = vsel %vm639_vm13, %v637_v38, 0.0  ;;  %v3403_v38 = vld [vmem:[%s4654_s12] sm:$0xff]  }
0x1b7d   :  { %2194 = vadd.xlane.f32.xlu0 %v2193_v14  ;;  %v3900_v14 = vmov 6   ;;  %3198 = vmatpush3.bf16.msra.mxu1 %v3403_v38 }
0x1b7e   :  { %3199 = vmatprep.subr.bf16.mxu1 %v3882_v1 }
0x1b81   :  { %641 = vadd.xlane.f32.xlu0 %v640_v39  ;;  %v3404_v39 = vld [vmem:[%s4654_s12 + $0x8] sm:$0xff]  }
0x1b82   :  { %3200 = vmatpush3.bf16.msra.mxu1 %v3404_v39 }
0x1b83   :  { %3205 = vmatprep.subr.bf16.mxu1 %v3882_v1 }
0x1b94   :  { %900 = vadd.xlane.f32.xlu1 %v899_v23 }
0x1b98   :  { %1935 = vadd.xlane.f32.xlu1 %v1934_v43 }
0x1be2   :  { %v2456_v18 = vpop.permute.xlu1 %2455 }
0x1be3   :  { %v2458_v21 = vsel %vm639_vm13, %v2456_v18, 0.0 }
0x1be4   :  { %2459 = vadd.xlane.f32.xlu1 %v2458_v21 }
0x1bfe   :  { %v1159_v28 = vpop.xlane.xlu0 %1158 }
0x1bff   :  { %v1160_v44 = vadd.f32 %v2774_v33, %v1159_v28 }
0x1c01   :  { %2467 = vrot.lane.b32.xlu0 %v1160_v44, %s3887_s9 }
0x1c02   :  { %v1418_v46 = vpop.xlane.xlu0 %1417 }
0x1c03   :  { %v1419_v53 = vadd.f32 %v2774_v33, %v1418_v46 }
0x1c06   :  { %v1677_v48 = vpop.xlane.xlu0 %1676 }
0x1c07   :  { %v1678_v55 = vadd.f32 %v2774_v33, %v1677_v48 }
0x1c0a   :  { %v2195_v49 = vpop.xlane.xlu0 %2194 }
0x1c0b   :  { %v2196_v34 = vadd.f32 %v2774_v33, %v2195_v49 }
0x1c0d   :  { %2483 = vrot.lane.b32.xlu0 %v2196_v34, %s3888_s4 }
0x1c0e   :  { %v642_v24 = vpop.xlane.xlu0 %641 }
0x1c0f   :  { %v649_v27 = vadd.f32 %v2774_v33, %v642_v24 }
0x1c21   :  { %v901_v32 = vpop.xlane.xlu1 %900 }
0x1c22   :  { %v902_v37 = vadd.f32 %v2774_v33, %v901_v32 }
0x1c24   :  { %2463 = vrot.lane.b32.xlu1 %v902_v37, %s3889_s19 }
0x1c25   :  { %v1936_v22 = vpop.xlane.xlu1 %1935 }
0x1c26   :  { %v1937_v57 = vadd.f32 %v2774_v33, %v1936_v22 }
0x1c28   :  { %2471 = vrot.lane.b32.xlu1 %v1419_v53, %s3890_s20 }
0x1c2c   :  { %2475 = vrot.lane.b32.xlu1 %v1678_v55, %s3871_s27 }
0x1c30   :  { %2479 = vrot.lane.b32.xlu1 %v1937_v57, %s3891_s22 }
0x1c71   :  { %v2460_v58 = vpop.xlane.xlu1 %2459 }
0x1c72   :  { %v2461_v60 = vadd.f32 %v2774_v33, %v2460_v58 }
0x1c73   :  { %v2468_v35 = vpop.permute.xlu0 %2467 }
0x1c74   :  { %2487 = vrot.lane.b32.xlu1 %v2461_v60, %s3892_s11 }
0x1c7f   :  { %v2484_v4 = vpop.permute.xlu0 %2483 }
0x1c96   :  { %v2464_v62 = vpop.permute.xlu1 %2463 }
0x1c97   :  { %v2491_v30 = vsel %vm2490_vm14, %v649_v27, %v2464_v62 }
0x1c98   :  { %v2493_v29 = vsel %vm2492_vm15, %v2491_v30, %v2468_v35 }
0x1c9a   :  { %v2472_v0 = vpop.permute.xlu1 %2471 }
0x1c9b   :  { %v2495_v3 = vsel %vm2494_vm1, %v2493_v29, %v2472_v0 }
0x1c9e   :  { %v2476_v51 = vpop.permute.xlu1 %2475 }
0x1c9f   :  { %v2497_v54 = vsel %vm2496_vm2, %v2495_v3, %v2476_v51 }
0x1ca2   :  { %v2480_v47 = vpop.permute.xlu1 %2479 }
0x1ca3   :  { %v2499_v56 = vsel %vm2498_vm4, %v2497_v54, %v2480_v47  ;;  %v3405_v54 = vld [vmem:[%s4658_s16] sm:$0xff]  }
0x1ca4   :  { %v2501_v5 = vsel %vm2500_vm5, %v2499_v56, %v2484_v4  ;;  %v3406_v56 = vld [vmem:[%s4658_s16 + $0x8] sm:$0xff]  }
0x1ce6   :  { %v2488_v59 = vpop.permute.xlu1 %2487 }
0x1ce7   :  { %v2503_v6 = vsel %vm2502_vm6, %v2501_v5, %v2488_v59 }
0x1ce8   :  { %v2505_v7 = vsel %vm2504_vm7, %v2503_v6, -inf }
0x1ce9   :  { %2506 = vmax.xlane.f32.xlu0 %v2505_v7  ;;  %v2814_v7 = vld [vmem:[%s4656_s14] ss:$0 sm:$0xff]  ;;  %s3901_s14 = smov [#allocation20]  }
0x1cea   :  { %s2744_s28 = sshll.u32 %s3901_s14, 4  ;;  %s2745_s28 = int_to_ptr.vmem [resolvable:$true] %s2744_s28 }
0x1ceb   :  { %p3837_p11 = scmp.lt.s32.totalorder %s2745_s28, %s2745_s28 }
0x1d76   :  { %v2507_v52 = vpop.xlane.xlu0 %2506 }
0x1d77   :  { %v2508_v8 = vsub.f32 %v2503_v6, %v2507_v52 }
0x1d79   :  { %v2509_v12 = vmul.f32 1.442695, %v2508_v8  ;;  %v2815_v8 = vld [vmem:[%s4657_s15] ss:$0 sm:$0xff]  ;;  %s3832_s15 = scalar_lea.vmem %s2745_s28, 32 }
0x1d7a   :  { %p3833_p10 = scmp.ne.s32.totalorder %s2745_s28, %s3832_s15  ;;  %p3838_p12 = scmp.lt.s32.totalorder %s3832_s15, %s3832_s15 }
0x1d7b   :  { %3603 = vpow2.f32 %v2509_v12 }
0x1d7c   :  { %p3839_p13 = por %p3838_p12, %p3837_p11 }
0x1d7e   :  { %p3840_p0 = pnand %p3839_p13, %p3833_p10 }
0x1d85   :  { %v3604_v13 = vpop.eup %3603 }
0x1d86   :  { %v2511_v40 = vsel %vm2504_vm7, %v3604_v13, 0.0 }
0x1d87   :  { %2512 = vadd.xlane.f32.xlu1 %v2511_v40 }
0x1e14   :  { %v2513_v20 = vpop.xlane.xlu1 %2512 }
0x1e15   :  { %3605 = vrcp.f32 %v2513_v20 }
0x1e1f   :  { %v3606_v25 = vpop.eup %3605 }
0x1e20   :  { %v2515_v2 = vmul.f32 %v3606_v25, %v3604_v13 }
0x1e22   :  { %2524 = vperm.xlu1 %3392, %v2515_v2   ;;  %2518 = vperm.xlu0 %3391, %v2515_v2  }
0x1e26   :  { %3393 = vset.pattern.permute.xlu1 %v3895_v26  ;;  %3398 = vset.pattern.permute.xlu0 %v3896_v15 }
0x1e27   :  { %2530 = vperm.xlu1 %3393, %v2515_v2   ;;  %2560 = vperm.xlu0 %3398, %v2515_v2  }
0x1e2b   :  { %3394 = vset.pattern.permute.xlu1 %v3897_v10 }
0x1e2c   :  { %2536 = vperm.xlu1 %3394, %v2515_v2  }
0x1e30   :  { %3395 = vset.pattern.permute.xlu1 %v3898_v9 }
0x1e31   :  { %2542 = vperm.xlu1 %3395, %v2515_v2  }
0x1e35   :  { %3396 = vset.pattern.permute.xlu1 %v3899_v36 }
0x1e36   :  { %2548 = vperm.xlu1 %3396, %v2515_v2  }
0x1e3a   :  { %3397 = vset.pattern.permute.xlu1 %v3900_v14 }
0x1e3b   :  { %2554 = vperm.xlu1 %3397, %v2515_v2   ;;  %v2816_v2 = vld [vmem:[%s4659_s17] ss:$0 sm:$0xff] }
0x1ea1   :  { %v2525_v23 = vpop.permute.xlu1 %2524  ;;  %v2519_v18 = vpop.permute.xlu0 %2518 }
0x1ea2   :  { %v2527_v21 = vmul.f32 %v2525_v23, %v4312_v50  ;;  %v2521_v33 = vmul.f32 %v2519_v18, %v4263_v42 }
0x1ea4   :  { %v2528_v46 = vadd.f32 %v2527_v21, %v2521_v33 }
0x1ea6   :  { %v2531_v41 = vpop.permute.xlu1 %2530  ;;  %v2561_v22 = vpop.permute.xlu0 %2560 }
0x1ea7   :  { %v2533_v44 = vmul.f32 %v2531_v41, %v4362_v63  ;;  %v2563_v42 = vmul.f32 %v2561_v22, %v4577_v17 }
0x1ea9   :  { %v2534_v49 = vadd.f32 %v2533_v44, %v2528_v46 }
0x1eab   :  { %v2537_v43 = vpop.permute.xlu1 %2536 }
0x1eac   :  { %v2539_v48 = vmul.f32 %v2537_v43, %v4412_v11 }
0x1eae   :  { %v2540_v37 = vadd.f32 %v2539_v48, %v2534_v49 }
0x1eb0   :  { %v2543_v28 = vpop.permute.xlu1 %2542 }
0x1eb1   :  { %v2545_v34 = vmul.f32 %v2543_v28, %v4462_v31 }
0x1eb3   :  { %v2546_v55 = vadd.f32 %v2545_v34, %v2540_v37 }
0x1eb5   :  { %v2549_v32 = vpop.permute.xlu1 %2548 }
0x1eb6   :  { %v2551_v53 = vmul.f32 %v2549_v32, %v4512_v19  ;;  %v2810_v19 = vld [vmem:[#allocation18] ss:$0 sm:$0xff] }
0x1eb8   :  { %v2552_v58 = vadd.f32 %v2551_v53, %v2546_v55 }
0x1eba   :  { %v2555_v57 = vpop.permute.xlu1 %2554 }
0x1ebb   :  { %v2557_v50 = vmul.f32 %v2555_v57, %v4550_v45 }
0x1ebd   :  { %v2558_v60 = vadd.f32 %v2557_v50, %v2552_v58 }
0x1ebf   :  { %v2564_v63 = vadd.f32 %v2563_v42, %v2558_v60 }
0x1ec1   :  { %v2565_v62 = vadd.f32 %v2564_v63, %v4577_v17 }
0x1ec3   :  { %v2570_v11 = vpack.c.bf16 %v2565_v62, %v2565_v62 }
0x1ec5   :  { %2579 = vrot.lane.b32.xlu1 %v2570_v11, %s3885_s5 }
0x1f37   :  { %v2580_v31 = vpop.permute.xlu1 %2579 }
0x1f38   :  { %3202 = vmatmul.mubr.msk.bf16.vlgmr.msra.gmra.mrb[20].mxu1 %vm259_vm3, %v2580_v31 }
0x1f39   :  { %3209 = vmatprep.mubr.msk.bf16.mxu1 %vm3883_vm0, %v3882_v1  ;;  %3206 = vmatpush3.bf16.msra.mxu1 %v3405_v54 }
0x1f3a   :  { %3207 = vmatprep.subr.bf16.mxu1 %v3882_v1 }
0x1f3d   :  { %3208 = vmatpush3.bf16.msra.mxu1 %v3406_v56 }
0x200b   :  { %v2630_v0 = vpop.f32.mrb[20].mxu1 }
0x200c   :  { %v2631_v24 = vadd.f32 %v2810_v19, %v2630_v0  ;;  %v3203_v51 = vpop.f32.mrb[21].mxu1 }
0x200d   :  { %v2633_v45 = vpop.f32.mrb[22].mxu1 }
0x200e   :  { %v3204_v27 = vpop.f32.mrb[23].mxu1  ;;  %v2638_v30 = vsel %vm639_vm13, %v2631_v24, 0.0 }
0x200f   :  { %2639 = vadd.xlane.f32.xlu1 %v2638_v30 }
0x209c   :  { %v2640_v35 = vpop.xlane.xlu1 %2639 }
0x209d   :  { %v2641_v17 = vmul.f32 0.03125, %v2640_v35 }
0x209f   :  { %v2642_v29 = vsub.f32 %v2631_v24, %v2641_v17 }
0x20a1   :  { %v2643_v47 = vmul.f32 %v2642_v29, %v2642_v29 }
0x20a3   :  { %v2644_v3 = vsel %vm639_vm13, %v2643_v47, 0.0 }
0x20a4   :  { %2645 = vadd.xlane.f32.xlu0 %v2644_v3 }
0x2131   :  { %v2646_v4 = vpop.xlane.xlu0 %2645 }
0x2132   :  { %v2647_v59 = vmul.f32 0.03125, %v2646_v4 }
0x2134   :  { %v2648_v5 = vadd.f32 1e-05, %v2647_v59 }
0x2136   :  { %3607 = vrsqrt.f32 %v2648_v5 }
0x2140   :  { %v3608_v6 = vpop.eup %3607 }
0x2141   :  { %v2650_v52 = vmul.f32 %v3608_v6, %v2642_v29 }
0x2143   :  { %v2657_v12 = vmul.f32 %v2814_v7, %v2650_v52 }
0x2145   :  { %v2664_v13 = vadd.f32 %v2815_v8, %v2657_v12 }
0x2147   :  { %v2666_v40 = vmul.f32 0.70710677, %v2664_v13  ;;  %v2665_v61 = vmul.f32 0.5, %v2664_v13 }
0x2149   :  { %3609 = verf.f32 %v2666_v40 }
0x2153   :  { %v3610_v1 = vpop.eup %3609 }
0x2154   :  { %v2668_v16 = vadd.f32 1.0, %v3610_v1 }
0x2156   :  { %v2669_v20 = vmul.f32 %v2668_v16, %v2665_v61 }
0x2158   :  { %v2674_v25 = vpack.c.bf16 %v2669_v20, %v2669_v20 }
0x215a   :  { %3210 = vmatmul.mubr.msk.bf16.vlgmr.msra.gmra.mrb[24].mxu1 %vm259_vm3, %v2674_v25 }
0x222d   :  { %v2731_v26 = vpop.f32.mrb[24].mxu1 }
0x222e   :  { %v2732_v15 = vadd.f32 %v2816_v2, %v2731_v26  ;;  %v3211_v10 = vpop.f32.mrb[25].mxu1 }
0x222f   :  { %v2734_v9 = vpop.f32.mrb[26].mxu1 }
0x2230   :  { %2737 = vst [vmem:[#allocation20] sm:$0x3] %v2732_v15  ;;  %v3212_v36 = vpop.f32.mrb[27].mxu1 }
0x2231   :  { %3843 = shalt.err (!%p3840_p0)
}
0x2232   :  { %s3844_s17 = scalar_lea.hbm %s4660_s18, 32 }
0x2233   :  { %p3845_p1 = scmp.ne.s32.totalorder %s4660_s18, %s3844_s17  ;;  %p3848_p2 = scmp.lt.u32.totalorder %s3844_s17, %s4660_s18 }
0x2235   :  { %p3850_p3 = pnand %p3848_p2, %p3845_p1 }
0x2237   :  { %3853 = shalt.err (!%p3850_p3)
}
0x2238   :  { %2747 = dma.vmem_to_hbm [thread:$0]  %s2745_s28, 32, %s4660_s18, [#allocation5]  }
0x2239   :  { %3866 = dma.done.wait [#allocation5], 32  }
0x223a   :  { %3867 = vsyncadd [#allocation5], 4294967264 }
0x223b   :  { %2751 = vsyncpa [#allocation4], 1 }
0x223c   :  { %2752 = vsyncpa [#allocation7], 1 }
0x223d   :  { %2753 = vsyncpa [#allocation10], 1 }
0x223e   :  { %2754 = vsyncpa [#allocation13], 1 }
0x223f   :  { %2755 = vsyncpa [#allocation16], 1 }
0x2240   :  { %2756 = vsyncpa [#allocation19], 1 }
0x2241   :  { %2757 = vsyncpa [#allocation5], 1 }

</bundles_post_ra>
